<compile_context>
chip_gen: v7x
topology: tpu7x:2x2x1
jax: 0.10.0
libtpu: 0.0.40
codegen_flags: <defaults>
</compile_context>

<pallas_src>
import functools

import jax
import jax.numpy as jnp
from jax.experimental import pallas as pl
from jax.experimental.pallas import tpu as pltpu

F32 = jnp.float32


def _vmem():
    return pl.BlockSpec(memory_space=pltpu.MemorySpace.VMEM)


# ------------------------------------------------------------------ #
# One fused kernel for the whole post-embedding forward pass.
# ------------------------------------------------------------------ #
def _fused_kernel(emb_ref, wlstm_ref, blstm_ref,
                  wconv_ref, bconv_ref, cmask_ref,
                  fcw_ref, fcb_ref, invp_ref, fc1w_ref, fc1b_ref, price_ref,
                  anorm_ref, g1w_ref, g1b_ref, g2w_ref, g2b_ref,
                  gatw_ref, gatal_ref, gatar_ref, gatbm_ref,
                  fow_ref, fob_ref,
                  o_ref,
                  h_scr, c_scr, lf_scr, lb_scr,
                  *, hidden, k_max, num_heads):
    S, B, E = emb_ref.shape
    H = hidden
    H2 = 2 * H
    N = anorm_ref.shape[0]

    # ---------------- bidirectional LSTM (both directions fused per step) ----
    h_scr[...] = jnp.zeros_like(h_scr)
    c_scr[...] = jnp.zeros_like(c_scr)
    lf_scr[...] = jnp.zeros_like(lf_scr)      # zero tail rows double as conv padding
    lb_scr[...] = jnp.zeros_like(lb_scr)

    w_lstm = wlstm_ref[...]                   # (2E+2H, 8H), gate-major / dir-minor cols
    b_lstm = blstm_ref[...]                   # (1, 8H)

    def lstm_step(t, carry):
        x_f = emb_ref[t]                      # (B, E)  forward input x_t
        x_b = emb_ref[S - 1 - t]              # (B, E)  backward input x_{S-1-t}
        h_prev = h_scr[...]                   # (B, 2H) = [h_f | h_b]
        xin = jnp.concatenate([x_f, x_b, h_prev], axis=1)          # (B, 2E+2H)
        gates = jnp.dot(xin, w_lstm, preferred_element_type=jnp.float32) + b_lstm
        # column layout: [i_f i_b | f_f f_b | g_f g_b | o_f o_b], each block H wide
        i = jax.nn.sigmoid(gates[:, 0 * H2:1 * H2])
        f = jax.nn.sigmoid(gates[:, 1 * H2:2 * H2])
        g = jnp.tanh(gates[:, 2 * H2:3 * H2])
        o = jax.nn.sigmoid(gates[:, 3 * H2:4 * H2])
        c = f * c_scr[...] + i * g
        h = o * jnp.tanh(c)                   # (B, 2H) = [h_f | h_b]
        c_scr[...] = c
        h_scr[...] = h
        lf_scr[t] = h[:, :H]                  # forward hidden -> output position t
        lb_scr[S - 1 - t] = h[:, H:]          # backward hidden -> output position S-1-t
        return carry

    jax.lax.fori_loop(0, S, lstm_step, 0, unroll=True)

    # ---------------- Conv2d(1,F,(k,E)) + ReLU + max-pool, padded im2col ------
    lf = lf_scr[...]                          # (S+k_max-1, B, H), zero-padded tail
    lb = lb_scr[...]
    parts = []
    for j in range(k_max):                    # window offset j: features [h_f | h_b]
        parts.append(lf[j:j + S])
        parts.append(lb[j:j + S])
    win = jnp.concatenate(parts, axis=-1)     # (S, B, k_max*E)
    win2 = win.reshape(S * B, k_max * E)
    conv = jnp.dot(win2, wconv_ref[...],
                   preferred_element_type=jnp.float32) + bconv_ref[...]
    conv = conv.reshape(S, B, conv.shape[-1]) + cmask_ref[...]  # -1e30 on invalid starts
    # max-pool then ReLU == ReLU then max-pool (monotone)
    pooled = jnp.maximum(jnp.max(conv, axis=0), 0.0)            # (B, 3*num_filters)

    # ---------------- fc -> tanh -> /exp(period/30) -> fc1 -> tanh -> +price --
    h1 = jnp.tanh(jnp.dot(pooled, fcw_ref[...],
                          preferred_element_type=jnp.float32) + fcb_ref[...])
    h1 = h1 * invp_ref[...]                   # row-divide by exp(period/30)
    h2 = jnp.tanh(jnp.dot(h1, fc1w_ref[...],
                          preferred_element_type=jnp.float32) + fc1b_ref[...])
    feat = jnp.concatenate([h2, price_ref[...]], axis=1)        # (N, H+P)

    # ---------------- GraphConv (norm='both') + tanh, x2 ----------------------
    a = anorm_ref[...]
    xg = jnp.dot(feat, g1w_ref[...], preferred_element_type=jnp.float32)
    xg = jnp.tanh(jnp.dot(a, xg, preferred_element_type=jnp.float32) + g1b_ref[...])
    xg = jnp.dot(xg, g2w_ref[...], preferred_element_type=jnp.float32)
    xg = jnp.tanh(jnp.dot(a, xg, preferred_element_type=jnp.float32) + g2b_ref[...])

    # ---------------- GATConv + mean over heads + tanh + fc -------------------
    z = jnp.dot(xg, gatw_ref[...], preferred_element_type=jnp.float32)  # (N, heads*H)
    edge = a > 0.0                            # a_norm > 0 iff adjacency edge exists
    acc = jnp.zeros((N, H), jnp.float32)
    for hh in range(num_heads):               # static, unrolled (num_heads is tiny)
        zh = z[:, hh * H:(hh + 1) * H]                          # (N, H)
        al = gatal_ref[hh:hh + 1, :]                            # (1, H)
        ar = gatar_ref[hh:hh + 1, :]                            # (1, H)
        # src scores as a row (1, N) via transposed-rhs dot_general (q @ k.T style)
        el = jax.lax.dot_general(al, zh, (((1,), (1,)), ((), ())),
                                 preferred_element_type=jnp.float32)    # (1, N)
        er = jnp.sum(zh * ar, axis=-1, keepdims=True)                   # (N, 1) dst
        e = er + el                                             # (N, N) row=dst, col=src
        e = jnp.where(e > 0, e, 0.2 * e)                        # LeakyReLU(0.2)
        e = jnp.where(edge, e, -1e30)
        e = e - jnp.max(e, axis=-1, keepdims=True)
        p = jnp.exp(e)
        p = p / jnp.sum(p, axis=-1, keepdims=True)              # softmax over src
        acc = acc + jnp.dot(p, zh, preferred_element_type=jnp.float32)
    gmean = acc * (1.0 / num_heads) + gatbm_ref[...]            # mean over heads (+bias)
    outg = jnp.tanh(gmean)
    o_ref[...] = (jnp.dot(outg, fow_ref[...], preferred_element_type=jnp.float32)
                  + fob_ref[...]).astype(o_ref.dtype)


# ------------------------------------------------------------------ #
# Parameters / graph
# ------------------------------------------------------------------ #
def init_params(key, *, n_vocab, embed_dim, hidden, num_filters, filter_sizes,
                num_heads, num_classes, price_dim):
    ks = jax.random.split(key, 32)

    def nrm(k, shape, scale=0.1):
        return scale * jax.random.normal(k, shape, dtype=F32)

    G = 4 * hidden
    nk = num_filters * len(filter_sizes)
    p = {
        "embed": nrm(ks[0], (n_vocab, embed_dim), 0.5),            # weight_matrix
        # LSTM (forward / backward), stored transposed: (in, 4H), cols [i f g o]
        "w_ih_f": nrm(ks[1], (embed_dim, G)), "w_hh_f": nrm(ks[2], (hidden, G)),
        "b_f": nrm(ks[3], (G,)),
        "w_ih_b": nrm(ks[4], (embed_dim, G)), "w_hh_b": nrm(ks[5], (hidden, G)),
        "b_b": nrm(ks[6], (G,)),
        # fc / fc1
        "fc_w": nrm(ks[7], (nk, hidden)), "fc_b": nrm(ks[8], (hidden,)),
        "fc1_w": nrm(ks[9], (hidden, hidden)), "fc1_b": nrm(ks[10], (hidden,)),
        # GraphConv layers
        "g1_w": nrm(ks[11], (hidden + price_dim, hidden)), "g1_b": nrm(ks[12], (hidden,)),
        "g2_w": nrm(ks[13], (hidden, hidden)), "g2_b": nrm(ks[14], (hidden,)),
        # GAT
        "gat_w": nrm(ks[15], (hidden, num_heads * hidden)),
        "gat_al": nrm(ks[16], (num_heads, hidden)),
        "gat_ar": nrm(ks[17], (num_heads, hidden)),
        "gat_b": nrm(ks[18], (num_heads, hidden)),
        # output fc
        "fc_out_w": nrm(ks[19], (hidden, num_classes)), "fc_out_b": nrm(ks[20], (num_classes,)),
        "conv_w": {}, "conv_b": {},
    }
    for i, k in enumerate(filter_sizes):
        p["conv_w"][k] = nrm(ks[21 + 2 * i], (k * embed_dim, num_filters))
        p["conv_b"][k] = nrm(ks[22 + 2 * i], (num_filters,))
    return p


def make_graph(n):
    # deterministic ring graph + self loops (symmetric)
    idx = jnp.arange(n)
    adj = jnp.zeros((n, n), F32)
    adj = adj.at[idx, idx].set(1.0)
    adj = adj.at[idx, (idx + 1) % n].set(1.0)
    adj = adj.at[idx, (idx - 1) % n].set(1.0)
    return adj


# ------------------------------------------------------------------ #
# One-time parameter preparation: fuse LSTM directions into a single 128-lane
# gate matrix, fuse conv weights of all filter sizes, precompute a_norm, etc.
# ------------------------------------------------------------------ #
def prepare_model(params, adj, *, hidden, filter_sizes, num_heads, seq_len):
    H = hidden
    E = params["embed"].shape[1]
    k_max = max(filter_sizes)
    nf = params["conv_w"][filter_sizes[0]].shape[1]
    nco = nf * len(filter_sizes)
    S = seq_len
    assert S >= k_max, "sequence length must be >= largest conv filter size"
    assert E == 2 * H, "embed_dim must equal 2*hidden (as in the original module)"

    # fused biLSTM weight: rows [x_f(E) | x_b(E) | h_f(H) | h_b(H)],
    # columns gate-major / direction-minor: [i_f i_b f_f f_b g_f g_b o_f o_b]
    W = jnp.zeros((2 * E + 2 * H, 8 * H), F32)
    bv = jnp.zeros((8 * H,), F32)
    for g in range(4):                        # PyTorch gate order i, f, g, o
        cf = slice(2 * H * g, 2 * H * g + H)
        cb = slice(2 * H * g + H, 2 * H * (g + 1))
        gi = slice(g * H, (g + 1) * H)
        W = W.at[0:E, cf].set(params["w_ih_f"][:, gi])
        W = W.at[E:2 * E, cb].set(params["w_ih_b"][:, gi])
        W = W.at[2 * E:2 * E + H, cf].set(params["w_hh_f"][:, gi])
        W = W.at[2 * E + H:2 * E + 2 * H, cb].set(params["w_hh_b"][:, gi])
        bv = bv.at[cf].set(params["b_f"][gi])
        bv = bv.at[cb].set(params["b_b"][gi])

    # fused conv weight / bias (windows padded to k_max) + validity mask
    Wc = jnp.zeros((k_max * E, nco), F32)
    bc = jnp.zeros((nco,), F32)
    cmask = jnp.zeros((S, 1, nco), F32)
    for idx, k in enumerate(filter_sizes):
        cols = slice(idx * nf, (idx + 1) * nf)
        Wc = Wc.at[0:k * E, cols].set(params["conv_w"][k])
        bc = bc.at[cols].set(params["conv_b"][k])
        invalid = jnp.arange(S) > (S - k)                 # window start out of range
        col_mask = jnp.where(invalid[:, None], -1e30, 0.0)
        cmask = cmask.at[:, 0, cols].set(jnp.broadcast_to(col_mask, (S, nf)))

    deg = adj.sum(axis=1)
    dinv = 1.0 / jnp.sqrt(deg)
    a_norm = (adj * dinv[:, None] * dinv[None, :]).astype(F32)

    return {
        "embed": params["embed"].astype(F32),
        "w_lstm": W, "b_lstm": bv.reshape(1, 8 * H),
        "w_conv": Wc, "b_conv": bc.reshape(1, nco), "c_mask": cmask,
        "fc_w": params["fc_w"].astype(F32), "fc_b": params["fc_b"].reshape(1, -1).astype(F32),
        "fc1_w": params["fc1_w"].astype(F32), "fc1_b": params["fc1_b"].reshape(1, -1).astype(F32),
        "a_norm": a_norm,
        "g1_w": params["g1_w"].astype(F32), "g1_b": params["g1_b"].reshape(1, -1).astype(F32),
        "g2_w": params["g2_w"].astype(F32), "g2_b": params["g2_b"].reshape(1, -1).astype(F32),
        "gat_w": params["gat_w"].astype(F32),
        "gat_al": params["gat_al"].astype(F32), "gat_ar": params["gat_ar"].astype(F32),
        # mean over heads commutes with the per-head bias add -> pre-average it
        "gat_b_mean": jnp.mean(params["gat_b"], axis=0, keepdims=True).astype(F32),
        "fc_out_w": params["fc_out_w"].astype(F32),
        "fc_out_b": params["fc_out_b"].reshape(1, -1).astype(F32),
    }


# ------------------------------------------------------------------ #
# Forward pass: embedding gather + period scaling in XLA, everything else in
# one fused Pallas kernel.
# ------------------------------------------------------------------ #
def graph_model_forward(prep, x_tokens, period, price, *, hidden, k_max, num_heads):
    B, S = x_tokens.shape
    num_classes = prep["fc_out_w"].shape[1]

    emb = jnp.take(prep["embed"], x_tokens.T, axis=0)            # (S, B, E)
    inv_period = jnp.exp(-period.astype(F32) / 30.0).reshape(B, 1)

    kernel = functools.partial(_fused_kernel, hidden=hidden, k_max=k_max,
                               num_heads=num_heads)
    return pl.pallas_call(
        kernel,
        out_shape=jax.ShapeDtypeStruct((B, num_classes), F32),
        in_specs=[_vmem()] * 23,
        out_specs=_vmem(),
        scratch_shapes=[
            pltpu.VMEM((B, 2 * hidden), F32),                    # h_cat
            pltpu.VMEM((B, 2 * hidden), F32),                    # c_cat
            pltpu.VMEM((S + k_max - 1, B, hidden), F32),         # fwd LSTM out (+pad)
            pltpu.VMEM((S + k_max - 1, B, hidden), F32),         # bwd LSTM out (+pad)
        ],
    )(emb, prep["w_lstm"], prep["b_lstm"],
      prep["w_conv"], prep["b_conv"], prep["c_mask"],
      prep["fc_w"], prep["fc_b"], inv_period, prep["fc1_w"], prep["fc1_b"],
      price.astype(F32),
      prep["a_norm"], prep["g1_w"], prep["g1_b"], prep["g2_w"], prep["g2_b"],
      prep["gat_w"], prep["gat_al"], prep["gat_ar"], prep["gat_b_mean"],
      prep["fc_out_w"], prep["fc_out_b"])


# ------------------------------------------------------------------ #
if __name__ == "__main__":
    # embed_dim must equal 2*hidden for the original squeeze(3) in conv_and_pool
    # to be valid; price has 4 features because conv1 takes hidden_size + 4.
    B = 8              # batch == number of graph nodes
    S = 12             # sequence length
    n_vocab = 50
    hidden = 16
    embed_dim = 2 * hidden
    num_filters = 8
    filter_sizes = (2, 3, 4)
    num_heads = 2
    num_classes = 3
    price_dim = 4

    key = jax.random.PRNGKey(0)
    k_par, k_x, k_per, k_pr = jax.random.split(key, 4)

    params = init_params(k_par, n_vocab=n_vocab, embed_dim=embed_dim, hidden=hidden,
                         num_filters=num_filters, filter_sizes=filter_sizes,
                         num_heads=num_heads, num_classes=num_classes,
                         price_dim=price_dim)
    adj = make_graph(B)
    prep = prepare_model(params, adj, hidden=hidden, filter_sizes=filter_sizes,
                         num_heads=num_heads, seq_len=S)

    x_tokens = jax.random.randint(k_x, (B, S), 0, n_vocab, dtype=jnp.int32)
    period = jax.random.uniform(k_per, (B,), dtype=F32, minval=1.0, maxval=30.0)
    price = jax.random.normal(k_pr, (B, price_dim), dtype=F32)

    fwd = jax.jit(functools.partial(graph_model_forward, hidden=hidden,
                                    k_max=max(filter_sizes), num_heads=num_heads))
    out = jax.block_until_ready(fwd(prep, x_tokens, period, price))
    assert out.shape == (B, num_classes)
    print("KERNEL_OK")
</pallas_src>

<mosaic_0001>
module attributes {stable_mosaic.version = 11 : i64} {
  func.func @_fused_kernel(%arg0: memref<12x8x32xf32, #tpu.memory_space<vmem>>, %arg1: memref<96x128xf32, #tpu.memory_space<vmem>>, %arg2: memref<1x128xf32, #tpu.memory_space<vmem>>, %arg3: memref<128x24xf32, #tpu.memory_space<vmem>>, %arg4: memref<1x24xf32, #tpu.memory_space<vmem>>, %arg5: memref<12x1x24xf32, #tpu.memory_space<vmem>>, %arg6: memref<24x16xf32, #tpu.memory_space<vmem>>, %arg7: memref<1x16xf32, #tpu.memory_space<vmem>>, %arg8: memref<8x1xf32, #tpu.memory_space<vmem>>, %arg9: memref<16x16xf32, #tpu.memory_space<vmem>>, %arg10: memref<1x16xf32, #tpu.memory_space<vmem>>, %arg11: memref<8x4xf32, #tpu.memory_space<vmem>>, %arg12: memref<8x8xf32, #tpu.memory_space<vmem>>, %arg13: memref<20x16xf32, #tpu.memory_space<vmem>>, %arg14: memref<1x16xf32, #tpu.memory_space<vmem>>, %arg15: memref<16x16xf32, #tpu.memory_space<vmem>>, %arg16: memref<1x16xf32, #tpu.memory_space<vmem>>, %arg17: memref<16x32xf32, #tpu.memory_space<vmem>>, %arg18: memref<2x16xf32, #tpu.memory_space<vmem>>, %arg19: memref<2x16xf32, #tpu.memory_space<vmem>>, %arg20: memref<1x16xf32, #tpu.memory_space<vmem>>, %arg21: memref<16x3xf32, #tpu.memory_space<vmem>>, %arg22: memref<1x3xf32, #tpu.memory_space<vmem>>, %arg23: memref<8x3xf32, #tpu.memory_space<vmem>>, %arg24: memref<8x32xf32, #tpu.memory_space<vmem>>, %arg25: memref<8x32xf32, #tpu.memory_space<vmem>>, %arg26: memref<15x8x16xf32, #tpu.memory_space<vmem>>, %arg27: memref<15x8x16xf32, #tpu.memory_space<vmem>>) attributes {dimension_semantics = [], scalar_prefetch = 0 : i64, scratch_operands = 4 : i64, tpu.core_type = #tpu.core_type<tc>} {
    %cst = arith.constant 0.000000e+00 : f32
    %0 = vector.broadcast %cst : f32 to vector<8x32xf32>
    %c0 = arith.constant 0 : index
    %c0_0 = arith.constant 0 : index
    %1 = vector.load %arg24[%c0, %c0_0] : memref<8x32xf32, #tpu.memory_space<vmem>>, vector<8x32xf32>
    tpu.vector_store %arg24[%c0, %c0_0], %0 {strides = array<i32>} : memref<8x32xf32, #tpu.memory_space<vmem>>, vector<8x32xf32>,
    %cst_1 = arith.constant 0.000000e+00 : f32
    %2 = vector.broadcast %cst_1 : f32 to vector<8x32xf32>
    %c0_2 = arith.constant 0 : index
    %c0_3 = arith.constant 0 : index
    %3 = vector.load %arg25[%c0_2, %c0_3] : memref<8x32xf32, #tpu.memory_space<vmem>>, vector<8x32xf32>
    tpu.vector_store %arg25[%c0_2, %c0_3], %2 {strides = array<i32>} : memref<8x32xf32, #tpu.memory_space<vmem>>, vector<8x32xf32>,
    %cst_4 = arith.constant 0.000000e+00 : f32
    %4 = vector.broadcast %cst_4 : f32 to vector<15x8x16xf32>
    %c0_5 = arith.constant 0 : index
    %c0_6 = arith.constant 0 : index
    %c0_7 = arith.constant 0 : index
    %5 = vector.load %arg26[%c0_5, %c0_6, %c0_7] : memref<15x8x16xf32, #tpu.memory_space<vmem>>, vector<15x8x16xf32>
    tpu.vector_store %arg26[%c0_5, %c0_6, %c0_7], %4 {strides = array<i32>} : memref<15x8x16xf32, #tpu.memory_space<vmem>>, vector<15x8x16xf32>,
    %cst_8 = arith.constant 0.000000e+00 : f32
    %6 = vector.broadcast %cst_8 : f32 to vector<15x8x16xf32>
    %c0_9 = arith.constant 0 : index
    %c0_10 = arith.constant 0 : index
    %c0_11 = arith.constant 0 : index
    %7 = vector.load %arg27[%c0_9, %c0_10, %c0_11] : memref<15x8x16xf32, #tpu.memory_space<vmem>>, vector<15x8x16xf32>
    tpu.vector_store %arg27[%c0_9, %c0_10, %c0_11], %6 {strides = array<i32>} : memref<15x8x16xf32, #tpu.memory_space<vmem>>, vector<15x8x16xf32>,
    %c0_12 = arith.constant 0 : index
    %c0_13 = arith.constant 0 : index
    %8 = vector.load %arg1[%c0_12, %c0_13] : memref<96x128xf32, #tpu.memory_space<vmem>>, vector<96x128xf32>
    %c0_14 = arith.constant 0 : index
    %c0_15 = arith.constant 0 : index
    %9 = vector.load %arg2[%c0_14, %c0_15] : memref<1x128xf32, #tpu.memory_space<vmem>>, vector<1x128xf32>
    %c0_i32 = arith.constant 0 : i32
    %10 = arith.index_cast %c0_i32 : i32 to index
    %c0_16 = arith.constant 0 : index
    %c0_17 = arith.constant 0 : index
    %11 = vector.load %arg0[%10, %c0_16, %c0_17] : memref<12x8x32xf32, #tpu.memory_space<vmem>>, vector<1x8x32xf32>
    %12 = vector.shape_cast %11 : vector<1x8x32xf32> to vector<8x32xf32>
    %c11_i32 = arith.constant 11 : i32
    %13 = arith.subi %c11_i32, %c0_i32 : i32
    %14 = arith.index_cast %13 : i32 to index
    %c0_18 = arith.constant 0 : index
    %c0_19 = arith.constant 0 : index
    %15 = vector.load %arg0[%14, %c0_18, %c0_19] : memref<12x8x32xf32, #tpu.memory_space<vmem>>, vector<1x8x32xf32>
    %16 = vector.shape_cast %15 : vector<1x8x32xf32> to vector<8x32xf32>
    %c0_20 = arith.constant 0 : index
    %c0_21 = arith.constant 0 : index
    %17 = vector.load %arg24[%c0_20, %c0_21] : memref<8x32xf32, #tpu.memory_space<vmem>>, vector<8x32xf32>
    %18 = tpu.concatenate %12, %16, %17 in 1 : vector<8x32xf32>, vector<8x32xf32>, vector<8x32xf32> -> vector<8x96xf32>
    %cst_22 = arith.constant dense<0.000000e+00> : vector<8x128xf32>
    %19 = tpu.matmul %18, %8, %cst_22 {dimension_numbers = #tpu.dot_dimension_numbers<[1], [0], [0], [1], [0, 0, 1, 1], [], []>} : vector<8x96xf32>, vector<96x128xf32>, vector<8x128xf32> -> vector<8x128xf32>
    %20 = vector.broadcast %9 : vector<1x128xf32> to vector<8x128xf32>
    %21 = arith.addf %19, %20 : vector<8x128xf32>
    %22 = vector.extract_strided_slice %21 {offsets = [0, 0], sizes = [8, 32], strides = [1, 1]} : vector<8x128xf32> to vector<8x32xf32>
    %23 = arith.negf %22 : vector<8x32xf32>
    %24 = math.exp %23 : vector<8x32xf32>
    %cst_23 = arith.constant 1.000000e+00 : f32
    %25 = vector.broadcast %cst_23 : f32 to vector<8x32xf32>
    %26 = arith.addf %25, %24 : vector<8x32xf32>
    %27 = arith.divf %25, %26 : vector<8x32xf32>
    %28 = vector.extract_strided_slice %21 {offsets = [0, 32], sizes = [8, 32], strides = [1, 1]} : vector<8x128xf32> to vector<8x32xf32>
    %29 = arith.negf %28 : vector<8x32xf32>
    %30 = math.exp %29 : vector<8x32xf32>
    %cst_24 = arith.constant 1.000000e+00 : f32
    %31 = vector.broadcast %cst_24 : f32 to vector<8x32xf32>
    %32 = arith.addf %31, %30 : vector<8x32xf32>
    %33 = arith.divf %31, %32 : vector<8x32xf32>
    %34 = vector.extract_strided_slice %21 {offsets = [0, 64], sizes = [8, 32], strides = [1, 1]} : vector<8x128xf32> to vector<8x32xf32>
    %35 = math.tanh %34 : vector<8x32xf32>
    %36 = vector.extract_strided_slice %21 {offsets = [0, 96], sizes = [8, 32], strides = [1, 1]} : vector<8x128xf32> to vector<8x32xf32>
    %37 = arith.negf %36 : vector<8x32xf32>
    %38 = math.exp %37 : vector<8x32xf32>
    %cst_25 = arith.constant 1.000000e+00 : f32
    %39 = vector.broadcast %cst_25 : f32 to vector<8x32xf32>
    %40 = arith.addf %39, %38 : vector<8x32xf32>
    %41 = arith.divf %39, %40 : vector<8x32xf32>
    %c0_26 = arith.constant 0 : index
    %c0_27 = arith.constant 0 : index
    %42 = vector.load %arg25[%c0_26, %c0_27] : memref<8x32xf32, #tpu.memory_space<vmem>>, vector<8x32xf32>
    %43 = arith.mulf %33, %42 : vector<8x32xf32>
    %44 = arith.mulf %27, %35 : vector<8x32xf32>
    %45 = arith.addf %43, %44 : vector<8x32xf32>
    %46 = math.tanh %45 : vector<8x32xf32>
    %47 = arith.mulf %41, %46 : vector<8x32xf32>
    %c0_28 = arith.constant 0 : index
    %c0_29 = arith.constant 0 : index
    %48 = vector.load %arg25[%c0_28, %c0_29] : memref<8x32xf32, #tpu.memory_space<vmem>>, vector<8x32xf32>
    tpu.vector_store %arg25[%c0_28, %c0_29], %45 {strides = array<i32>} : memref<8x32xf32, #tpu.memory_space<vmem>>, vector<8x32xf32>,
    %c0_30 = arith.constant 0 : index
    %c0_31 = arith.constant 0 : index
    %49 = vector.load %arg24[%c0_30, %c0_31] : memref<8x32xf32, #tpu.memory_space<vmem>>, vector<8x32xf32>
    tpu.vector_store %arg24[%c0_30, %c0_31], %47 {strides = array<i32>} : memref<8x32xf32, #tpu.memory_space<vmem>>, vector<8x32xf32>,
    %50 = vector.extract_strided_slice %47 {offsets = [0, 0], sizes = [8, 16], strides = [1, 1]} : vector<8x32xf32> to vector<8x16xf32>
    %51 = arith.index_cast %c0_i32 : i32 to index
    %c0_32 = arith.constant 0 : index
    %c0_33 = arith.constant 0 : index
    %52 = vector.load %arg26[%51, %c0_32, %c0_33] : memref<15x8x16xf32, #tpu.memory_space<vmem>>, vector<1x8x16xf32>
    %53 = vector.shape_cast %52 : vector<1x8x16xf32> to vector<8x16xf32>
    %54 = vector.shape_cast %50 : vector<8x16xf32> to vector<1x8x16xf32>
    tpu.vector_store %arg26[%51, %c0_32, %c0_33], %54 {strides = array<i32>} : memref<15x8x16xf32, #tpu.memory_space<vmem>>, vector<1x8x16xf32>,
    %55 = vector.extract_strided_slice %47 {offsets = [0, 16], sizes = [8, 16], strides = [1, 1]} : vector<8x32xf32> to vector<8x16xf32>
    %c11_i32_34 = arith.constant 11 : i32
    %56 = arith.subi %c11_i32_34, %c0_i32 : i32
    %57 = arith.index_cast %56 : i32 to index
    %c0_35 = arith.constant 0 : index
    %c0_36 = arith.constant 0 : index
    %58 = vector.load %arg27[%57, %c0_35, %c0_36] : memref<15x8x16xf32, #tpu.memory_space<vmem>>, vector<1x8x16xf32>
    %59 = vector.shape_cast %58 : vector<1x8x16xf32> to vector<8x16xf32>
    %60 = vector.shape_cast %55 : vector<8x16xf32> to vector<1x8x16xf32>
    tpu.vector_store %arg27[%57, %c0_35, %c0_36], %60 {strides = array<i32>} : memref<15x8x16xf32, #tpu.memory_space<vmem>>, vector<1x8x16xf32>,
    %c1_i32 = arith.constant 1 : i32
    %61 = arith.index_cast %c1_i32 : i32 to index
    %c0_37 = arith.constant 0 : index
    %c0_38 = arith.constant 0 : index
    %62 = vector.load %arg0[%61, %c0_37, %c0_38] : memref<12x8x32xf32, #tpu.memory_space<vmem>>, vector<1x8x32xf32>
    %63 = vector.shape_cast %62 : vector<1x8x32xf32> to vector<8x32xf32>
    %c11_i32_39 = arith.constant 11 : i32
    %64 = arith.subi %c11_i32_39, %c1_i32 : i32
    %65 = arith.index_cast %64 : i32 to index
    %c0_40 = arith.constant 0 : index
    %c0_41 = arith.constant 0 : index
    %66 = vector.load %arg0[%65, %c0_40, %c0_41] : memref<12x8x32xf32, #tpu.memory_space<vmem>>, vector<1x8x32xf32>
    %67 = vector.shape_cast %66 : vector<1x8x32xf32> to vector<8x32xf32>
    %c0_42 = arith.constant 0 : index
    %c0_43 = arith.constant 0 : index
    %68 = vector.load %arg24[%c0_42, %c0_43] : memref<8x32xf32, #tpu.memory_space<vmem>>, vector<8x32xf32>
    %69 = tpu.concatenate %63, %67, %68 in 1 : vector<8x32xf32>, vector<8x32xf32>, vector<8x32xf32> -> vector<8x96xf32>
    %cst_44 = arith.constant dense<0.000000e+00> : vector<8x128xf32>
    %70 = tpu.matmul %69, %8, %cst_44 {dimension_numbers = #tpu.dot_dimension_numbers<[1], [0], [0], [1], [0, 0, 1, 1], [], []>} : vector<8x96xf32>, vector<96x128xf32>, vector<8x128xf32> -> vector<8x128xf32>
    %71 = vector.broadcast %9 : vector<1x128xf32> to vector<8x128xf32>
    %72 = arith.addf %70, %71 : vector<8x128xf32>
    %73 = vector.extract_strided_slice %72 {offsets = [0, 0], sizes = [8, 32], strides = [1, 1]} : vector<8x128xf32> to vector<8x32xf32>
    %74 = arith.negf %73 : vector<8x32xf32>
    %75 = math.exp %74 : vector<8x32xf32>
    %cst_45 = arith.constant 1.000000e+00 : f32
    %76 = vector.broadcast %cst_45 : f32 to vector<8x32xf32>
    %77 = arith.addf %76, %75 : vector<8x32xf32>
    %78 = arith.divf %76, %77 : vector<8x32xf32>
    %79 = vector.extract_strided_slice %72 {offsets = [0, 32], sizes = [8, 32], strides = [1, 1]} : vector<8x128xf32> to vector<8x32xf32>
    %80 = arith.negf %79 : vector<8x32xf32>
    %81 = math.exp %80 : vector<8x32xf32>
    %cst_46 = arith.constant 1.000000e+00 : f32
    %82 = vector.broadcast %cst_46 : f32 to vector<8x32xf32>
    %83 = arith.addf %82, %81 : vector<8x32xf32>
    %84 = arith.divf %82, %83 : vector<8x32xf32>
    %85 = vector.extract_strided_slice %72 {offsets = [0, 64], sizes = [8, 32], strides = [1, 1]} : vector<8x128xf32> to vector<8x32xf32>
    %86 = math.tanh %85 : vector<8x32xf32>
    %87 = vector.extract_strided_slice %72 {offsets = [0, 96], sizes = [8, 32], strides = [1, 1]} : vector<8x128xf32> to vector<8x32xf32>
    %88 = arith.negf %87 : vector<8x32xf32>
    %89 = math.exp %88 : vector<8x32xf32>
    %cst_47 = arith.constant 1.000000e+00 : f32
    %90 = vector.broadcast %cst_47 : f32 to vector<8x32xf32>
    %91 = arith.addf %90, %89 : vector<8x32xf32>
    %92 = arith.divf %90, %91 : vector<8x32xf32>
    %c0_48 = arith.constant 0 : index
    %c0_49 = arith.constant 0 : index
    %93 = vector.load %arg25[%c0_48, %c0_49] : memref<8x32xf32, #tpu.memory_space<vmem>>, vector<8x32xf32>
    %94 = arith.mulf %84, %93 : vector<8x32xf32>
    %95 = arith.mulf %78, %86 : vector<8x32xf32>
    %96 = arith.addf %94, %95 : vector<8x32xf32>
    %97 = math.tanh %96 : vector<8x32xf32>
    %98 = arith.mulf %92, %97 : vector<8x32xf32>
    %c0_50 = arith.constant 0 : index
    %c0_51 = arith.constant 0 : index
    %99 = vector.load %arg25[%c0_50, %c0_51] : memref<8x32xf32, #tpu.memory_space<vmem>>, vector<8x32xf32>
    tpu.vector_store %arg25[%c0_50, %c0_51], %96 {strides = array<i32>} : memref<8x32xf32, #tpu.memory_space<vmem>>, vector<8x32xf32>,
    %c0_52 = arith.constant 0 : index
    %c0_53 = arith.constant 0 : index
    %100 = vector.load %arg24[%c0_52, %c0_53] : memref<8x32xf32, #tpu.memory_space<vmem>>, vector<8x32xf32>
    tpu.vector_store %arg24[%c0_52, %c0_53], %98 {strides = array<i32>} : memref<8x32xf32, #tpu.memory_space<vmem>>, vector<8x32xf32>,
    %101 = vector.extract_strided_slice %98 {offsets = [0, 0], sizes = [8, 16], strides = [1, 1]} : vector<8x32xf32> to vector<8x16xf32>
    %102 = arith.index_cast %c1_i32 : i32 to index
    %c0_54 = arith.constant 0 : index
    %c0_55 = arith.constant 0 : index
    %103 = vector.load %arg26[%102, %c0_54, %c0_55] : memref<15x8x16xf32, #tpu.memory_space<vmem>>, vector<1x8x16xf32>
    %104 = vector.shape_cast %103 : vector<1x8x16xf32> to vector<8x16xf32>
    %105 = vector.shape_cast %101 : vector<8x16xf32> to vector<1x8x16xf32>
    tpu.vector_store %arg26[%102, %c0_54, %c0_55], %105 {strides = array<i32>} : memref<15x8x16xf32, #tpu.memory_space<vmem>>, vector<1x8x16xf32>,
    %106 = vector.extract_strided_slice %98 {offsets = [0, 16], sizes = [8, 16], strides = [1, 1]} : vector<8x32xf32> to vector<8x16xf32>
    %c11_i32_56 = arith.constant 11 : i32
    %107 = arith.subi %c11_i32_56, %c1_i32 : i32
    %108 = arith.index_cast %107 : i32 to index
    %c0_57 = arith.constant 0 : index
    %c0_58 = arith.constant 0 : index
    %109 = vector.load %arg27[%108, %c0_57, %c0_58] : memref<15x8x16xf32, #tpu.memory_space<vmem>>, vector<1x8x16xf32>
    %110 = vector.shape_cast %109 : vector<1x8x16xf32> to vector<8x16xf32>
    %111 = vector.shape_cast %106 : vector<8x16xf32> to vector<1x8x16xf32>
    tpu.vector_store %arg27[%108, %c0_57, %c0_58], %111 {strides = array<i32>} : memref<15x8x16xf32, #tpu.memory_space<vmem>>, vector<1x8x16xf32>,
    %c2_i32 = arith.constant 2 : i32
    %112 = arith.index_cast %c2_i32 : i32 to index
    %c0_59 = arith.constant 0 : index
    %c0_60 = arith.constant 0 : index
    %113 = vector.load %arg0[%112, %c0_59, %c0_60] : memref<12x8x32xf32, #tpu.memory_space<vmem>>, vector<1x8x32xf32>
    %114 = vector.shape_cast %113 : vector<1x8x32xf32> to vector<8x32xf32>
    %c11_i32_61 = arith.constant 11 : i32
    %115 = arith.subi %c11_i32_61, %c2_i32 : i32
    %116 = arith.index_cast %115 : i32 to index
    %c0_62 = arith.constant 0 : index
    %c0_63 = arith.constant 0 : index
    %117 = vector.load %arg0[%116, %c0_62, %c0_63] : memref<12x8x32xf32, #tpu.memory_space<vmem>>, vector<1x8x32xf32>
    %118 = vector.shape_cast %117 : vector<1x8x32xf32> to vector<8x32xf32>
    %c0_64 = arith.constant 0 : index
    %c0_65 = arith.constant 0 : index
    %119 = vector.load %arg24[%c0_64, %c0_65] : memref<8x32xf32, #tpu.memory_space<vmem>>, vector<8x32xf32>
    %120 = tpu.concatenate %114, %118, %119 in 1 : vector<8x32xf32>, vector<8x32xf32>, vector<8x32xf32> -> vector<8x96xf32>
    %cst_66 = arith.constant dense<0.000000e+00> : vector<8x128xf32>
    %121 = tpu.matmul %120, %8, %cst_66 {dimension_numbers = #tpu.dot_dimension_numbers<[1], [0], [0], [1], [0, 0, 1, 1], [], []>} : vector<8x96xf32>, vector<96x128xf32>, vector<8x128xf32> -> vector<8x128xf32>
    %122 = vector.broadcast %9 : vector<1x128xf32> to vector<8x128xf32>
    %123 = arith.addf %121, %122 : vector<8x128xf32>
    %124 = vector.extract_strided_slice %123 {offsets = [0, 0], sizes = [8, 32], strides = [1, 1]} : vector<8x128xf32> to vector<8x32xf32>
    %125 = arith.negf %124 : vector<8x32xf32>
    %126 = math.exp %125 : vector<8x32xf32>
    %cst_67 = arith.constant 1.000000e+00 : f32
    %127 = vector.broadcast %cst_67 : f32 to vector<8x32xf32>
    %128 = arith.addf %127, %126 : vector<8x32xf32>
    %129 = arith.divf %127, %128 : vector<8x32xf32>
    %130 = vector.extract_strided_slice %123 {offsets = [0, 32], sizes = [8, 32], strides = [1, 1]} : vector<8x128xf32> to vector<8x32xf32>
    %131 = arith.negf %130 : vector<8x32xf32>
    %132 = math.exp %131 : vector<8x32xf32>
    %cst_68 = arith.constant 1.000000e+00 : f32
    %133 = vector.broadcast %cst_68 : f32 to vector<8x32xf32>
    %134 = arith.addf %133, %132 : vector<8x32xf32>
    %135 = arith.divf %133, %134 : vector<8x32xf32>
    %136 = vector.extract_strided_slice %123 {offsets = [0, 64], sizes = [8, 32], strides = [1, 1]} : vector<8x128xf32> to vector<8x32xf32>
    %137 = math.tanh %136 : vector<8x32xf32>
    %138 = vector.extract_strided_slice %123 {offsets = [0, 96], sizes = [8, 32], strides = [1, 1]} : vector<8x128xf32> to vector<8x32xf32>
    %139 = arith.negf %138 : vector<8x32xf32>
    %140 = math.exp %139 : vector<8x32xf32>
    %cst_69 = arith.constant 1.000000e+00 : f32
    %141 = vector.broadcast %cst_69 : f32 to vector<8x32xf32>
    %142 = arith.addf %141, %140 : vector<8x32xf32>
    %143 = arith.divf %141, %142 : vector<8x32xf32>
    %c0_70 = arith.constant 0 : index
    %c0_71 = arith.constant 0 : index
    %144 = vector.load %arg25[%c0_70, %c0_71] : memref<8x32xf32, #tpu.memory_space<vmem>>, vector<8x32xf32>
    %145 = arith.mulf %135, %144 : vector<8x32xf32>
    %146 = arith.mulf %129, %137 : vector<8x32xf32>
    %147 = arith.addf %145, %146 : vector<8x32xf32>
    %148 = math.tanh %147 : vector<8x32xf32>
    %149 = arith.mulf %143, %148 : vector<8x32xf32>
    %c0_72 = arith.constant 0 : index
    %c0_73 = arith.constant 0 : index
    %150 = vector.load %arg25[%c0_72, %c0_73] : memref<8x32xf32, #tpu.memory_space<vmem>>, vector<8x32xf32>
    tpu.vector_store %arg25[%c0_72, %c0_73], %147 {strides = array<i32>} : memref<8x32xf32, #tpu.memory_space<vmem>>, vector<8x32xf32>,
    %c0_74 = arith.constant 0 : index
    %c0_75 = arith.constant 0 : index
    %151 = vector.load %arg24[%c0_74, %c0_75] : memref<8x32xf32, #tpu.memory_space<vmem>>, vector<8x32xf32>
    tpu.vector_store %arg24[%c0_74, %c0_75], %149 {strides = array<i32>} : memref<8x32xf32, #tpu.memory_space<vmem>>, vector<8x32xf32>,
    %152 = vector.extract_strided_slice %149 {offsets = [0, 0], sizes = [8, 16], strides = [1, 1]} : vector<8x32xf32> to vector<8x16xf32>
    %153 = arith.index_cast %c2_i32 : i32 to index
    %c0_76 = arith.constant 0 : index
    %c0_77 = arith.constant 0 : index
    %154 = vector.load %arg26[%153, %c0_76, %c0_77] : memref<15x8x16xf32, #tpu.memory_space<vmem>>, vector<1x8x16xf32>
    %155 = vector.shape_cast %154 : vector<1x8x16xf32> to vector<8x16xf32>
    %156 = vector.shape_cast %152 : vector<8x16xf32> to vector<1x8x16xf32>
    tpu.vector_store %arg26[%153, %c0_76, %c0_77], %156 {strides = array<i32>} : memref<15x8x16xf32, #tpu.memory_space<vmem>>, vector<1x8x16xf32>,
    %157 = vector.extract_strided_slice %149 {offsets = [0, 16], sizes = [8, 16], strides = [1, 1]} : vector<8x32xf32> to vector<8x16xf32>
    %c11_i32_78 = arith.constant 11 : i32
    %158 = arith.subi %c11_i32_78, %c2_i32 : i32
    %159 = arith.index_cast %158 : i32 to index
    %c0_79 = arith.constant 0 : index
    %c0_80 = arith.constant 0 : index
    %160 = vector.load %arg27[%159, %c0_79, %c0_80] : memref<15x8x16xf32, #tpu.memory_space<vmem>>, vector<1x8x16xf32>
    %161 = vector.shape_cast %160 : vector<1x8x16xf32> to vector<8x16xf32>
    %162 = vector.shape_cast %157 : vector<8x16xf32> to vector<1x8x16xf32>
    tpu.vector_store %arg27[%159, %c0_79, %c0_80], %162 {strides = array<i32>} : memref<15x8x16xf32, #tpu.memory_space<vmem>>, vector<1x8x16xf32>,
    %c3_i32 = arith.constant 3 : i32
    %163 = arith.index_cast %c3_i32 : i32 to index
    %c0_81 = arith.constant 0 : index
    %c0_82 = arith.constant 0 : index
    %164 = vector.load %arg0[%163, %c0_81, %c0_82] : memref<12x8x32xf32, #tpu.memory_space<vmem>>, vector<1x8x32xf32>
    %165 = vector.shape_cast %164 : vector<1x8x32xf32> to vector<8x32xf32>
    %c11_i32_83 = arith.constant 11 : i32
    %166 = arith.subi %c11_i32_83, %c3_i32 : i32
    %167 = arith.index_cast %166 : i32 to index
    %c0_84 = arith.constant 0 : index
    %c0_85 = arith.constant 0 : index
    %168 = vector.load %arg0[%167, %c0_84, %c0_85] : memref<12x8x32xf32, #tpu.memory_space<vmem>>, vector<1x8x32xf32>
    %169 = vector.shape_cast %168 : vector<1x8x32xf32> to vector<8x32xf32>
    %c0_86 = arith.constant 0 : index
    %c0_87 = arith.constant 0 : index
    %170 = vector.load %arg24[%c0_86, %c0_87] : memref<8x32xf32, #tpu.memory_space<vmem>>, vector<8x32xf32>
    %171 = tpu.concatenate %165, %169, %170 in 1 : vector<8x32xf32>, vector<8x32xf32>, vector<8x32xf32> -> vector<8x96xf32>
    %cst_88 = arith.constant dense<0.000000e+00> : vector<8x128xf32>
    %172 = tpu.matmul %171, %8, %cst_88 {dimension_numbers = #tpu.dot_dimension_numbers<[1], [0], [0], [1], [0, 0, 1, 1], [], []>} : vector<8x96xf32>, vector<96x128xf32>, vector<8x128xf32> -> vector<8x128xf32>
    %173 = vector.broadcast %9 : vector<1x128xf32> to vector<8x128xf32>
    %174 = arith.addf %172, %173 : vector<8x128xf32>
    %175 = vector.extract_strided_slice %174 {offsets = [0, 0], sizes = [8, 32], strides = [1, 1]} : vector<8x128xf32> to vector<8x32xf32>
    %176 = arith.negf %175 : vector<8x32xf32>
    %177 = math.exp %176 : vector<8x32xf32>
    %cst_89 = arith.constant 1.000000e+00 : f32
    %178 = vector.broadcast %cst_89 : f32 to vector<8x32xf32>
    %179 = arith.addf %178, %177 : vector<8x32xf32>
    %180 = arith.divf %178, %179 : vector<8x32xf32>
    %181 = vector.extract_strided_slice %174 {offsets = [0, 32], sizes = [8, 32], strides = [1, 1]} : vector<8x128xf32> to vector<8x32xf32>
    %182 = arith.negf %181 : vector<8x32xf32>
    %183 = math.exp %182 : vector<8x32xf32>
    %cst_90 = arith.constant 1.000000e+00 : f32
    %184 = vector.broadcast %cst_90 : f32 to vector<8x32xf32>
    %185 = arith.addf %184, %183 : vector<8x32xf32>
    %186 = arith.divf %184, %185 : vector<8x32xf32>
    %187 = vector.extract_strided_slice %174 {offsets = [0, 64], sizes = [8, 32], strides = [1, 1]} : vector<8x128xf32> to vector<8x32xf32>
    %188 = math.tanh %187 : vector<8x32xf32>
    %189 = vector.extract_strided_slice %174 {offsets = [0, 96], sizes = [8, 32], strides = [1, 1]} : vector<8x128xf32> to vector<8x32xf32>
    %190 = arith.negf %189 : vector<8x32xf32>
    %191 = math.exp %190 : vector<8x32xf32>
    %cst_91 = arith.constant 1.000000e+00 : f32
    %192 = vector.broadcast %cst_91 : f32 to vector<8x32xf32>
    %193 = arith.addf %192, %191 : vector<8x32xf32>
    %194 = arith.divf %192, %193 : vector<8x32xf32>
    %c0_92 = arith.constant 0 : index
    %c0_93 = arith.constant 0 : index
    %195 = vector.load %arg25[%c0_92, %c0_93] : memref<8x32xf32, #tpu.memory_space<vmem>>, vector<8x32xf32>
    %196 = arith.mulf %186, %195 : vector<8x32xf32>
    %197 = arith.mulf %180, %188 : vector<8x32xf32>
    %198 = arith.addf %196, %197 : vector<8x32xf32>
    %199 = math.tanh %198 : vector<8x32xf32>
    %200 = arith.mulf %194, %199 : vector<8x32xf32>
    %c0_94 = arith.constant 0 : index
    %c0_95 = arith.constant 0 : index
    %201 = vector.load %arg25[%c0_94, %c0_95] : memref<8x32xf32, #tpu.memory_space<vmem>>, vector<8x32xf32>
    tpu.vector_store %arg25[%c0_94, %c0_95], %198 {strides = array<i32>} : memref<8x32xf32, #tpu.memory_space<vmem>>, vector<8x32xf32>,
    %c0_96 = arith.constant 0 : index
    %c0_97 = arith.constant 0 : index
    %202 = vector.load %arg24[%c0_96, %c0_97] : memref<8x32xf32, #tpu.memory_space<vmem>>, vector<8x32xf32>
    tpu.vector_store %arg24[%c0_96, %c0_97], %200 {strides = array<i32>} : memref<8x32xf32, #tpu.memory_space<vmem>>, vector<8x32xf32>,
    %203 = vector.extract_strided_slice %200 {offsets = [0, 0], sizes = [8, 16], strides = [1, 1]} : vector<8x32xf32> to vector<8x16xf32>
    %204 = arith.index_cast %c3_i32 : i32 to index
    %c0_98 = arith.constant 0 : index
    %c0_99 = arith.constant 0 : index
    %205 = vector.load %arg26[%204, %c0_98, %c0_99] : memref<15x8x16xf32, #tpu.memory_space<vmem>>, vector<1x8x16xf32>
    %206 = vector.shape_cast %205 : vector<1x8x16xf32> to vector<8x16xf32>
    %207 = vector.shape_cast %203 : vector<8x16xf32> to vector<1x8x16xf32>
    tpu.vector_store %arg26[%204, %c0_98, %c0_99], %207 {strides = array<i32>} : memref<15x8x16xf32, #tpu.memory_space<vmem>>, vector<1x8x16xf32>,
    %208 = vector.extract_strided_slice %200 {offsets = [0, 16], sizes = [8, 16], strides = [1, 1]} : vector<8x32xf32> to vector<8x16xf32>
    %c11_i32_100 = arith.constant 11 : i32
    %209 = arith.subi %c11_i32_100, %c3_i32 : i32
    %210 = arith.index_cast %209 : i32 to index
    %c0_101 = arith.constant 0 : index
    %c0_102 = arith.constant 0 : index
    %211 = vector.load %arg27[%210, %c0_101, %c0_102] : memref<15x8x16xf32, #tpu.memory_space<vmem>>, vector<1x8x16xf32>
    %212 = vector.shape_cast %211 : vector<1x8x16xf32> to vector<8x16xf32>
    %213 = vector.shape_cast %208 : vector<8x16xf32> to vector<1x8x16xf32>
    tpu.vector_store %arg27[%210, %c0_101, %c0_102], %213 {strides = array<i32>} : memref<15x8x16xf32, #tpu.memory_space<vmem>>, vector<1x8x16xf32>,
    %c4_i32 = arith.constant 4 : i32
    %214 = arith.index_cast %c4_i32 : i32 to index
    %c0_103 = arith.constant 0 : index
    %c0_104 = arith.constant 0 : index
    %215 = vector.load %arg0[%214, %c0_103, %c0_104] : memref<12x8x32xf32, #tpu.memory_space<vmem>>, vector<1x8x32xf32>
    %216 = vector.shape_cast %215 : vector<1x8x32xf32> to vector<8x32xf32>
    %c11_i32_105 = arith.constant 11 : i32
    %217 = arith.subi %c11_i32_105, %c4_i32 : i32
    %218 = arith.index_cast %217 : i32 to index
    %c0_106 = arith.constant 0 : index
    %c0_107 = arith.constant 0 : index
    %219 = vector.load %arg0[%218, %c0_106, %c0_107] : memref<12x8x32xf32, #tpu.memory_space<vmem>>, vector<1x8x32xf32>
    %220 = vector.shape_cast %219 : vector<1x8x32xf32> to vector<8x32xf32>
    %c0_108 = arith.constant 0 : index
    %c0_109 = arith.constant 0 : index
    %221 = vector.load %arg24[%c0_108, %c0_109] : memref<8x32xf32, #tpu.memory_space<vmem>>, vector<8x32xf32>
    %222 = tpu.concatenate %216, %220, %221 in 1 : vector<8x32xf32>, vector<8x32xf32>, vector<8x32xf32> -> vector<8x96xf32>
    %cst_110 = arith.constant dense<0.000000e+00> : vector<8x128xf32>
    %223 = tpu.matmul %222, %8, %cst_110 {dimension_numbers = #tpu.dot_dimension_numbers<[1], [0], [0], [1], [0, 0, 1, 1], [], []>} : vector<8x96xf32>, vector<96x128xf32>, vector<8x128xf32> -> vector<8x128xf32>
    %224 = vector.broadcast %9 : vector<1x128xf32> to vector<8x128xf32>
    %225 = arith.addf %223, %224 : vector<8x128xf32>
    %226 = vector.extract_strided_slice %225 {offsets = [0, 0], sizes = [8, 32], strides = [1, 1]} : vector<8x128xf32> to vector<8x32xf32>
    %227 = arith.negf %226 : vector<8x32xf32>
    %228 = math.exp %227 : vector<8x32xf32>
    %cst_111 = arith.constant 1.000000e+00 : f32
    %229 = vector.broadcast %cst_111 : f32 to vector<8x32xf32>
    %230 = arith.addf %229, %228 : vector<8x32xf32>
    %231 = arith.divf %229, %230 : vector<8x32xf32>
    %232 = vector.extract_strided_slice %225 {offsets = [0, 32], sizes = [8, 32], strides = [1, 1]} : vector<8x128xf32> to vector<8x32xf32>
    %233 = arith.negf %232 : vector<8x32xf32>
    %234 = math.exp %233 : vector<8x32xf32>
    %cst_112 = arith.constant 1.000000e+00 : f32
    %235 = vector.broadcast %cst_112 : f32 to vector<8x32xf32>
    %236 = arith.addf %235, %234 : vector<8x32xf32>
    %237 = arith.divf %235, %236 : vector<8x32xf32>
    %238 = vector.extract_strided_slice %225 {offsets = [0, 64], sizes = [8, 32], strides = [1, 1]} : vector<8x128xf32> to vector<8x32xf32>
    %239 = math.tanh %238 : vector<8x32xf32>
    %240 = vector.extract_strided_slice %225 {offsets = [0, 96], sizes = [8, 32], strides = [1, 1]} : vector<8x128xf32> to vector<8x32xf32>
    %241 = arith.negf %240 : vector<8x32xf32>
    %242 = math.exp %241 : vector<8x32xf32>
    %cst_113 = arith.constant 1.000000e+00 : f32
    %243 = vector.broadcast %cst_113 : f32 to vector<8x32xf32>
    %244 = arith.addf %243, %242 : vector<8x32xf32>
    %245 = arith.divf %243, %244 : vector<8x32xf32>
    %c0_114 = arith.constant 0 : index
    %c0_115 = arith.constant 0 : index
    %246 = vector.load %arg25[%c0_114, %c0_115] : memref<8x32xf32, #tpu.memory_space<vmem>>, vector<8x32xf32>
    %247 = arith.mulf %237, %246 : vector<8x32xf32>
    %248 = arith.mulf %231, %239 : vector<8x32xf32>
    %249 = arith.addf %247, %248 : vector<8x32xf32>
    %250 = math.tanh %249 : vector<8x32xf32>
    %251 = arith.mulf %245, %250 : vector<8x32xf32>
    %c0_116 = arith.constant 0 : index
    %c0_117 = arith.constant 0 : index
    %252 = vector.load %arg25[%c0_116, %c0_117] : memref<8x32xf32, #tpu.memory_space<vmem>>, vector<8x32xf32>
    tpu.vector_store %arg25[%c0_116, %c0_117], %249 {strides = array<i32>} : memref<8x32xf32, #tpu.memory_space<vmem>>, vector<8x32xf32>,
    %c0_118 = arith.constant 0 : index
    %c0_119 = arith.constant 0 : index
    %253 = vector.load %arg24[%c0_118, %c0_119] : memref<8x32xf32, #tpu.memory_space<vmem>>, vector<8x32xf32>
    tpu.vector_store %arg24[%c0_118, %c0_119], %251 {strides = array<i32>} : memref<8x32xf32, #tpu.memory_space<vmem>>, vector<8x32xf32>,
    %254 = vector.extract_strided_slice %251 {offsets = [0, 0], sizes = [8, 16], strides = [1, 1]} : vector<8x32xf32> to vector<8x16xf32>
    %255 = arith.index_cast %c4_i32 : i32 to index
    %c0_120 = arith.constant 0 : index
    %c0_121 = arith.constant 0 : index
    %256 = vector.load %arg26[%255, %c0_120, %c0_121] : memref<15x8x16xf32, #tpu.memory_space<vmem>>, vector<1x8x16xf32>
    %257 = vector.shape_cast %256 : vector<1x8x16xf32> to vector<8x16xf32>
    %258 = vector.shape_cast %254 : vector<8x16xf32> to vector<1x8x16xf32>
    tpu.vector_store %arg26[%255, %c0_120, %c0_121], %258 {strides = array<i32>} : memref<15x8x16xf32, #tpu.memory_space<vmem>>, vector<1x8x16xf32>,
    %259 = vector.extract_strided_slice %251 {offsets = [0, 16], sizes = [8, 16], strides = [1, 1]} : vector<8x32xf32> to vector<8x16xf32>
    %c11_i32_122 = arith.constant 11 : i32
    %260 = arith.subi %c11_i32_122, %c4_i32 : i32
    %261 = arith.index_cast %260 : i32 to index
    %c0_123 = arith.constant 0 : index
    %c0_124 = arith.constant 0 : index
    %262 = vector.load %arg27[%261, %c0_123, %c0_124] : memref<15x8x16xf32, #tpu.memory_space<vmem>>, vector<1x8x16xf32>
    %263 = vector.shape_cast %262 : vector<1x8x16xf32> to vector<8x16xf32>
    %264 = vector.shape_cast %259 : vector<8x16xf32> to vector<1x8x16xf32>
    tpu.vector_store %arg27[%261, %c0_123, %c0_124], %264 {strides = array<i32>} : memref<15x8x16xf32, #tpu.memory_space<vmem>>, vector<1x8x16xf32>,
    %c5_i32 = arith.constant 5 : i32
    %265 = arith.index_cast %c5_i32 : i32 to index
    %c0_125 = arith.constant 0 : index
    %c0_126 = arith.constant 0 : index
    %266 = vector.load %arg0[%265, %c0_125, %c0_126] : memref<12x8x32xf32, #tpu.memory_space<vmem>>, vector<1x8x32xf32>
    %267 = vector.shape_cast %266 : vector<1x8x32xf32> to vector<8x32xf32>
    %c11_i32_127 = arith.constant 11 : i32
    %268 = arith.subi %c11_i32_127, %c5_i32 : i32
    %269 = arith.index_cast %268 : i32 to index
    %c0_128 = arith.constant 0 : index
    %c0_129 = arith.constant 0 : index
    %270 = vector.load %arg0[%269, %c0_128, %c0_129] : memref<12x8x32xf32, #tpu.memory_space<vmem>>, vector<1x8x32xf32>
    %271 = vector.shape_cast %270 : vector<1x8x32xf32> to vector<8x32xf32>
    %c0_130 = arith.constant 0 : index
    %c0_131 = arith.constant 0 : index
    %272 = vector.load %arg24[%c0_130, %c0_131] : memref<8x32xf32, #tpu.memory_space<vmem>>, vector<8x32xf32>
    %273 = tpu.concatenate %267, %271, %272 in 1 : vector<8x32xf32>, vector<8x32xf32>, vector<8x32xf32> -> vector<8x96xf32>
    %cst_132 = arith.constant dense<0.000000e+00> : vector<8x128xf32>
    %274 = tpu.matmul %273, %8, %cst_132 {dimension_numbers = #tpu.dot_dimension_numbers<[1], [0], [0], [1], [0, 0, 1, 1], [], []>} : vector<8x96xf32>, vector<96x128xf32>, vector<8x128xf32> -> vector<8x128xf32>
    %275 = vector.broadcast %9 : vector<1x128xf32> to vector<8x128xf32>
    %276 = arith.addf %274, %275 : vector<8x128xf32>
    %277 = vector.extract_strided_slice %276 {offsets = [0, 0], sizes = [8, 32], strides = [1, 1]} : vector<8x128xf32> to vector<8x32xf32>
    %278 = arith.negf %277 : vector<8x32xf32>
    %279 = math.exp %278 : vector<8x32xf32>
    %cst_133 = arith.constant 1.000000e+00 : f32
    %280 = vector.broadcast %cst_133 : f32 to vector<8x32xf32>
    %281 = arith.addf %280, %279 : vector<8x32xf32>
    %282 = arith.divf %280, %281 : vector<8x32xf32>
    %283 = vector.extract_strided_slice %276 {offsets = [0, 32], sizes = [8, 32], strides = [1, 1]} : vector<8x128xf32> to vector<8x32xf32>
    %284 = arith.negf %283 : vector<8x32xf32>
    %285 = math.exp %284 : vector<8x32xf32>
    %cst_134 = arith.constant 1.000000e+00 : f32
    %286 = vector.broadcast %cst_134 : f32 to vector<8x32xf32>
    %287 = arith.addf %286, %285 : vector<8x32xf32>
    %288 = arith.divf %286, %287 : vector<8x32xf32>
    %289 = vector.extract_strided_slice %276 {offsets = [0, 64], sizes = [8, 32], strides = [1, 1]} : vector<8x128xf32> to vector<8x32xf32>
    %290 = math.tanh %289 : vector<8x32xf32>
    %291 = vector.extract_strided_slice %276 {offsets = [0, 96], sizes = [8, 32], strides = [1, 1]} : vector<8x128xf32> to vector<8x32xf32>
    %292 = arith.negf %291 : vector<8x32xf32>
    %293 = math.exp %292 : vector<8x32xf32>
    %cst_135 = arith.constant 1.000000e+00 : f32
    %294 = vector.broadcast %cst_135 : f32 to vector<8x32xf32>
    %295 = arith.addf %294, %293 : vector<8x32xf32>
    %296 = arith.divf %294, %295 : vector<8x32xf32>
    %c0_136 = arith.constant 0 : index
    %c0_137 = arith.constant 0 : index
    %297 = vector.load %arg25[%c0_136, %c0_137] : memref<8x32xf32, #tpu.memory_space<vmem>>, vector<8x32xf32>
    %298 = arith.mulf %288, %297 : vector<8x32xf32>
    %299 = arith.mulf %282, %290 : vector<8x32xf32>
    %300 = arith.addf %298, %299 : vector<8x32xf32>
    %301 = math.tanh %300 : vector<8x32xf32>
    %302 = arith.mulf %296, %301 : vector<8x32xf32>
    %c0_138 = arith.constant 0 : index
    %c0_139 = arith.constant 0 : index
    %303 = vector.load %arg25[%c0_138, %c0_139] : memref<8x32xf32, #tpu.memory_space<vmem>>, vector<8x32xf32>
    tpu.vector_store %arg25[%c0_138, %c0_139], %300 {strides = array<i32>} : memref<8x32xf32, #tpu.memory_space<vmem>>, vector<8x32xf32>,
    %c0_140 = arith.constant 0 : index
    %c0_141 = arith.constant 0 : index
    %304 = vector.load %arg24[%c0_140, %c0_141] : memref<8x32xf32, #tpu.memory_space<vmem>>, vector<8x32xf32>
    tpu.vector_store %arg24[%c0_140, %c0_141], %302 {strides = array<i32>} : memref<8x32xf32, #tpu.memory_space<vmem>>, vector<8x32xf32>,
    %305 = vector.extract_strided_slice %302 {offsets = [0, 0], sizes = [8, 16], strides = [1, 1]} : vector<8x32xf32> to vector<8x16xf32>
    %306 = arith.index_cast %c5_i32 : i32 to index
    %c0_142 = arith.constant 0 : index
    %c0_143 = arith.constant 0 : index
    %307 = vector.load %arg26[%306, %c0_142, %c0_143] : memref<15x8x16xf32, #tpu.memory_space<vmem>>, vector<1x8x16xf32>
    %308 = vector.shape_cast %307 : vector<1x8x16xf32> to vector<8x16xf32>
    %309 = vector.shape_cast %305 : vector<8x16xf32> to vector<1x8x16xf32>
    tpu.vector_store %arg26[%306, %c0_142, %c0_143], %309 {strides = array<i32>} : memref<15x8x16xf32, #tpu.memory_space<vmem>>, vector<1x8x16xf32>,
    %310 = vector.extract_strided_slice %302 {offsets = [0, 16], sizes = [8, 16], strides = [1, 1]} : vector<8x32xf32> to vector<8x16xf32>
    %c11_i32_144 = arith.constant 11 : i32
    %311 = arith.subi %c11_i32_144, %c5_i32 : i32
    %312 = arith.index_cast %311 : i32 to index
    %c0_145 = arith.constant 0 : index
    %c0_146 = arith.constant 0 : index
    %313 = vector.load %arg27[%312, %c0_145, %c0_146] : memref<15x8x16xf32, #tpu.memory_space<vmem>>, vector<1x8x16xf32>
    %314 = vector.shape_cast %313 : vector<1x8x16xf32> to vector<8x16xf32>
    %315 = vector.shape_cast %310 : vector<8x16xf32> to vector<1x8x16xf32>
    tpu.vector_store %arg27[%312, %c0_145, %c0_146], %315 {strides = array<i32>} : memref<15x8x16xf32, #tpu.memory_space<vmem>>, vector<1x8x16xf32>,
    %c6_i32 = arith.constant 6 : i32
    %316 = arith.index_cast %c6_i32 : i32 to index
    %c0_147 = arith.constant 0 : index
    %c0_148 = arith.constant 0 : index
    %317 = vector.load %arg0[%316, %c0_147, %c0_148] : memref<12x8x32xf32, #tpu.memory_space<vmem>>, vector<1x8x32xf32>
    %318 = vector.shape_cast %317 : vector<1x8x32xf32> to vector<8x32xf32>
    %c11_i32_149 = arith.constant 11 : i32
    %319 = arith.subi %c11_i32_149, %c6_i32 : i32
    %320 = arith.index_cast %319 : i32 to index
    %c0_150 = arith.constant 0 : index
    %c0_151 = arith.constant 0 : index
    %321 = vector.load %arg0[%320, %c0_150, %c0_151] : memref<12x8x32xf32, #tpu.memory_space<vmem>>, vector<1x8x32xf32>
    %322 = vector.shape_cast %321 : vector<1x8x32xf32> to vector<8x32xf32>
    %c0_152 = arith.constant 0 : index
    %c0_153 = arith.constant 0 : index
    %323 = vector.load %arg24[%c0_152, %c0_153] : memref<8x32xf32, #tpu.memory_space<vmem>>, vector<8x32xf32>
    %324 = tpu.concatenate %318, %322, %323 in 1 : vector<8x32xf32>, vector<8x32xf32>, vector<8x32xf32> -> vector<8x96xf32>
    %cst_154 = arith.constant dense<0.000000e+00> : vector<8x128xf32>
    %325 = tpu.matmul %324, %8, %cst_154 {dimension_numbers = #tpu.dot_dimension_numbers<[1], [0], [0], [1], [0, 0, 1, 1], [], []>} : vector<8x96xf32>, vector<96x128xf32>, vector<8x128xf32> -> vector<8x128xf32>
    %326 = vector.broadcast %9 : vector<1x128xf32> to vector<8x128xf32>
    %327 = arith.addf %325, %326 : vector<8x128xf32>
    %328 = vector.extract_strided_slice %327 {offsets = [0, 0], sizes = [8, 32], strides = [1, 1]} : vector<8x128xf32> to vector<8x32xf32>
    %329 = arith.negf %328 : vector<8x32xf32>
    %330 = math.exp %329 : vector<8x32xf32>
    %cst_155 = arith.constant 1.000000e+00 : f32
    %331 = vector.broadcast %cst_155 : f32 to vector<8x32xf32>
    %332 = arith.addf %331, %330 : vector<8x32xf32>
    %333 = arith.divf %331, %332 : vector<8x32xf32>
    %334 = vector.extract_strided_slice %327 {offsets = [0, 32], sizes = [8, 32], strides = [1, 1]} : vector<8x128xf32> to vector<8x32xf32>
    %335 = arith.negf %334 : vector<8x32xf32>
    %336 = math.exp %335 : vector<8x32xf32>
    %cst_156 = arith.constant 1.000000e+00 : f32
    %337 = vector.broadcast %cst_156 : f32 to vector<8x32xf32>
    %338 = arith.addf %337, %336 : vector<8x32xf32>
    %339 = arith.divf %337, %338 : vector<8x32xf32>
    %340 = vector.extract_strided_slice %327 {offsets = [0, 64], sizes = [8, 32], strides = [1, 1]} : vector<8x128xf32> to vector<8x32xf32>
    %341 = math.tanh %340 : vector<8x32xf32>
    %342 = vector.extract_strided_slice %327 {offsets = [0, 96], sizes = [8, 32], strides = [1, 1]} : vector<8x128xf32> to vector<8x32xf32>
    %343 = arith.negf %342 : vector<8x32xf32>
    %344 = math.exp %343 : vector<8x32xf32>
    %cst_157 = arith.constant 1.000000e+00 : f32
    %345 = vector.broadcast %cst_157 : f32 to vector<8x32xf32>
    %346 = arith.addf %345, %344 : vector<8x32xf32>
    %347 = arith.divf %345, %346 : vector<8x32xf32>
    %c0_158 = arith.constant 0 : index
    %c0_159 = arith.constant 0 : index
    %348 = vector.load %arg25[%c0_158, %c0_159] : memref<8x32xf32, #tpu.memory_space<vmem>>, vector<8x32xf32>
    %349 = arith.mulf %339, %348 : vector<8x32xf32>
    %350 = arith.mulf %333, %341 : vector<8x32xf32>
    %351 = arith.addf %349, %350 : vector<8x32xf32>
    %352 = math.tanh %351 : vector<8x32xf32>
    %353 = arith.mulf %347, %352 : vector<8x32xf32>
    %c0_160 = arith.constant 0 : index
    %c0_161 = arith.constant 0 : index
    %354 = vector.load %arg25[%c0_160, %c0_161] : memref<8x32xf32, #tpu.memory_space<vmem>>, vector<8x32xf32>
    tpu.vector_store %arg25[%c0_160, %c0_161], %351 {strides = array<i32>} : memref<8x32xf32, #tpu.memory_space<vmem>>, vector<8x32xf32>,
    %c0_162 = arith.constant 0 : index
    %c0_163 = arith.constant 0 : index
    %355 = vector.load %arg24[%c0_162, %c0_163] : memref<8x32xf32, #tpu.memory_space<vmem>>, vector<8x32xf32>
    tpu.vector_store %arg24[%c0_162, %c0_163], %353 {strides = array<i32>} : memref<8x32xf32, #tpu.memory_space<vmem>>, vector<8x32xf32>,
    %356 = vector.extract_strided_slice %353 {offsets = [0, 0], sizes = [8, 16], strides = [1, 1]} : vector<8x32xf32> to vector<8x16xf32>
    %357 = arith.index_cast %c6_i32 : i32 to index
    %c0_164 = arith.constant 0 : index
    %c0_165 = arith.constant 0 : index
    %358 = vector.load %arg26[%357, %c0_164, %c0_165] : memref<15x8x16xf32, #tpu.memory_space<vmem>>, vector<1x8x16xf32>
    %359 = vector.shape_cast %358 : vector<1x8x16xf32> to vector<8x16xf32>
    %360 = vector.shape_cast %356 : vector<8x16xf32> to vector<1x8x16xf32>
    tpu.vector_store %arg26[%357, %c0_164, %c0_165], %360 {strides = array<i32>} : memref<15x8x16xf32, #tpu.memory_space<vmem>>, vector<1x8x16xf32>,
    %361 = vector.extract_strided_slice %353 {offsets = [0, 16], sizes = [8, 16], strides = [1, 1]} : vector<8x32xf32> to vector<8x16xf32>
    %c11_i32_166 = arith.constant 11 : i32
    %362 = arith.subi %c11_i32_166, %c6_i32 : i32
    %363 = arith.index_cast %362 : i32 to index
    %c0_167 = arith.constant 0 : index
    %c0_168 = arith.constant 0 : index
    %364 = vector.load %arg27[%363, %c0_167, %c0_168] : memref<15x8x16xf32, #tpu.memory_space<vmem>>, vector<1x8x16xf32>
    %365 = vector.shape_cast %364 : vector<1x8x16xf32> to vector<8x16xf32>
    %366 = vector.shape_cast %361 : vector<8x16xf32> to vector<1x8x16xf32>
    tpu.vector_store %arg27[%363, %c0_167, %c0_168], %366 {strides = array<i32>} : memref<15x8x16xf32, #tpu.memory_space<vmem>>, vector<1x8x16xf32>,
    %c7_i32 = arith.constant 7 : i32
    %367 = arith.index_cast %c7_i32 : i32 to index
    %c0_169 = arith.constant 0 : index
    %c0_170 = arith.constant 0 : index
    %368 = vector.load %arg0[%367, %c0_169, %c0_170] : memref<12x8x32xf32, #tpu.memory_space<vmem>>, vector<1x8x32xf32>
    %369 = vector.shape_cast %368 : vector<1x8x32xf32> to vector<8x32xf32>
    %c11_i32_171 = arith.constant 11 : i32
    %370 = arith.subi %c11_i32_171, %c7_i32 : i32
    %371 = arith.index_cast %370 : i32 to index
    %c0_172 = arith.constant 0 : index
    %c0_173 = arith.constant 0 : index
    %372 = vector.load %arg0[%371, %c0_172, %c0_173] : memref<12x8x32xf32, #tpu.memory_space<vmem>>, vector<1x8x32xf32>
    %373 = vector.shape_cast %372 : vector<1x8x32xf32> to vector<8x32xf32>
    %c0_174 = arith.constant 0 : index
    %c0_175 = arith.constant 0 : index
    %374 = vector.load %arg24[%c0_174, %c0_175] : memref<8x32xf32, #tpu.memory_space<vmem>>, vector<8x32xf32>
    %375 = tpu.concatenate %369, %373, %374 in 1 : vector<8x32xf32>, vector<8x32xf32>, vector<8x32xf32> -> vector<8x96xf32>
    %cst_176 = arith.constant dense<0.000000e+00> : vector<8x128xf32>
    %376 = tpu.matmul %375, %8, %cst_176 {dimension_numbers = #tpu.dot_dimension_numbers<[1], [0], [0], [1], [0, 0, 1, 1], [], []>} : vector<8x96xf32>, vector<96x128xf32>, vector<8x128xf32> -> vector<8x128xf32>
    %377 = vector.broadcast %9 : vector<1x128xf32> to vector<8x128xf32>
    %378 = arith.addf %376, %377 : vector<8x128xf32>
    %379 = vector.extract_strided_slice %378 {offsets = [0, 0], sizes = [8, 32], strides = [1, 1]} : vector<8x128xf32> to vector<8x32xf32>
    %380 = arith.negf %379 : vector<8x32xf32>
    %381 = math.exp %380 : vector<8x32xf32>
    %cst_177 = arith.constant 1.000000e+00 : f32
    %382 = vector.broadcast %cst_177 : f32 to vector<8x32xf32>
    %383 = arith.addf %382, %381 : vector<8x32xf32>
    %384 = arith.divf %382, %383 : vector<8x32xf32>
    %385 = vector.extract_strided_slice %378 {offsets = [0, 32], sizes = [8, 32], strides = [1, 1]} : vector<8x128xf32> to vector<8x32xf32>
    %386 = arith.negf %385 : vector<8x32xf32>
    %387 = math.exp %386 : vector<8x32xf32>
    %cst_178 = arith.constant 1.000000e+00 : f32
    %388 = vector.broadcast %cst_178 : f32 to vector<8x32xf32>
    %389 = arith.addf %388, %387 : vector<8x32xf32>
    %390 = arith.divf %388, %389 : vector<8x32xf32>
    %391 = vector.extract_strided_slice %378 {offsets = [0, 64], sizes = [8, 32], strides = [1, 1]} : vector<8x128xf32> to vector<8x32xf32>
    %392 = math.tanh %391 : vector<8x32xf32>
    %393 = vector.extract_strided_slice %378 {offsets = [0, 96], sizes = [8, 32], strides = [1, 1]} : vector<8x128xf32> to vector<8x32xf32>
    %394 = arith.negf %393 : vector<8x32xf32>
    %395 = math.exp %394 : vector<8x32xf32>
    %cst_179 = arith.constant 1.000000e+00 : f32
    %396 = vector.broadcast %cst_179 : f32 to vector<8x32xf32>
    %397 = arith.addf %396, %395 : vector<8x32xf32>
    %398 = arith.divf %396, %397 : vector<8x32xf32>
    %c0_180 = arith.constant 0 : index
    %c0_181 = arith.constant 0 : index
    %399 = vector.load %arg25[%c0_180, %c0_181] : memref<8x32xf32, #tpu.memory_space<vmem>>, vector<8x32xf32>
    %400 = arith.mulf %390, %399 : vector<8x32xf32>
    %401 = arith.mulf %384, %392 : vector<8x32xf32>
    %402 = arith.addf %400, %401 : vector<8x32xf32>
    %403 = math.tanh %402 : vector<8x32xf32>
    %404 = arith.mulf %398, %403 : vector<8x32xf32>
    %c0_182 = arith.constant 0 : index
    %c0_183 = arith.constant 0 : index
    %405 = vector.load %arg25[%c0_182, %c0_183] : memref<8x32xf32, #tpu.memory_space<vmem>>, vector<8x32xf32>
    tpu.vector_store %arg25[%c0_182, %c0_183], %402 {strides = array<i32>} : memref<8x32xf32, #tpu.memory_space<vmem>>, vector<8x32xf32>,
    %c0_184 = arith.constant 0 : index
    %c0_185 = arith.constant 0 : index
    %406 = vector.load %arg24[%c0_184, %c0_185] : memref<8x32xf32, #tpu.memory_space<vmem>>, vector<8x32xf32>
    tpu.vector_store %arg24[%c0_184, %c0_185], %404 {strides = array<i32>} : memref<8x32xf32, #tpu.memory_space<vmem>>, vector<8x32xf32>,
    %407 = vector.extract_strided_slice %404 {offsets = [0, 0], sizes = [8, 16], strides = [1, 1]} : vector<8x32xf32> to vector<8x16xf32>
    %408 = arith.index_cast %c7_i32 : i32 to index
    %c0_186 = arith.constant 0 : index
    %c0_187 = arith.constant 0 : index
    %409 = vector.load %arg26[%408, %c0_186, %c0_187] : memref<15x8x16xf32, #tpu.memory_space<vmem>>, vector<1x8x16xf32>
    %410 = vector.shape_cast %409 : vector<1x8x16xf32> to vector<8x16xf32>
    %411 = vector.shape_cast %407 : vector<8x16xf32> to vector<1x8x16xf32>
    tpu.vector_store %arg26[%408, %c0_186, %c0_187], %411 {strides = array<i32>} : memref<15x8x16xf32, #tpu.memory_space<vmem>>, vector<1x8x16xf32>,
    %412 = vector.extract_strided_slice %404 {offsets = [0, 16], sizes = [8, 16], strides = [1, 1]} : vector<8x32xf32> to vector<8x16xf32>
    %c11_i32_188 = arith.constant 11 : i32
    %413 = arith.subi %c11_i32_188, %c7_i32 : i32
    %414 = arith.index_cast %413 : i32 to index
    %c0_189 = arith.constant 0 : index
    %c0_190 = arith.constant 0 : index
    %415 = vector.load %arg27[%414, %c0_189, %c0_190] : memref<15x8x16xf32, #tpu.memory_space<vmem>>, vector<1x8x16xf32>
    %416 = vector.shape_cast %415 : vector<1x8x16xf32> to vector<8x16xf32>
    %417 = vector.shape_cast %412 : vector<8x16xf32> to vector<1x8x16xf32>
    tpu.vector_store %arg27[%414, %c0_189, %c0_190], %417 {strides = array<i32>} : memref<15x8x16xf32, #tpu.memory_space<vmem>>, vector<1x8x16xf32>,
    %c8_i32 = arith.constant 8 : i32
    %418 = arith.index_cast %c8_i32 : i32 to index
    %c0_191 = arith.constant 0 : index
    %c0_192 = arith.constant 0 : index
    %419 = vector.load %arg0[%418, %c0_191, %c0_192] : memref<12x8x32xf32, #tpu.memory_space<vmem>>, vector<1x8x32xf32>
    %420 = vector.shape_cast %419 : vector<1x8x32xf32> to vector<8x32xf32>
    %c11_i32_193 = arith.constant 11 : i32
    %421 = arith.subi %c11_i32_193, %c8_i32 : i32
    %422 = arith.index_cast %421 : i32 to index
    %c0_194 = arith.constant 0 : index
    %c0_195 = arith.constant 0 : index
    %423 = vector.load %arg0[%422, %c0_194, %c0_195] : memref<12x8x32xf32, #tpu.memory_space<vmem>>, vector<1x8x32xf32>
    %424 = vector.shape_cast %423 : vector<1x8x32xf32> to vector<8x32xf32>
    %c0_196 = arith.constant 0 : index
    %c0_197 = arith.constant 0 : index
    %425 = vector.load %arg24[%c0_196, %c0_197] : memref<8x32xf32, #tpu.memory_space<vmem>>, vector<8x32xf32>
    %426 = tpu.concatenate %420, %424, %425 in 1 : vector<8x32xf32>, vector<8x32xf32>, vector<8x32xf32> -> vector<8x96xf32>
    %cst_198 = arith.constant dense<0.000000e+00> : vector<8x128xf32>
    %427 = tpu.matmul %426, %8, %cst_198 {dimension_numbers = #tpu.dot_dimension_numbers<[1], [0], [0], [1], [0, 0, 1, 1], [], []>} : vector<8x96xf32>, vector<96x128xf32>, vector<8x128xf32> -> vector<8x128xf32>
    %428 = vector.broadcast %9 : vector<1x128xf32> to vector<8x128xf32>
    %429 = arith.addf %427, %428 : vector<8x128xf32>
    %430 = vector.extract_strided_slice %429 {offsets = [0, 0], sizes = [8, 32], strides = [1, 1]} : vector<8x128xf32> to vector<8x32xf32>
    %431 = arith.negf %430 : vector<8x32xf32>
    %432 = math.exp %431 : vector<8x32xf32>
    %cst_199 = arith.constant 1.000000e+00 : f32
    %433 = vector.broadcast %cst_199 : f32 to vector<8x32xf32>
    %434 = arith.addf %433, %432 : vector<8x32xf32>
    %435 = arith.divf %433, %434 : vector<8x32xf32>
    %436 = vector.extract_strided_slice %429 {offsets = [0, 32], sizes = [8, 32], strides = [1, 1]} : vector<8x128xf32> to vector<8x32xf32>
    %437 = arith.negf %436 : vector<8x32xf32>
    %438 = math.exp %437 : vector<8x32xf32>
    %cst_200 = arith.constant 1.000000e+00 : f32
    %439 = vector.broadcast %cst_200 : f32 to vector<8x32xf32>
    %440 = arith.addf %439, %438 : vector<8x32xf32>
    %441 = arith.divf %439, %440 : vector<8x32xf32>
    %442 = vector.extract_strided_slice %429 {offsets = [0, 64], sizes = [8, 32], strides = [1, 1]} : vector<8x128xf32> to vector<8x32xf32>
    %443 = math.tanh %442 : vector<8x32xf32>
    %444 = vector.extract_strided_slice %429 {offsets = [0, 96], sizes = [8, 32], strides = [1, 1]} : vector<8x128xf32> to vector<8x32xf32>
    %445 = arith.negf %444 : vector<8x32xf32>
    %446 = math.exp %445 : vector<8x32xf32>
    %cst_201 = arith.constant 1.000000e+00 : f32
    %447 = vector.broadcast %cst_201 : f32 to vector<8x32xf32>
    %448 = arith.addf %447, %446 : vector<8x32xf32>
    %449 = arith.divf %447, %448 : vector<8x32xf32>
    %c0_202 = arith.constant 0 : index
    %c0_203 = arith.constant 0 : index
    %450 = vector.load %arg25[%c0_202, %c0_203] : memref<8x32xf32, #tpu.memory_space<vmem>>, vector<8x32xf32>
    %451 = arith.mulf %441, %450 : vector<8x32xf32>
    %452 = arith.mulf %435, %443 : vector<8x32xf32>
    %453 = arith.addf %451, %452 : vector<8x32xf32>
    %454 = math.tanh %453 : vector<8x32xf32>
    %455 = arith.mulf %449, %454 : vector<8x32xf32>
    %c0_204 = arith.constant 0 : index
    %c0_205 = arith.constant 0 : index
    %456 = vector.load %arg25[%c0_204, %c0_205] : memref<8x32xf32, #tpu.memory_space<vmem>>, vector<8x32xf32>
    tpu.vector_store %arg25[%c0_204, %c0_205], %453 {strides = array<i32>} : memref<8x32xf32, #tpu.memory_space<vmem>>, vector<8x32xf32>,
    %c0_206 = arith.constant 0 : index
    %c0_207 = arith.constant 0 : index
    %457 = vector.load %arg24[%c0_206, %c0_207] : memref<8x32xf32, #tpu.memory_space<vmem>>, vector<8x32xf32>
    tpu.vector_store %arg24[%c0_206, %c0_207], %455 {strides = array<i32>} : memref<8x32xf32, #tpu.memory_space<vmem>>, vector<8x32xf32>,
    %458 = vector.extract_strided_slice %455 {offsets = [0, 0], sizes = [8, 16], strides = [1, 1]} : vector<8x32xf32> to vector<8x16xf32>
    %459 = arith.index_cast %c8_i32 : i32 to index
    %c0_208 = arith.constant 0 : index
    %c0_209 = arith.constant 0 : index
    %460 = vector.load %arg26[%459, %c0_208, %c0_209] : memref<15x8x16xf32, #tpu.memory_space<vmem>>, vector<1x8x16xf32>
    %461 = vector.shape_cast %460 : vector<1x8x16xf32> to vector<8x16xf32>
    %462 = vector.shape_cast %458 : vector<8x16xf32> to vector<1x8x16xf32>
    tpu.vector_store %arg26[%459, %c0_208, %c0_209], %462 {strides = array<i32>} : memref<15x8x16xf32, #tpu.memory_space<vmem>>, vector<1x8x16xf32>,
    %463 = vector.extract_strided_slice %455 {offsets = [0, 16], sizes = [8, 16], strides = [1, 1]} : vector<8x32xf32> to vector<8x16xf32>
    %c11_i32_210 = arith.constant 11 : i32
    %464 = arith.subi %c11_i32_210, %c8_i32 : i32
    %465 = arith.index_cast %464 : i32 to index
    %c0_211 = arith.constant 0 : index
    %c0_212 = arith.constant 0 : index
    %466 = vector.load %arg27[%465, %c0_211, %c0_212] : memref<15x8x16xf32, #tpu.memory_space<vmem>>, vector<1x8x16xf32>
    %467 = vector.shape_cast %466 : vector<1x8x16xf32> to vector<8x16xf32>
    %468 = vector.shape_cast %463 : vector<8x16xf32> to vector<1x8x16xf32>
    tpu.vector_store %arg27[%465, %c0_211, %c0_212], %468 {strides = array<i32>} : memref<15x8x16xf32, #tpu.memory_space<vmem>>, vector<1x8x16xf32>,
    %c9_i32 = arith.constant 9 : i32
    %469 = arith.index_cast %c9_i32 : i32 to index
    %c0_213 = arith.constant 0 : index
    %c0_214 = arith.constant 0 : index
    %470 = vector.load %arg0[%469, %c0_213, %c0_214] : memref<12x8x32xf32, #tpu.memory_space<vmem>>, vector<1x8x32xf32>
    %471 = vector.shape_cast %470 : vector<1x8x32xf32> to vector<8x32xf32>
    %c11_i32_215 = arith.constant 11 : i32
    %472 = arith.subi %c11_i32_215, %c9_i32 : i32
    %473 = arith.index_cast %472 : i32 to index
    %c0_216 = arith.constant 0 : index
    %c0_217 = arith.constant 0 : index
    %474 = vector.load %arg0[%473, %c0_216, %c0_217] : memref<12x8x32xf32, #tpu.memory_space<vmem>>, vector<1x8x32xf32>
    %475 = vector.shape_cast %474 : vector<1x8x32xf32> to vector<8x32xf32>
    %c0_218 = arith.constant 0 : index
    %c0_219 = arith.constant 0 : index
    %476 = vector.load %arg24[%c0_218, %c0_219] : memref<8x32xf32, #tpu.memory_space<vmem>>, vector<8x32xf32>
    %477 = tpu.concatenate %471, %475, %476 in 1 : vector<8x32xf32>, vector<8x32xf32>, vector<8x32xf32> -> vector<8x96xf32>
    %cst_220 = arith.constant dense<0.000000e+00> : vector<8x128xf32>
    %478 = tpu.matmul %477, %8, %cst_220 {dimension_numbers = #tpu.dot_dimension_numbers<[1], [0], [0], [1], [0, 0, 1, 1], [], []>} : vector<8x96xf32>, vector<96x128xf32>, vector<8x128xf32> -> vector<8x128xf32>
    %479 = vector.broadcast %9 : vector<1x128xf32> to vector<8x128xf32>
    %480 = arith.addf %478, %479 : vector<8x128xf32>
    %481 = vector.extract_strided_slice %480 {offsets = [0, 0], sizes = [8, 32], strides = [1, 1]} : vector<8x128xf32> to vector<8x32xf32>
    %482 = arith.negf %481 : vector<8x32xf32>
    %483 = math.exp %482 : vector<8x32xf32>
    %cst_221 = arith.constant 1.000000e+00 : f32
    %484 = vector.broadcast %cst_221 : f32 to vector<8x32xf32>
    %485 = arith.addf %484, %483 : vector<8x32xf32>
    %486 = arith.divf %484, %485 : vector<8x32xf32>
    %487 = vector.extract_strided_slice %480 {offsets = [0, 32], sizes = [8, 32], strides = [1, 1]} : vector<8x128xf32> to vector<8x32xf32>
    %488 = arith.negf %487 : vector<8x32xf32>
    %489 = math.exp %488 : vector<8x32xf32>
    %cst_222 = arith.constant 1.000000e+00 : f32
    %490 = vector.broadcast %cst_222 : f32 to vector<8x32xf32>
    %491 = arith.addf %490, %489 : vector<8x32xf32>
    %492 = arith.divf %490, %491 : vector<8x32xf32>
    %493 = vector.extract_strided_slice %480 {offsets = [0, 64], sizes = [8, 32], strides = [1, 1]} : vector<8x128xf32> to vector<8x32xf32>
    %494 = math.tanh %493 : vector<8x32xf32>
    %495 = vector.extract_strided_slice %480 {offsets = [0, 96], sizes = [8, 32], strides = [1, 1]} : vector<8x128xf32> to vector<8x32xf32>
    %496 = arith.negf %495 : vector<8x32xf32>
    %497 = math.exp %496 : vector<8x32xf32>
    %cst_223 = arith.constant 1.000000e+00 : f32
    %498 = vector.broadcast %cst_223 : f32 to vector<8x32xf32>
    %499 = arith.addf %498, %497 : vector<8x32xf32>
    %500 = arith.divf %498, %499 : vector<8x32xf32>
    %c0_224 = arith.constant 0 : index
    %c0_225 = arith.constant 0 : index
    %501 = vector.load %arg25[%c0_224, %c0_225] : memref<8x32xf32, #tpu.memory_space<vmem>>, vector<8x32xf32>
    %502 = arith.mulf %492, %501 : vector<8x32xf32>
    %503 = arith.mulf %486, %494 : vector<8x32xf32>
    %504 = arith.addf %502, %503 : vector<8x32xf32>
    %505 = math.tanh %504 : vector<8x32xf32>
    %506 = arith.mulf %500, %505 : vector<8x32xf32>
    %c0_226 = arith.constant 0 : index
    %c0_227 = arith.constant 0 : index
    %507 = vector.load %arg25[%c0_226, %c0_227] : memref<8x32xf32, #tpu.memory_space<vmem>>, vector<8x32xf32>
    tpu.vector_store %arg25[%c0_226, %c0_227], %504 {strides = array<i32>} : memref<8x32xf32, #tpu.memory_space<vmem>>, vector<8x32xf32>,
    %c0_228 = arith.constant 0 : index
    %c0_229 = arith.constant 0 : index
    %508 = vector.load %arg24[%c0_228, %c0_229] : memref<8x32xf32, #tpu.memory_space<vmem>>, vector<8x32xf32>
    tpu.vector_store %arg24[%c0_228, %c0_229], %506 {strides = array<i32>} : memref<8x32xf32, #tpu.memory_space<vmem>>, vector<8x32xf32>,
    %509 = vector.extract_strided_slice %506 {offsets = [0, 0], sizes = [8, 16], strides = [1, 1]} : vector<8x32xf32> to vector<8x16xf32>
    %510 = arith.index_cast %c9_i32 : i32 to index
    %c0_230 = arith.constant 0 : index
    %c0_231 = arith.constant 0 : index
    %511 = vector.load %arg26[%510, %c0_230, %c0_231] : memref<15x8x16xf32, #tpu.memory_space<vmem>>, vector<1x8x16xf32>
    %512 = vector.shape_cast %511 : vector<1x8x16xf32> to vector<8x16xf32>
    %513 = vector.shape_cast %509 : vector<8x16xf32> to vector<1x8x16xf32>
    tpu.vector_store %arg26[%510, %c0_230, %c0_231], %513 {strides = array<i32>} : memref<15x8x16xf32, #tpu.memory_space<vmem>>, vector<1x8x16xf32>,
    %514 = vector.extract_strided_slice %506 {offsets = [0, 16], sizes = [8, 16], strides = [1, 1]} : vector<8x32xf32> to vector<8x16xf32>
    %c11_i32_232 = arith.constant 11 : i32
    %515 = arith.subi %c11_i32_232, %c9_i32 : i32
    %516 = arith.index_cast %515 : i32 to index
    %c0_233 = arith.constant 0 : index
    %c0_234 = arith.constant 0 : index
    %517 = vector.load %arg27[%516, %c0_233, %c0_234] : memref<15x8x16xf32, #tpu.memory_space<vmem>>, vector<1x8x16xf32>
    %518 = vector.shape_cast %517 : vector<1x8x16xf32> to vector<8x16xf32>
    %519 = vector.shape_cast %514 : vector<8x16xf32> to vector<1x8x16xf32>
    tpu.vector_store %arg27[%516, %c0_233, %c0_234], %519 {strides = array<i32>} : memref<15x8x16xf32, #tpu.memory_space<vmem>>, vector<1x8x16xf32>,
    %c10_i32 = arith.constant 10 : i32
    %520 = arith.index_cast %c10_i32 : i32 to index
    %c0_235 = arith.constant 0 : index
    %c0_236 = arith.constant 0 : index
    %521 = vector.load %arg0[%520, %c0_235, %c0_236] : memref<12x8x32xf32, #tpu.memory_space<vmem>>, vector<1x8x32xf32>
    %522 = vector.shape_cast %521 : vector<1x8x32xf32> to vector<8x32xf32>
    %c11_i32_237 = arith.constant 11 : i32
    %523 = arith.subi %c11_i32_237, %c10_i32 : i32
    %524 = arith.index_cast %523 : i32 to index
    %c0_238 = arith.constant 0 : index
    %c0_239 = arith.constant 0 : index
    %525 = vector.load %arg0[%524, %c0_238, %c0_239] : memref<12x8x32xf32, #tpu.memory_space<vmem>>, vector<1x8x32xf32>
    %526 = vector.shape_cast %525 : vector<1x8x32xf32> to vector<8x32xf32>
    %c0_240 = arith.constant 0 : index
    %c0_241 = arith.constant 0 : index
    %527 = vector.load %arg24[%c0_240, %c0_241] : memref<8x32xf32, #tpu.memory_space<vmem>>, vector<8x32xf32>
    %528 = tpu.concatenate %522, %526, %527 in 1 : vector<8x32xf32>, vector<8x32xf32>, vector<8x32xf32> -> vector<8x96xf32>
    %cst_242 = arith.constant dense<0.000000e+00> : vector<8x128xf32>
    %529 = tpu.matmul %528, %8, %cst_242 {dimension_numbers = #tpu.dot_dimension_numbers<[1], [0], [0], [1], [0, 0, 1, 1], [], []>} : vector<8x96xf32>, vector<96x128xf32>, vector<8x128xf32> -> vector<8x128xf32>
    %530 = vector.broadcast %9 : vector<1x128xf32> to vector<8x128xf32>
    %531 = arith.addf %529, %530 : vector<8x128xf32>
    %532 = vector.extract_strided_slice %531 {offsets = [0, 0], sizes = [8, 32], strides = [1, 1]} : vector<8x128xf32> to vector<8x32xf32>
    %533 = arith.negf %532 : vector<8x32xf32>
    %534 = math.exp %533 : vector<8x32xf32>
    %cst_243 = arith.constant 1.000000e+00 : f32
    %535 = vector.broadcast %cst_243 : f32 to vector<8x32xf32>
    %536 = arith.addf %535, %534 : vector<8x32xf32>
    %537 = arith.divf %535, %536 : vector<8x32xf32>
    %538 = vector.extract_strided_slice %531 {offsets = [0, 32], sizes = [8, 32], strides = [1, 1]} : vector<8x128xf32> to vector<8x32xf32>
    %539 = arith.negf %538 : vector<8x32xf32>
    %540 = math.exp %539 : vector<8x32xf32>
    %cst_244 = arith.constant 1.000000e+00 : f32
    %541 = vector.broadcast %cst_244 : f32 to vector<8x32xf32>
    %542 = arith.addf %541, %540 : vector<8x32xf32>
    %543 = arith.divf %541, %542 : vector<8x32xf32>
    %544 = vector.extract_strided_slice %531 {offsets = [0, 64], sizes = [8, 32], strides = [1, 1]} : vector<8x128xf32> to vector<8x32xf32>
    %545 = math.tanh %544 : vector<8x32xf32>
    %546 = vector.extract_strided_slice %531 {offsets = [0, 96], sizes = [8, 32], strides = [1, 1]} : vector<8x128xf32> to vector<8x32xf32>
    %547 = arith.negf %546 : vector<8x32xf32>
    %548 = math.exp %547 : vector<8x32xf32>
    %cst_245 = arith.constant 1.000000e+00 : f32
    %549 = vector.broadcast %cst_245 : f32 to vector<8x32xf32>
    %550 = arith.addf %549, %548 : vector<8x32xf32>
    %551 = arith.divf %549, %550 : vector<8x32xf32>
    %c0_246 = arith.constant 0 : index
    %c0_247 = arith.constant 0 : index
    %552 = vector.load %arg25[%c0_246, %c0_247] : memref<8x32xf32, #tpu.memory_space<vmem>>, vector<8x32xf32>
    %553 = arith.mulf %543, %552 : vector<8x32xf32>
    %554 = arith.mulf %537, %545 : vector<8x32xf32>
    %555 = arith.addf %553, %554 : vector<8x32xf32>
    %556 = math.tanh %555 : vector<8x32xf32>
    %557 = arith.mulf %551, %556 : vector<8x32xf32>
    %c0_248 = arith.constant 0 : index
    %c0_249 = arith.constant 0 : index
    %558 = vector.load %arg25[%c0_248, %c0_249] : memref<8x32xf32, #tpu.memory_space<vmem>>, vector<8x32xf32>
    tpu.vector_store %arg25[%c0_248, %c0_249], %555 {strides = array<i32>} : memref<8x32xf32, #tpu.memory_space<vmem>>, vector<8x32xf32>,
    %c0_250 = arith.constant 0 : index
    %c0_251 = arith.constant 0 : index
    %559 = vector.load %arg24[%c0_250, %c0_251] : memref<8x32xf32, #tpu.memory_space<vmem>>, vector<8x32xf32>
    tpu.vector_store %arg24[%c0_250, %c0_251], %557 {strides = array<i32>} : memref<8x32xf32, #tpu.memory_space<vmem>>, vector<8x32xf32>,
    %560 = vector.extract_strided_slice %557 {offsets = [0, 0], sizes = [8, 16], strides = [1, 1]} : vector<8x32xf32> to vector<8x16xf32>
    %561 = arith.index_cast %c10_i32 : i32 to index
    %c0_252 = arith.constant 0 : index
    %c0_253 = arith.constant 0 : index
    %562 = vector.load %arg26[%561, %c0_252, %c0_253] : memref<15x8x16xf32, #tpu.memory_space<vmem>>, vector<1x8x16xf32>
    %563 = vector.shape_cast %562 : vector<1x8x16xf32> to vector<8x16xf32>
    %564 = vector.shape_cast %560 : vector<8x16xf32> to vector<1x8x16xf32>
    tpu.vector_store %arg26[%561, %c0_252, %c0_253], %564 {strides = array<i32>} : memref<15x8x16xf32, #tpu.memory_space<vmem>>, vector<1x8x16xf32>,
    %565 = vector.extract_strided_slice %557 {offsets = [0, 16], sizes = [8, 16], strides = [1, 1]} : vector<8x32xf32> to vector<8x16xf32>
    %c11_i32_254 = arith.constant 11 : i32
    %566 = arith.subi %c11_i32_254, %c10_i32 : i32
    %567 = arith.index_cast %566 : i32 to index
    %c0_255 = arith.constant 0 : index
    %c0_256 = arith.constant 0 : index
    %568 = vector.load %arg27[%567, %c0_255, %c0_256] : memref<15x8x16xf32, #tpu.memory_space<vmem>>, vector<1x8x16xf32>
    %569 = vector.shape_cast %568 : vector<1x8x16xf32> to vector<8x16xf32>
    %570 = vector.shape_cast %565 : vector<8x16xf32> to vector<1x8x16xf32>
    tpu.vector_store %arg27[%567, %c0_255, %c0_256], %570 {strides = array<i32>} : memref<15x8x16xf32, #tpu.memory_space<vmem>>, vector<1x8x16xf32>,
    %c11_i32_257 = arith.constant 11 : i32
    %571 = arith.index_cast %c11_i32_257 : i32 to index
    %c0_258 = arith.constant 0 : index
    %c0_259 = arith.constant 0 : index
    %572 = vector.load %arg0[%571, %c0_258, %c0_259] : memref<12x8x32xf32, #tpu.memory_space<vmem>>, vector<1x8x32xf32>
    %573 = vector.shape_cast %572 : vector<1x8x32xf32> to vector<8x32xf32>
    %c11_i32_260 = arith.constant 11 : i32
    %574 = arith.subi %c11_i32_260, %c11_i32_257 : i32
    %575 = arith.index_cast %574 : i32 to index
    %c0_261 = arith.constant 0 : index
    %c0_262 = arith.constant 0 : index
    %576 = vector.load %arg0[%575, %c0_261, %c0_262] : memref<12x8x32xf32, #tpu.memory_space<vmem>>, vector<1x8x32xf32>
    %577 = vector.shape_cast %576 : vector<1x8x32xf32> to vector<8x32xf32>
    %c0_263 = arith.constant 0 : index
    %c0_264 = arith.constant 0 : index
    %578 = vector.load %arg24[%c0_263, %c0_264] : memref<8x32xf32, #tpu.memory_space<vmem>>, vector<8x32xf32>
    %579 = tpu.concatenate %573, %577, %578 in 1 : vector<8x32xf32>, vector<8x32xf32>, vector<8x32xf32> -> vector<8x96xf32>
    %cst_265 = arith.constant dense<0.000000e+00> : vector<8x128xf32>
    %580 = tpu.matmul %579, %8, %cst_265 {dimension_numbers = #tpu.dot_dimension_numbers<[1], [0], [0], [1], [0, 0, 1, 1], [], []>} : vector<8x96xf32>, vector<96x128xf32>, vector<8x128xf32> -> vector<8x128xf32>
    %581 = vector.broadcast %9 : vector<1x128xf32> to vector<8x128xf32>
    %582 = arith.addf %580, %581 : vector<8x128xf32>
    %583 = vector.extract_strided_slice %582 {offsets = [0, 0], sizes = [8, 32], strides = [1, 1]} : vector<8x128xf32> to vector<8x32xf32>
    %584 = arith.negf %583 : vector<8x32xf32>
    %585 = math.exp %584 : vector<8x32xf32>
    %cst_266 = arith.constant 1.000000e+00 : f32
    %586 = vector.broadcast %cst_266 : f32 to vector<8x32xf32>
    %587 = arith.addf %586, %585 : vector<8x32xf32>
    %588 = arith.divf %586, %587 : vector<8x32xf32>
    %589 = vector.extract_strided_slice %582 {offsets = [0, 32], sizes = [8, 32], strides = [1, 1]} : vector<8x128xf32> to vector<8x32xf32>
    %590 = arith.negf %589 : vector<8x32xf32>
    %591 = math.exp %590 : vector<8x32xf32>
    %cst_267 = arith.constant 1.000000e+00 : f32
    %592 = vector.broadcast %cst_267 : f32 to vector<8x32xf32>
    %593 = arith.addf %592, %591 : vector<8x32xf32>
    %594 = arith.divf %592, %593 : vector<8x32xf32>
    %595 = vector.extract_strided_slice %582 {offsets = [0, 64], sizes = [8, 32], strides = [1, 1]} : vector<8x128xf32> to vector<8x32xf32>
    %596 = math.tanh %595 : vector<8x32xf32>
    %597 = vector.extract_strided_slice %582 {offsets = [0, 96], sizes = [8, 32], strides = [1, 1]} : vector<8x128xf32> to vector<8x32xf32>
    %598 = arith.negf %597 : vector<8x32xf32>
    %599 = math.exp %598 : vector<8x32xf32>
    %cst_268 = arith.constant 1.000000e+00 : f32
    %600 = vector.broadcast %cst_268 : f32 to vector<8x32xf32>
    %601 = arith.addf %600, %599 : vector<8x32xf32>
    %602 = arith.divf %600, %601 : vector<8x32xf32>
    %c0_269 = arith.constant 0 : index
    %c0_270 = arith.constant 0 : index
    %603 = vector.load %arg25[%c0_269, %c0_270] : memref<8x32xf32, #tpu.memory_space<vmem>>, vector<8x32xf32>
    %604 = arith.mulf %594, %603 : vector<8x32xf32>
    %605 = arith.mulf %588, %596 : vector<8x32xf32>
    %606 = arith.addf %604, %605 : vector<8x32xf32>
    %607 = math.tanh %606 : vector<8x32xf32>
    %608 = arith.mulf %602, %607 : vector<8x32xf32>
    %c0_271 = arith.constant 0 : index
    %c0_272 = arith.constant 0 : index
    %609 = vector.load %arg25[%c0_271, %c0_272] : memref<8x32xf32, #tpu.memory_space<vmem>>, vector<8x32xf32>
    tpu.vector_store %arg25[%c0_271, %c0_272], %606 {strides = array<i32>} : memref<8x32xf32, #tpu.memory_space<vmem>>, vector<8x32xf32>,
    %c0_273 = arith.constant 0 : index
    %c0_274 = arith.constant 0 : index
    %610 = vector.load %arg24[%c0_273, %c0_274] : memref<8x32xf32, #tpu.memory_space<vmem>>, vector<8x32xf32>
    tpu.vector_store %arg24[%c0_273, %c0_274], %608 {strides = array<i32>} : memref<8x32xf32, #tpu.memory_space<vmem>>, vector<8x32xf32>,
    %611 = vector.extract_strided_slice %608 {offsets = [0, 0], sizes = [8, 16], strides = [1, 1]} : vector<8x32xf32> to vector<8x16xf32>
    %612 = arith.index_cast %c11_i32_257 : i32 to index
    %c0_275 = arith.constant 0 : index
    %c0_276 = arith.constant 0 : index
    %613 = vector.load %arg26[%612, %c0_275, %c0_276] : memref<15x8x16xf32, #tpu.memory_space<vmem>>, vector<1x8x16xf32>
    %614 = vector.shape_cast %613 : vector<1x8x16xf32> to vector<8x16xf32>
    %615 = vector.shape_cast %611 : vector<8x16xf32> to vector<1x8x16xf32>
    tpu.vector_store %arg26[%612, %c0_275, %c0_276], %615 {strides = array<i32>} : memref<15x8x16xf32, #tpu.memory_space<vmem>>, vector<1x8x16xf32>,
    %616 = vector.extract_strided_slice %608 {offsets = [0, 16], sizes = [8, 16], strides = [1, 1]} : vector<8x32xf32> to vector<8x16xf32>
    %c11_i32_277 = arith.constant 11 : i32
    %617 = arith.subi %c11_i32_277, %c11_i32_257 : i32
    %618 = arith.index_cast %617 : i32 to index
    %c0_278 = arith.constant 0 : index
    %c0_279 = arith.constant 0 : index
    %619 = vector.load %arg27[%618, %c0_278, %c0_279] : memref<15x8x16xf32, #tpu.memory_space<vmem>>, vector<1x8x16xf32>
    %620 = vector.shape_cast %619 : vector<1x8x16xf32> to vector<8x16xf32>
    %621 = vector.shape_cast %616 : vector<8x16xf32> to vector<1x8x16xf32>
    tpu.vector_store %arg27[%618, %c0_278, %c0_279], %621 {strides = array<i32>} : memref<15x8x16xf32, #tpu.memory_space<vmem>>, vector<1x8x16xf32>,
    %c12_i32 = arith.constant 12 : i32
    %c0_280 = arith.constant 0 : index
    %c0_281 = arith.constant 0 : index
    %c0_282 = arith.constant 0 : index
    %622 = vector.load %arg26[%c0_280, %c0_281, %c0_282] : memref<15x8x16xf32, #tpu.memory_space<vmem>>, vector<15x8x16xf32>
    %c0_283 = arith.constant 0 : index
    %c0_284 = arith.constant 0 : index
    %c0_285 = arith.constant 0 : index
    %623 = vector.load %arg27[%c0_283, %c0_284, %c0_285] : memref<15x8x16xf32, #tpu.memory_space<vmem>>, vector<15x8x16xf32>
    %624 = vector.extract_strided_slice %622 {offsets = [0, 0, 0], sizes = [12, 8, 16], strides = [1, 1, 1]} : vector<15x8x16xf32> to vector<12x8x16xf32>
    %625 = vector.extract_strided_slice %623 {offsets = [0, 0, 0], sizes = [12, 8, 16], strides = [1, 1, 1]} : vector<15x8x16xf32> to vector<12x8x16xf32>
    %626 = vector.extract_strided_slice %622 {offsets = [1, 0, 0], sizes = [12, 8, 16], strides = [1, 1, 1]} : vector<15x8x16xf32> to vector<12x8x16xf32>
    %627 = vector.extract_strided_slice %623 {offsets = [1, 0, 0], sizes = [12, 8, 16], strides = [1, 1, 1]} : vector<15x8x16xf32> to vector<12x8x16xf32>
    %628 = vector.extract_strided_slice %622 {offsets = [2, 0, 0], sizes = [12, 8, 16], strides = [1, 1, 1]} : vector<15x8x16xf32> to vector<12x8x16xf32>
    %629 = vector.extract_strided_slice %623 {offsets = [2, 0, 0], sizes = [12, 8, 16], strides = [1, 1, 1]} : vector<15x8x16xf32> to vector<12x8x16xf32>
    %630 = vector.extract_strided_slice %622 {offsets = [3, 0, 0], sizes = [12, 8, 16], strides = [1, 1, 1]} : vector<15x8x16xf32> to vector<12x8x16xf32>
    %631 = vector.extract_strided_slice %623 {offsets = [3, 0, 0], sizes = [12, 8, 16], strides = [1, 1, 1]} : vector<15x8x16xf32> to vector<12x8x16xf32>
    %632 = tpu.concatenate %624, %625, %626, %627, %628, %629, %630, %631 in 2 : vector<12x8x16xf32>, vector<12x8x16xf32>, vector<12x8x16xf32>, vector<12x8x16xf32>, vector<12x8x16xf32>, vector<12x8x16xf32>, vector<12x8x16xf32>, vector<12x8x16xf32> -> vector<12x8x128xf32>
    %633 = vector.shape_cast %632 : vector<12x8x128xf32> to vector<96x128xf32>
    %c0_286 = arith.constant 0 : index
    %c0_287 = arith.constant 0 : index
    %634 = vector.load %arg3[%c0_286, %c0_287] : memref<128x24xf32, #tpu.memory_space<vmem>>, vector<128x24xf32>
    %cst_288 = arith.constant dense<0.000000e+00> : vector<96x24xf32>
    %635 = tpu.matmul %633, %634, %cst_288 {dimension_numbers = #tpu.dot_dimension_numbers<[1], [0], [0], [1], [0, 0, 1, 1], [], []>} : vector<96x128xf32>, vector<128x24xf32>, vector<96x24xf32> -> vector<96x24xf32>
    %c0_289 = arith.constant 0 : index
    %c0_290 = arith.constant 0 : index
    %636 = vector.load %arg4[%c0_289, %c0_290] : memref<1x24xf32, #tpu.memory_space<vmem>>, vector<1x24xf32>
    %637 = vector.broadcast %636 : vector<1x24xf32> to vector<96x24xf32>
    %638 = arith.addf %635, %637 : vector<96x24xf32>
    %639 = vector.shape_cast %638 : vector<96x24xf32> to vector<12x8x24xf32>
    %c0_291 = arith.constant 0 : index
    %c0_292 = arith.constant 0 : index
    %c0_293 = arith.constant 0 : index
    %640 = vector.load %arg5[%c0_291, %c0_292, %c0_293] : memref<12x1x24xf32, #tpu.memory_space<vmem>>, vector<12x1x24xf32>
    %641 = vector.broadcast %640 : vector<12x1x24xf32> to vector<12x8x24xf32>
    %642 = arith.addf %639, %641 : vector<12x8x24xf32>
    %cst_294 = arith.constant dense<0xFF800000> : vector<8x24xf32>
    %643 = vector.multi_reduction <maximumf>, %642, %cst_294 [0] : vector<12x8x24xf32> to vector<8x24xf32>
    %cst_295 = arith.constant 0.000000e+00 : f32
    %644 = vector.broadcast %cst_295 : f32 to vector<8x24xf32>
    %645 = arith.maximumf %643, %644 : vector<8x24xf32>
    %c0_296 = arith.constant 0 : index
    %c0_297 = arith.constant 0 : index
    %646 = vector.load %arg6[%c0_296, %c0_297] : memref<24x16xf32, #tpu.memory_space<vmem>>, vector<24x16xf32>
    %cst_298 = arith.constant dense<0.000000e+00> : vector<8x16xf32>
    %647 = tpu.matmul %645, %646, %cst_298 {dimension_numbers = #tpu.dot_dimension_numbers<[1], [0], [0], [1], [0, 0, 1, 1], [], []>} : vector<8x24xf32>, vector<24x16xf32>, vector<8x16xf32> -> vector<8x16xf32>
    %c0_299 = arith.constant 0 : index
    %c0_300 = arith.constant 0 : index
    %648 = vector.load %arg7[%c0_299, %c0_300] : memref<1x16xf32, #tpu.memory_space<vmem>>, vector<1x16xf32>
    %649 = vector.broadcast %648 : vector<1x16xf32> to vector<8x16xf32>
    %650 = arith.addf %647, %649 : vector<8x16xf32>
    %651 = math.tanh %650 : vector<8x16xf32>
    %c0_301 = arith.constant 0 : index
    %c0_302 = arith.constant 0 : index
    %652 = vector.load %arg8[%c0_301, %c0_302] : memref<8x1xf32, #tpu.memory_space<vmem>>, vector<8x1xf32>
    %653 = vector.broadcast %652 : vector<8x1xf32> to vector<8x16xf32>
    %654 = arith.mulf %651, %653 : vector<8x16xf32>
    %c0_303 = arith.constant 0 : index
    %c0_304 = arith.constant 0 : index
    %655 = vector.load %arg9[%c0_303, %c0_304] : memref<16x16xf32, #tpu.memory_space<vmem>>, vector<16x16xf32>
    %cst_305 = arith.constant dense<0.000000e+00> : vector<8x16xf32>
    %656 = tpu.matmul %654, %655, %cst_305 {dimension_numbers = #tpu.dot_dimension_numbers<[1], [0], [0], [1], [0, 0, 1, 1], [], []>} : vector<8x16xf32>, vector<16x16xf32>, vector<8x16xf32> -> vector<8x16xf32>
    %c0_306 = arith.constant 0 : index
    %c0_307 = arith.constant 0 : index
    %657 = vector.load %arg10[%c0_306, %c0_307] : memref<1x16xf32, #tpu.memory_space<vmem>>, vector<1x16xf32>
    %658 = vector.broadcast %657 : vector<1x16xf32> to vector<8x16xf32>
    %659 = arith.addf %656, %658 : vector<8x16xf32>
    %660 = math.tanh %659 : vector<8x16xf32>
    %c0_308 = arith.constant 0 : index
    %c0_309 = arith.constant 0 : index
    %661 = vector.load %arg11[%c0_308, %c0_309] : memref<8x4xf32, #tpu.memory_space<vmem>>, vector<8x4xf32>
    %662 = tpu.concatenate %660, %661 in 1 : vector<8x16xf32>, vector<8x4xf32> -> vector<8x20xf32>
    %c0_310 = arith.constant 0 : index
    %c0_311 = arith.constant 0 : index
    %663 = vector.load %arg12[%c0_310, %c0_311] : memref<8x8xf32, #tpu.memory_space<vmem>>, vector<8x8xf32>
    %c0_312 = arith.constant 0 : index
    %c0_313 = arith.constant 0 : index
    %664 = vector.load %arg13[%c0_312, %c0_313] : memref<20x16xf32, #tpu.memory_space<vmem>>, vector<20x16xf32>
    %cst_314 = arith.constant dense<0.000000e+00> : vector<8x16xf32>
    %665 = tpu.matmul %662, %664, %cst_314 {dimension_numbers = #tpu.dot_dimension_numbers<[1], [0], [0], [1], [0, 0, 1, 1], [], []>} : vector<8x20xf32>, vector<20x16xf32>, vector<8x16xf32> -> vector<8x16xf32>
    %cst_315 = arith.constant dense<0.000000e+00> : vector<8x16xf32>
    %666 = tpu.matmul %663, %665, %cst_315 {dimension_numbers = #tpu.dot_dimension_numbers<[1], [0], [0], [1], [0, 0, 1, 1], [], []>} : vector<8x8xf32>, vector<8x16xf32>, vector<8x16xf32> -> vector<8x16xf32>
    %c0_316 = arith.constant 0 : index
    %c0_317 = arith.constant 0 : index
    %667 = vector.load %arg14[%c0_316, %c0_317] : memref<1x16xf32, #tpu.memory_space<vmem>>, vector<1x16xf32>
    %668 = vector.broadcast %667 : vector<1x16xf32> to vector<8x16xf32>
    %669 = arith.addf %666, %668 : vector<8x16xf32>
    %670 = math.tanh %669 : vector<8x16xf32>
    %c0_318 = arith.constant 0 : index
    %c0_319 = arith.constant 0 : index
    %671 = vector.load %arg15[%c0_318, %c0_319] : memref<16x16xf32, #tpu.memory_space<vmem>>, vector<16x16xf32>
    %cst_320 = arith.constant dense<0.000000e+00> : vector<8x16xf32>
    %672 = tpu.matmul %670, %671, %cst_320 {dimension_numbers = #tpu.dot_dimension_numbers<[1], [0], [0], [1], [0, 0, 1, 1], [], []>} : vector<8x16xf32>, vector<16x16xf32>, vector<8x16xf32> -> vector<8x16xf32>
    %cst_321 = arith.constant dense<0.000000e+00> : vector<8x16xf32>
    %673 = tpu.matmul %663, %672, %cst_321 {dimension_numbers = #tpu.dot_dimension_numbers<[1], [0], [0], [1], [0, 0, 1, 1], [], []>} : vector<8x8xf32>, vector<8x16xf32>, vector<8x16xf32> -> vector<8x16xf32>
    %c0_322 = arith.constant 0 : index
    %c0_323 = arith.constant 0 : index
    %674 = vector.load %arg16[%c0_322, %c0_323] : memref<1x16xf32, #tpu.memory_space<vmem>>, vector<1x16xf32>
    %675 = vector.broadcast %674 : vector<1x16xf32> to vector<8x16xf32>
    %676 = arith.addf %673, %675 : vector<8x16xf32>
    %677 = math.tanh %676 : vector<8x16xf32>
    %c0_324 = arith.constant 0 : index
    %c0_325 = arith.constant 0 : index
    %678 = vector.load %arg17[%c0_324, %c0_325] : memref<16x32xf32, #tpu.memory_space<vmem>>, vector<16x32xf32>
    %cst_326 = arith.constant dense<0.000000e+00> : vector<8x32xf32>
    %679 = tpu.matmul %677, %678, %cst_326 {dimension_numbers = #tpu.dot_dimension_numbers<[1], [0], [0], [1], [0, 0, 1, 1], [], []>} : vector<8x16xf32>, vector<16x32xf32>, vector<8x32xf32> -> vector<8x32xf32>
    %cst_327 = arith.constant 0.000000e+00 : f32
    %680 = vector.broadcast %cst_327 : f32 to vector<8x8xf32>
    %681 = arith.cmpf ogt, %663, %680 : vector<8x8xf32>
    %cst_328 = arith.constant 0.000000e+00 : f32
    %682 = vector.broadcast %cst_328 : f32 to vector<8x16xf32>
    %683 = vector.extract_strided_slice %679 {offsets = [0, 0], sizes = [8, 16], strides = [1, 1]} : vector<8x32xf32> to vector<8x16xf32>
    %c0_329 = arith.constant 0 : index
    %c0_330 = arith.constant 0 : index
    %684 = vector.load %arg18[%c0_329, %c0_330] : memref<2x16xf32, #tpu.memory_space<vmem>>, vector<1x16xf32>
    %c0_331 = arith.constant 0 : index
    %c0_332 = arith.constant 0 : index
    %685 = vector.load %arg19[%c0_331, %c0_332] : memref<2x16xf32, #tpu.memory_space<vmem>>, vector<1x16xf32>
    %cst_333 = arith.constant dense<0.000000e+00> : vector<1x8xf32>
    %686 = tpu.matmul %684, %683, %cst_333 {dimension_numbers = #tpu.dot_dimension_numbers<[1], [1], [0], [0], [0, 0, 1, 0], [], []>} : vector<1x16xf32>, vector<8x16xf32>, vector<1x8xf32> -> vector<1x8xf32>
    %687 = vector.broadcast %685 : vector<1x16xf32> to vector<8x16xf32>
    %688 = arith.mulf %683, %687 : vector<8x16xf32>
    %cst_334 = arith.constant dense<0.000000e+00> : vector<8xf32>
    %689 = vector.multi_reduction <add>, %688, %cst_334 [1] : vector<8x16xf32> to vector<8xf32>
    %690 = vector.shape_cast %689 : vector<8xf32> to vector<8x1xf32>
    %691 = vector.broadcast %690 : vector<8x1xf32> to vector<8x8xf32>
    %692 = vector.broadcast %686 : vector<1x8xf32> to vector<8x8xf32>
    %693 = arith.addf %691, %692 : vector<8x8xf32>
    %cst_335 = arith.constant 0.000000e+00 : f32
    %694 = vector.broadcast %cst_335 : f32 to vector<8x8xf32>
    %695 = arith.cmpf ogt, %693, %694 : vector<8x8xf32>
    %cst_336 = arith.constant 2.000000e-01 : f32
    %696 = vector.broadcast %cst_336 : f32 to vector<8x8xf32>
    %697 = arith.mulf %696, %693 : vector<8x8xf32>
    %698 = arith.select %695, %693, %697 : vector<8x8xi1>, vector<8x8xf32>
    %cst_337 = arith.constant -1.000000e+30 : f32
    %699 = vector.broadcast %cst_337 : f32 to vector<8x8xf32>
    %700 = arith.select %681, %698, %699 : vector<8x8xi1>, vector<8x8xf32>
    %cst_338 = arith.constant dense<0xFF800000> : vector<8xf32>
    %701 = vector.multi_reduction <maximumf>, %700, %cst_338 [1] : vector<8x8xf32> to vector<8xf32>
    %702 = vector.shape_cast %701 : vector<8xf32> to vector<8x1xf32>
    %703 = vector.broadcast %702 : vector<8x1xf32> to vector<8x8xf32>
    %704 = arith.subf %700, %703 : vector<8x8xf32>
    %705 = math.exp %704 : vector<8x8xf32>
    %cst_339 = arith.constant dense<0.000000e+00> : vector<8xf32>
    %706 = vector.multi_reduction <add>, %705, %cst_339 [1] : vector<8x8xf32> to vector<8xf32>
    %707 = vector.shape_cast %706 : vector<8xf32> to vector<8x1xf32>
    %708 = vector.broadcast %707 : vector<8x1xf32> to vector<8x8xf32>
    %709 = arith.divf %705, %708 : vector<8x8xf32>
    %cst_340 = arith.constant dense<0.000000e+00> : vector<8x16xf32>
    %710 = tpu.matmul %709, %683, %cst_340 {dimension_numbers = #tpu.dot_dimension_numbers<[1], [0], [0], [1], [0, 0, 1, 1], [], []>} : vector<8x8xf32>, vector<8x16xf32>, vector<8x16xf32> -> vector<8x16xf32>
    %711 = arith.addf %682, %710 : vector<8x16xf32>
    %712 = vector.extract_strided_slice %679 {offsets = [0, 16], sizes = [8, 16], strides = [1, 1]} : vector<8x32xf32> to vector<8x16xf32>
    %c1 = arith.constant 1 : index
    %c0_341 = arith.constant 0 : index
    %713 = vector.load %arg18[%c1, %c0_341] : memref<2x16xf32, #tpu.memory_space<vmem>>, vector<1x16xf32>
    %c1_342 = arith.constant 1 : index
    %c0_343 = arith.constant 0 : index
    %714 = vector.load %arg19[%c1_342, %c0_343] : memref<2x16xf32, #tpu.memory_space<vmem>>, vector<1x16xf32>
    %cst_344 = arith.constant dense<0.000000e+00> : vector<1x8xf32>
    %715 = tpu.matmul %713, %712, %cst_344 {dimension_numbers = #tpu.dot_dimension_numbers<[1], [1], [0], [0], [0, 0, 1, 0], [], []>} : vector<1x16xf32>, vector<8x16xf32>, vector<1x8xf32> -> vector<1x8xf32>
    %716 = vector.broadcast %714 : vector<1x16xf32> to vector<8x16xf32>
    %717 = arith.mulf %712, %716 : vector<8x16xf32>
    %cst_345 = arith.constant dense<0.000000e+00> : vector<8xf32>
    %718 = vector.multi_reduction <add>, %717, %cst_345 [1] : vector<8x16xf32> to vector<8xf32>
    %719 = vector.shape_cast %718 : vector<8xf32> to vector<8x1xf32>
    %720 = vector.broadcast %719 : vector<8x1xf32> to vector<8x8xf32>
    %721 = vector.broadcast %715 : vector<1x8xf32> to vector<8x8xf32>
    %722 = arith.addf %720, %721 : vector<8x8xf32>
    %cst_346 = arith.constant 0.000000e+00 : f32
    %723 = vector.broadcast %cst_346 : f32 to vector<8x8xf32>
    %724 = arith.cmpf ogt, %722, %723 : vector<8x8xf32>
    %cst_347 = arith.constant 2.000000e-01 : f32
    %725 = vector.broadcast %cst_347 : f32 to vector<8x8xf32>
    %726 = arith.mulf %725, %722 : vector<8x8xf32>
    %727 = arith.select %724, %722, %726 : vector<8x8xi1>, vector<8x8xf32>
    %cst_348 = arith.constant -1.000000e+30 : f32
    %728 = vector.broadcast %cst_348 : f32 to vector<8x8xf32>
    %729 = arith.select %681, %727, %728 : vector<8x8xi1>, vector<8x8xf32>
    %cst_349 = arith.constant dense<0xFF800000> : vector<8xf32>
    %730 = vector.multi_reduction <maximumf>, %729, %cst_349 [1] : vector<8x8xf32> to vector<8xf32>
    %731 = vector.shape_cast %730 : vector<8xf32> to vector<8x1xf32>
    %732 = vector.broadcast %731 : vector<8x1xf32> to vector<8x8xf32>
    %733 = arith.subf %729, %732 : vector<8x8xf32>
    %734 = math.exp %733 : vector<8x8xf32>
    %cst_350 = arith.constant dense<0.000000e+00> : vector<8xf32>
    %735 = vector.multi_reduction <add>, %734, %cst_350 [1] : vector<8x8xf32> to vector<8xf32>
    %736 = vector.shape_cast %735 : vector<8xf32> to vector<8x1xf32>
    %737 = vector.broadcast %736 : vector<8x1xf32> to vector<8x8xf32>
    %738 = arith.divf %734, %737 : vector<8x8xf32>
    %cst_351 = arith.constant dense<0.000000e+00> : vector<8x16xf32>
    %739 = tpu.matmul %738, %712, %cst_351 {dimension_numbers = #tpu.dot_dimension_numbers<[1], [0], [0], [1], [0, 0, 1, 1], [], []>} : vector<8x8xf32>, vector<8x16xf32>, vector<8x16xf32> -> vector<8x16xf32>
    %740 = arith.addf %711, %739 : vector<8x16xf32>
    %cst_352 = arith.constant 5.000000e-01 : f32
    %741 = vector.broadcast %cst_352 : f32 to vector<8x16xf32>
    %742 = arith.mulf %740, %741 : vector<8x16xf32>
    %c0_353 = arith.constant 0 : index
    %c0_354 = arith.constant 0 : index
    %743 = vector.load %arg20[%c0_353, %c0_354] : memref<1x16xf32, #tpu.memory_space<vmem>>, vector<1x16xf32>
    %744 = vector.broadcast %743 : vector<1x16xf32> to vector<8x16xf32>
    %745 = arith.addf %742, %744 : vector<8x16xf32>
    %746 = math.tanh %745 : vector<8x16xf32>
    %c0_355 = arith.constant 0 : index
    %c0_356 = arith.constant 0 : index
    %747 = vector.load %arg21[%c0_355, %c0_356] : memref<16x3xf32, #tpu.memory_space<vmem>>, vector<16x3xf32>
    %cst_357 = arith.constant dense<0.000000e+00> : vector<8x3xf32>
    %748 = tpu.matmul %746, %747, %cst_357 {dimension_numbers = #tpu.dot_dimension_numbers<[1], [0], [0], [1], [0, 0, 1, 1], [], []>} : vector<8x16xf32>, vector<16x3xf32>, vector<8x3xf32> -> vector<8x3xf32>
    %c0_358 = arith.constant 0 : index
    %c0_359 = arith.constant 0 : index
    %749 = vector.load %arg22[%c0_358, %c0_359] : memref<1x3xf32, #tpu.memory_space<vmem>>, vector<1x3xf32>
    %750 = vector.broadcast %749 : vector<1x3xf32> to vector<8x3xf32>
    %751 = arith.addf %748, %750 : vector<8x3xf32>
    %c0_360 = arith.constant 0 : index
    %c0_361 = arith.constant 0 : index
    %752 = vector.load %arg23[%c0_360, %c0_361] : memref<8x3xf32, #tpu.memory_space<vmem>>, vector<8x3xf32>
    tpu.vector_store %arg23[%c0_360, %c0_361], %751 {strides = array<i32>} : memref<8x3xf32, #tpu.memory_space<vmem>>, vector<8x3xf32>,
    return
  }
}

</mosaic_0001>

<bundles_post_ra>
// kernel: graph_model_forward.1
= control target key start
LH: loop header
LB: loop body
LE: loop exit
PB: predicated region body
PF: predicated region fallthrough
CT: control target
= control target key end

     0   :  { %vm74_vm0 = vcmask 261120   ;;  %v4784_v1 = vmov 0.0   ;;  %v4785_v2 = vmov 0.0|0.0   ;;  %vm4787_vm1 = vmmov 0   ;;  %s4788_s25 = smov 64   ;;  %s4791_s26 = smov 48   ;;  %s6091_s0 = inlined_call_operand.vmem [shape: f32[12,8,32], index: 0, kind: input, shape index: {}]   ;;  %s6092_s1 = inlined_call_operand.vmem [shape: f32[96,128], index: 1, kind: input, shape index: {}]   ;;  %s6093_s2 = inlined_call_operand.vmem [shape: f32[1,128], index: 2, kind: input, shape index: {}]   ;;  %s6094_s3 = inlined_call_operand.vmem [shape: f32[128,24], index: 3, kind: input, shape index: {}]   ;;  %s6095_s6 = inlined_call_operand.vmem [shape: f32[24,16], index: 6, kind: input, shape index: {}]   ;;  %s6096_s8 = inlined_call_operand.vmem [shape: f32[8,1], index: 8, kind: input, shape index: {}]   ;;  %s6097_s4 = inlined_call_operand.vmem [shape: f32[1,24], index: 4, kind: input, shape index: {}]   ;;  %s6098_s5 = inlined_call_operand.vmem [shape: f32[12,1,24], index: 5, kind: input, shape index: {}]   ;;  %s6099_s9 = inlined_call_operand.vmem [shape: f32[16,16], index: 9, kind: input, shape index: {}]   ;;  %s6100_s11 = inlined_call_operand.vmem [shape: f32[8,4], index: 11, kind: input, shape index: {}]   ;;  %s6101_s7 = inlined_call_operand.vmem [shape: f32[1,16], index: 7, kind: input, shape index: {}]   ;;  %s6102_s13 = inlined_call_operand.vmem [shape: f32[20,16], index: 13, kind: input, shape index: {}]   ;;  %s6103_s10 = inlined_call_operand.vmem [shape: f32[1,16], index: 10, kind: input, shape index: {}]   ;;  %s6104_s12 = inlined_call_operand.vmem [shape: f32[8,8], index: 12, kind: input, shape index: {}]   ;;  %s6105_s15 = inlined_call_operand.vmem [shape: f32[16,16], index: 15, kind: input, shape index: {}]   ;;  %s6106_s14 = inlined_call_operand.vmem [shape: f32[1,16], index: 14, kind: input, shape index: {}]   ;;  %s6107_s17 = inlined_call_operand.vmem [shape: f32[16,32], index: 17, kind: input, shape index: {}]   ;;  %s6108_s19 = inlined_call_operand.vmem [shape: f32[2,16], index: 19, kind: input, shape index: {}]   ;;  %s6109_s16 = inlined_call_operand.vmem [shape: f32[1,16], index: 16, kind: input, shape index: {}]   ;;  %s6110_s18 = inlined_call_operand.vmem [shape: f32[2,16], index: 18, kind: input, shape index: {}]   ;;  %s6111_s21 = inlined_call_operand.vmem [shape: f32[16,3], index: 21, kind: input, shape index: {}]   ;;  %s6112_s20 = inlined_call_operand.vmem [shape: f32[1,16], index: 20, kind: input, shape index: {}]   ;;  %s6113_s22 = inlined_call_operand.vmem [shape: f32[1,3], index: 22, kind: input, shape index: {}]   ;;  %s6114_s23 = inlined_call_operand.vmem [shape: f32[8,3], index: 23, kind: output, shape index: {}]  }
   0x1   :  { %6123 = sst [smem:[#allocation6_spill]] %s6091_s0  ;;  %75 = vst.msk [vmem:[#allocation2] sm:$0xff] %vm74_vm0, %v4784_v1  ;;  %76 = vst.msk [vmem:[#allocation3] sm:$0xff] %vm74_vm0, %v4784_v1  ;;  %4177 = vmatprep.subr.bf16.mxu0 %v4785_v2  ;;  %4195 = vmatprep.subr.bf16.mxu1 %v4785_v2  ;;  %vm134_vm2 = vcmask 523264   ;;  %vm142_vm3 = vcmask 785408   ;;  %vm77_vm4 = vcmask 130048  }
   0x2   :  { %6124 = sst [smem:[#allocation7_spill]] %s6092_s1  ;;  %s6131_s24 = sld [smem:[#allocation6_spill]]  ;;  %3751 = vmatprep.mubr.msk.f32.mxu0 %vm4787_vm1, %v4784_v1  ;;  %3778 = vmatprep.mubr.msk.f32.mxu1 %vm4787_vm1, %v4784_v1  ;;  %78 = vst.msk [vmem:[#allocation4] sm:$0xff] %vm77_vm4, %v4784_v1  ;;  %79 = vst.msk [vmem:[#allocation4 + $0x8] sm:$0xff] %vm77_vm4, %v4784_v1  ;;  %vm2057_vm5 = vcmask 392192   ;;  %vm2082_vm6 = vcmask 654336  }
   0x3   :  { %6125 = sst [smem:[#allocation8_spill]] %s6093_s2  ;;  %s6132_s1 = sld [smem:[#allocation7_spill]]  ;;  %80 = vst.msk [vmem:[#allocation4 + $0x10] sm:$0xff] %vm77_vm4, %v4784_v1  ;;  %81 = vst.msk [vmem:[#allocation4 + $0x18] sm:$0xff] %vm77_vm4, %v4784_v1  ;;  %vm2107_vm7 = vcmask 916480   ;;  %vm2364_vm8 = vcmask 195584  }
   0x4   :  { %6126 = sst [smem:[#allocation9_spill]] %s6094_s3  ;;  %82 = vst.msk [vmem:[#allocation4 + $0x20] sm:$0xff] %vm77_vm4, %v4784_v1  ;;  %83 = vst.msk [vmem:[#allocation4 + $0x28] sm:$0xff] %vm77_vm4, %v4784_v1  ;;  %s6121_s3 = smov 96   ;;  %vm2577_vm9 = vcmask 1043456   ;;  %vm2573_vm10 = vcmask 162816  }
   0x5   :  { %6127 = sst [smem:[#allocation10_spill]] %s6095_s6  ;;  %84 = vst.msk [vmem:[#allocation4 + $0x30] sm:$0xff] %vm77_vm4, %v4784_v1  ;;  %85 = vst.msk [vmem:[#allocation4 + $0x38] sm:$0xff] %vm77_vm4, %v4784_v1  ;;  %s4792_s2 = smov 80   ;;  %vm2658_vm11 = vcmask 64512   ;;  %vm3422_vm15 = vcmask 23552  }
   0x6   :  { %6128 = sst [smem:[#allocation11_spill]] %s6096_s8  ;;  %86 = vst.msk [vmem:[#allocation4 + $0x40] sm:$0xff] %vm77_vm4, %v4784_v1  ;;  %87 = vst.msk [vmem:[#allocation4 + $0x48] sm:$0xff] %vm77_vm4, %v4784_v1  ;;  %s4793_s27 = smov 112  }
   0x7   :  { %6129 = sst [smem:[#allocation12_spill]] %s6097_s4  ;;  %s4786_s4 = smov 32   ;;  %88 = vst.msk [vmem:[#allocation4 + $0x50] sm:$0xff] %vm77_vm4, %v4784_v1  ;;  %89 = vst.msk [vmem:[#allocation4 + $0x58] sm:$0xff] %vm77_vm4, %v4784_v1 }
   0x8   :  { %6130 = sst [smem:[#allocation13_spill]] %s6098_s5  ;;  %v3428_v0 = vld [vmem:[%s6131_s24 + $0x58] sm:$0xff]  ;;  %v124_v11 = vld [vmem:[#allocation2] sm:$0xff]  ;;  %s6133_s5 = sld [smem:[#allocation8_spill]]  ;;  %v223_v32 = vld [vmem:[#allocation3] sm:$0xff]  ;;  %90 = vst.msk [vmem:[#allocation4 + $0x60] sm:$0xff] %vm77_vm4, %v4784_v1 }
   0x9   :  { %v108_v3 = vld [vmem:[%s6132_s1] sm:$0xff]  ;;  %v109_v4 = vld [vmem:[%s6132_s1 + $0x8] sm:$0xff]  ;;  %126 = vrot.lane.b32.xlu0 %v3428_v0, %s4786_s4  ;;  %v110_v6 = vld [vmem:[%s6132_s1 + $0x10] sm:$0xff]  ;;  %91 = vst.msk [vmem:[#allocation4 + $0x68] sm:$0xff] %vm77_vm4, %v4784_v1  ;;  %s6135_s28 = smov 96   ;;  %s6137_s30 = sld [smem:[#allocation11_spill]] }
   0xa   :  { %v4931_v5 = vpack.c.bf16 %v109_v4, %v108_v3  ;;  %v111_v7 = vld [vmem:[%s6132_s1 + $0x18] sm:$0xff]  ;;  %v112_v9 = vld [vmem:[%s6132_s1 + $0x20] sm:$0xff]  ;;  %v113_v10 = vld [vmem:[%s6132_s1 + $0x28] sm:$0xff]  ;;  %92 = vst.msk [vmem:[#allocation4 + $0x70] sm:$0xff] %vm77_vm4, %v4784_v1 }
   0xb   :  { %v4944_v8 = vpack.c.bf16 %v111_v7, %v110_v6  ;;  %v4956_v12 = vpack.c.bf16 %v113_v10, %v112_v9  ;;  %v114_v13 = vld [vmem:[%s6132_s1 + $0x30] sm:$0xff]  ;;  %v115_v14 = vld [vmem:[%s6132_s1 + $0x38] sm:$0xff]  ;;  %v116_v16 = vld [vmem:[%s6132_s1 + $0x40] sm:$0xff]  ;;  %93 = vst.msk [vmem:[#allocation5] sm:$0xff] %vm77_vm4, %v4784_v1 }
   0xc   :  { %4179 = vmatpush3.bf16.msra.mxu0 %v4931_v5  ;;  %4197 = vmatpush3.bf16.msra.mxu1 %v4931_v5  ;;  %v4969_v15 = vpack.c.bf16 %v115_v14, %v114_v13  ;;  %v117_v17 = vld [vmem:[%s6132_s1 + $0x48] sm:$0xff]  ;;  %v118_v19 = vld [vmem:[%s6132_s1 + $0x50] sm:$0xff]  ;;  %v119_v20 = vld [vmem:[%s6132_s1 + $0x58] sm:$0xff]  ;;  %94 = vst.msk [vmem:[#allocation5 + $0x8] sm:$0xff] %vm77_vm4, %v4784_v1 }
   0xd   :  { %4180 = vmatprep.subr.bf16.mxu0 %v4785_v2  ;;  %4198 = vmatprep.subr.bf16.mxu1 %v4785_v2  ;;  %v4981_v18 = vpack.c.bf16 %v117_v17, %v116_v16  ;;  %v4993_v21 = vpack.c.bf16 %v119_v20, %v118_v19  ;;  %v121_v23 = vld [vmem:[%s6131_s24] sm:$0xff]  ;;  %v3433_v44 = vld [vmem:[%s6131_s24 + $0x50] sm:$0xff]  ;;  %95 = vst.msk [vmem:[#allocation5 + $0x10] sm:$0xff] %vm77_vm4, %v4784_v1  ;;  %96 = vst.msk [vmem:[#allocation5 + $0x18] sm:$0xff] %vm77_vm4, %v4784_v1 }
   0xe   :  { %130 = vrot.lane.b32.xlu0 %v124_v11, %s4788_s25  ;;  %v5025_v27 = vld [vmem:[%s6133_s5] ss:$0 sm:$0xff]  ;;  %97 = vst.msk [vmem:[#allocation5 + $0x20] sm:$0xff] %vm77_vm4, %v4784_v1  ;;  %98 = vst.msk [vmem:[#allocation5 + $0x28] sm:$0xff] %vm77_vm4, %v4784_v1  ;;  %v5109_v52 = vld [vmem:[%s6131_s24 + $0x8] sm:$0xff] }
   0xf   :  { %99 = vst.msk [vmem:[#allocation5 + $0x30] sm:$0xff] %vm77_vm4, %v4784_v1  ;;  %100 = vst.msk [vmem:[#allocation5 + $0x38] sm:$0xff] %vm77_vm4, %v4784_v1  ;;  %v5136_v11 = vld [vmem:[%s6131_s24 + $0x48] sm:$0xff] }
  0x10   :  { %4182 = vmatpush3.bf16.msra.mxu0 %v4944_v8  ;;  %4200 = vmatpush3.bf16.msra.mxu1 %v4944_v8  ;;  %101 = vst.msk [vmem:[#allocation5 + $0x40] sm:$0xff] %vm77_vm4, %v4784_v1  ;;  %102 = vst.msk [vmem:[#allocation5 + $0x48] sm:$0xff] %vm77_vm4, %v4784_v1 }
  0x11   :  { %4183 = vmatprep.subr.bf16.mxu0 %v4785_v2  ;;  %4201 = vmatprep.subr.bf16.mxu1 %v4785_v2  ;;  %103 = vst.msk [vmem:[#allocation5 + $0x50] sm:$0xff] %vm77_vm4, %v4784_v1  ;;  %104 = vst.msk [vmem:[#allocation5 + $0x58] sm:$0xff] %vm77_vm4, %v4784_v1 }
  0x12   :  { %105 = vst.msk [vmem:[#allocation5 + $0x60] sm:$0xff] %vm77_vm4, %v4784_v1  ;;  %106 = vst.msk [vmem:[#allocation5 + $0x68] sm:$0xff] %vm77_vm4, %v4784_v1 }
  0x13   :  { %107 = vst.msk [vmem:[#allocation5 + $0x70] sm:$0xff] %vm77_vm4, %v4784_v1 }
  0x14   :  { %4185 = vmatpush3.bf16.msra.mxu0 %v4956_v12  ;;  %4203 = vmatpush3.bf16.msra.mxu1 %v4956_v12 }
  0x15   :  { %4186 = vmatprep.subr.bf16.mxu0 %v4785_v2  ;;  %4204 = vmatprep.subr.bf16.mxu1 %v4785_v2 }
  0x18   :  { %4188 = vmatpush3.bf16.msra.mxu0 %v4969_v15  ;;  %4206 = vmatpush3.bf16.msra.mxu1 %v4969_v15 }
  0x19   :  { %4189 = vmatprep.subr.bf16.mxu0 %v4785_v2  ;;  %4207 = vmatprep.subr.bf16.mxu1 %v4785_v2 }
  0x1c   :  { %4191 = vmatpush3.bf16.msra.mxu0 %v4981_v18  ;;  %4209 = vmatpush3.bf16.msra.mxu1 %v4981_v18 }
  0x1d   :  { %4192 = vmatprep.subr.bf16.mxu0 %v4785_v2  ;;  %4210 = vmatprep.subr.bf16.mxu1 %v4785_v2 }
  0x20   :  { %4194 = vmatpush3.bf16.msra.mxu0 %v4993_v21  ;;  %4212 = vmatpush3.bf16.msra.mxu1 %v4993_v21 }
  0x21   :  { %4213 = vmatprep.subr.bf16.mxu0 %v4785_v2  ;;  %4231 = vmatprep.subr.bf16.mxu1 %v4785_v2 }
  0x7b   :  { %v127_v22 = vpop.permute.xlu0 %126 }
  0x7c   :  { %v133_v24 = vsel %vm74_vm0, %v121_v23, %v127_v22  ;;  %v5153_v23 = vld [vmem:[%s6131_s24 + $0x10] sm:$0xff] }
  0x80   :  { %v131_v25 = vpop.permute.xlu0 %130 }
  0x81   :  { %v135_v26 = vsel %vm134_vm2, %v133_v24, %v131_v25 }
  0x82   :  { %3752 = vmatmul.mubr.msk.f32.vlgmr.msra.gmra.mrb[0].mxu0 %vm142_vm3, %v135_v26 }
  0x83   :  { %4215 = vmatpush3.bf16.msra.mxu0 %v4931_v5  ;;  %3805 = vmatprep.mubr.msk.f32.mxu0 %vm4787_vm1, %v4784_v1 }
  0x84   :  { %4216 = vmatprep.subr.bf16.mxu0 %v4785_v2 }
  0x87   :  { %4218 = vmatpush3.bf16.msra.mxu0 %v4944_v8 }
  0x88   :  { %4219 = vmatprep.subr.bf16.mxu0 %v4785_v2 }
  0x8b   :  { %4221 = vmatpush3.bf16.msra.mxu0 %v4956_v12 }
  0x8c   :  { %4222 = vmatprep.subr.bf16.mxu0 %v4785_v2 }
  0x8f   :  { %4224 = vmatpush3.bf16.msra.mxu0 %v4969_v15 }
  0x90   :  { %4225 = vmatprep.subr.bf16.mxu0 %v4785_v2 }
  0x93   :  { %4227 = vmatpush3.bf16.msra.mxu0 %v4981_v18 }
  0x94   :  { %4228 = vmatprep.subr.bf16.mxu0 %v4785_v2 }
  0x97   :  { %4230 = vmatpush3.bf16.msra.mxu0 %v4993_v21 }
  0x98   :  { %4249 = vmatprep.subr.bf16.mxu0 %v4785_v2 }
 0x155   :  { %v212_v28 = vpop.f32.mrb[0].mxu0 }
 0x156   :  { %v213_v29 = vadd.f32 %v5025_v27, %v212_v28  ;;  %v3753_v30 = vpop.f32.mrb[1].mxu0 }
 0x158   :  { %4668 = vtanh.f32 %v213_v29  ;;  %v3431_v33 = vmul.f32 -1.442695, %v213_v29 }
 0x15a   :  { %4670 = vpow2.f32 %v3431_v33 }
 0x162   :  { %v4669_v31 = vpop.eup %4668 }
 0x163   :  { %230 = vrot.lane.b32.xlu1 %v4669_v31, %s4788_s25 }
 0x164   :  { %v4671_v34 = vpop.eup %4670 }
 0x165   :  { %v219_v35 = vadd.f32 1.0, %v4671_v34 }
 0x167   :  { %225 = vrot.lane.b32.xlu1 %v223_v32, %s4786_s4  ;;  %4672 = vrcp.f32 %v219_v35 }
 0x171   :  { %v4673_v36 = vpop.eup %4672 }
 0x1d5   :  { %v231_v37 = vpop.permute.xlu1 %230 }
 0x1d6   :  { %v233_v38 = vmul.f32 %v4673_v36, %v231_v37 }
 0x1d8   :  { %235 = vrot.lane.b32.xlu0 %v233_v38, %s4786_s4 }
 0x1d9   :  { %v226_v39 = vpop.permute.xlu1 %225 }
 0x1da   :  { %v228_v40 = vmul.f32 %v4673_v36, %v226_v39 }
 0x24a   :  { %v236_v41 = vpop.permute.xlu0 %235 }
 0x24b   :  { %v238_v42 = vadd.f32 %v236_v41, %v228_v40 }
 0x24d   :  { %4674 = vtanh.f32 %v238_v42 }
 0x257   :  { %v4675_v43 = vpop.eup %4674 }
 0x258   :  { %241 = vrot.lane.b32.xlu1 %v4675_v43, %s4788_s25  ;;  %v5180_v43 = vld [vmem:[%s6131_s24 + $0x40] sm:$0xff] }
 0x25c   :  { %267 = vrot.lane.b32.xlu1 %v3433_v44, %s4786_s4 }
 0x260   :  { %246 = vrot.lane.b32.xlu1 %v238_v42, %s6121_s3 }
 0x2ca   :  { %v242_v45 = vpop.permute.xlu1 %241 }
 0x2cb   :  { %v5097_v46 = vmul.f32 %v4673_v36, %v242_v45 }
 0x2cd   :  { %251 = vrot.lane.b32.xlu0 %v5097_v46, %s4786_s4 }
 0x2ce   :  { %v268_v47 = vpop.permute.xlu1 %267 }
 0x2cf   :  { %v274_v53 = vsel %vm74_vm0, %v5109_v52, %v268_v47 }
 0x2d2   :  { %v247_v48 = vpop.permute.xlu1 %246 }
 0x2d3   :  { %249 = vst.msk [vmem:[#allocation3] sm:$0xff] %vm74_vm0, %v247_v48 }
 0x2da   :  { %v356_v49 = vld [vmem:[#allocation3] sm:$0xff] }
 0x2db   :  { %358 = vrot.lane.b32.xlu1 %v356_v49, %s4786_s4 }
 0x33f   :  { %v252_v50 = vpop.permute.xlu0 %251 }
 0x340   :  { %254 = vst.msk [vmem:[#allocation2] sm:$0xff] %vm74_vm0, %v252_v50 }
 0x341   :  { %255 = vst.msk [vmem:[#allocation4] sm:$0xff] %vm77_vm4, %v252_v50 }
 0x347   :  { %v265_v51 = vld [vmem:[#allocation2] sm:$0xff] }
 0x348   :  { %271 = vrot.lane.b32.xlu0 %v265_v51, %s4788_s25 }
 0x34d   :  { %v359_v4 = vpop.permute.xlu1 %358 }
 0x3ba   :  { %v272_v54 = vpop.permute.xlu0 %271 }
 0x3bb   :  { %v275_v55 = vsel %vm134_vm2, %v274_v53, %v272_v54  ;;  %v5197_v53 = vld [vmem:[%s6131_s24 + $0x18] sm:$0xff] }
 0x3bc   :  { %3779 = vmatmul.mubr.msk.f32.vlgmr.msra.gmra.mrb[0].mxu1 %vm142_vm3, %v275_v55 }
 0x3bd   :  { %4233 = vmatpush3.bf16.msra.mxu1 %v4931_v5  ;;  %3832 = vmatprep.mubr.msk.f32.mxu1 %vm4787_vm1, %v4784_v1 }
 0x3be   :  { %4234 = vmatprep.subr.bf16.mxu1 %v4785_v2 }
 0x3c1   :  { %4236 = vmatpush3.bf16.msra.mxu1 %v4944_v8 }
 0x3c2   :  { %4237 = vmatprep.subr.bf16.mxu1 %v4785_v2 }
 0x3c5   :  { %4239 = vmatpush3.bf16.msra.mxu1 %v4956_v12 }
 0x3c6   :  { %4240 = vmatprep.subr.bf16.mxu1 %v4785_v2 }
 0x3c9   :  { %4242 = vmatpush3.bf16.msra.mxu1 %v4969_v15 }
 0x3ca   :  { %4243 = vmatprep.subr.bf16.mxu1 %v4785_v2 }
 0x3cd   :  { %4245 = vmatpush3.bf16.msra.mxu1 %v4981_v18 }
 0x3ce   :  { %4246 = vmatprep.subr.bf16.mxu1 %v4785_v2 }
 0x3d1   :  { %4248 = vmatpush3.bf16.msra.mxu1 %v4993_v21 }
 0x3d2   :  { %4267 = vmatprep.subr.bf16.mxu1 %v4785_v2 }
 0x48f   :  { %v345_v56 = vpop.f32.mrb[0].mxu1 }
 0x490   :  { %v346_v57 = vadd.f32 %v5025_v27, %v345_v56  ;;  %v3780_v58 = vpop.f32.mrb[1].mxu1 }
 0x492   :  { %4676 = vtanh.f32 %v346_v57  ;;  %v3435_v60 = vmul.f32 -1.442695, %v346_v57 }
 0x494   :  { %4678 = vpow2.f32 %v3435_v60 }
 0x49c   :  { %v4677_v59 = vpop.eup %4676 }
 0x49d   :  { %363 = vrot.lane.b32.xlu0 %v4677_v59, %s4788_s25 }
 0x49e   :  { %v4679_v61 = vpop.eup %4678 }
 0x49f   :  { %v352_v62 = vadd.f32 1.0, %v4679_v61 }
 0x4a1   :  { %4680 = vrcp.f32 %v352_v62 }
 0x4ab   :  { %v4681_v63 = vpop.eup %4680 }
 0x4ac   :  { %v361_v6 = vmul.f32 %v4681_v63, %v359_v4 }
 0x50f   :  { %v364_v0 = vpop.permute.xlu0 %363 }
 0x510   :  { %v366_v3 = vmul.f32 %v4681_v63, %v364_v0 }
 0x512   :  { %368 = vrot.lane.b32.xlu0 %v366_v3, %s4786_s4 }
 0x584   :  { %v369_v7 = vpop.permute.xlu0 %368 }
 0x585   :  { %v371_v9 = vadd.f32 %v369_v7, %v361_v6 }
 0x587   :  { %4682 = vtanh.f32 %v371_v9 }
 0x591   :  { %v4683_v10 = vpop.eup %4682 }
 0x592   :  { %374 = vrot.lane.b32.xlu1 %v4683_v10, %s4788_s25 }
 0x596   :  { %401 = vrot.lane.b32.xlu1 %v5136_v11, %s4786_s4 }
 0x59a   :  { %379 = vrot.lane.b32.xlu1 %v371_v9, %s6121_s3 }
 0x604   :  { %v375_v13 = vpop.permute.xlu1 %374 }
 0x605   :  { %v5141_v14 = vmul.f32 %v4681_v63, %v375_v13 }
 0x607   :  { %384 = vrot.lane.b32.xlu0 %v5141_v14, %s4786_s4 }
 0x608   :  { %v402_v16 = vpop.permute.xlu1 %401 }
 0x609   :  { %v408_v24 = vsel %vm74_vm0, %v5153_v23, %v402_v16  ;;  %v5224_v16 = vld [vmem:[%s6131_s24 + $0x38] sm:$0xff] }
 0x60c   :  { %v380_v17 = vpop.permute.xlu1 %379 }
 0x60d   :  { %382 = vst.msk [vmem:[#allocation3] sm:$0xff] %vm74_vm0, %v380_v17 }
 0x614   :  { %v490_v19 = vld [vmem:[#allocation3] sm:$0xff] }
 0x615   :  { %492 = vrot.lane.b32.xlu1 %v490_v19, %s4786_s4 }
 0x679   :  { %v385_v20 = vpop.permute.xlu0 %384 }
 0x67a   :  { %387 = vst.msk [vmem:[#allocation2] sm:$0xff] %vm74_vm0, %v385_v20 }
 0x67b   :  { %389 = vst.msk [vmem:[#allocation4 + $0x8] sm:$0xff] %vm77_vm4, %v385_v20 }
 0x681   :  { %v399_v22 = vld [vmem:[#allocation2] sm:$0xff] }
 0x682   :  { %405 = vrot.lane.b32.xlu0 %v399_v22, %s4788_s25 }
 0x687   :  { %v493_v38 = vpop.permute.xlu1 %492 }
 0x6f4   :  { %v406_v25 = vpop.permute.xlu0 %405 }
 0x6f5   :  { %v409_v26 = vsel %vm134_vm2, %v408_v24, %v406_v25 }
 0x6f6   :  { %3806 = vmatmul.mubr.msk.f32.vlgmr.msra.gmra.mrb[2].mxu0 %vm142_vm3, %v409_v26 }
 0x6f7   :  { %4251 = vmatpush3.bf16.msra.mxu0 %v4931_v5  ;;  %3859 = vmatprep.mubr.msk.f32.mxu0 %vm4787_vm1, %v4784_v1 }
 0x6f8   :  { %4252 = vmatprep.subr.bf16.mxu0 %v4785_v2 }
 0x6fb   :  { %4254 = vmatpush3.bf16.msra.mxu0 %v4944_v8 }
 0x6fc   :  { %4255 = vmatprep.subr.bf16.mxu0 %v4785_v2 }
 0x6ff   :  { %4257 = vmatpush3.bf16.msra.mxu0 %v4956_v12 }
 0x700   :  { %4258 = vmatprep.subr.bf16.mxu0 %v4785_v2 }
 0x703   :  { %4260 = vmatpush3.bf16.msra.mxu0 %v4969_v15 }
 0x704   :  { %4261 = vmatprep.subr.bf16.mxu0 %v4785_v2 }
 0x707   :  { %4263 = vmatpush3.bf16.msra.mxu0 %v4981_v18 }
 0x708   :  { %4264 = vmatprep.subr.bf16.mxu0 %v4785_v2 }
 0x70b   :  { %4266 = vmatpush3.bf16.msra.mxu0 %v4993_v21 }
 0x70c   :  { %4285 = vmatprep.subr.bf16.mxu0 %v4785_v2 }
 0x7c9   :  { %v479_v28 = vpop.f32.mrb[2].mxu0 }
 0x7ca   :  { %v480_v29 = vadd.f32 %v5025_v27, %v479_v28  ;;  %v3807_v30 = vpop.f32.mrb[3].mxu0  ;;  %v5241_v28 = vld [vmem:[%s6131_s24 + $0x20] sm:$0xff] }
 0x7cc   :  { %4684 = vtanh.f32 %v480_v29  ;;  %v3439_v32 = vmul.f32 -1.442695, %v480_v29 }
 0x7ce   :  { %4686 = vpow2.f32 %v3439_v32 }
 0x7d6   :  { %v4685_v31 = vpop.eup %4684 }
 0x7d7   :  { %497 = vrot.lane.b32.xlu0 %v4685_v31, %s4788_s25 }
 0x7d8   :  { %v4687_v33 = vpop.eup %4686 }
 0x7d9   :  { %v486_v34 = vadd.f32 1.0, %v4687_v33 }
 0x7db   :  { %4688 = vrcp.f32 %v486_v34 }
 0x7e5   :  { %v4689_v35 = vpop.eup %4688 }
 0x7e6   :  { %v495_v39 = vmul.f32 %v4689_v35, %v493_v38 }
 0x849   :  { %v498_v36 = vpop.permute.xlu0 %497 }
 0x84a   :  { %v500_v37 = vmul.f32 %v4689_v35, %v498_v36 }
 0x84c   :  { %502 = vrot.lane.b32.xlu0 %v500_v37, %s4786_s4 }
 0x8be   :  { %v503_v40 = vpop.permute.xlu0 %502 }
 0x8bf   :  { %v505_v41 = vadd.f32 %v503_v40, %v495_v39 }
 0x8c1   :  { %4690 = vtanh.f32 %v505_v41 }
 0x8cb   :  { %v4691_v42 = vpop.eup %4690 }
 0x8cc   :  { %508 = vrot.lane.b32.xlu1 %v4691_v42, %s4788_s25 }
 0x8d0   :  { %535 = vrot.lane.b32.xlu1 %v5180_v43, %s4786_s4 }
 0x8d4   :  { %513 = vrot.lane.b32.xlu1 %v505_v41, %s6121_s3 }
 0x93e   :  { %v509_v44 = vpop.permute.xlu1 %508 }
 0x93f   :  { %v5185_v45 = vmul.f32 %v4689_v35, %v509_v44 }
 0x941   :  { %518 = vrot.lane.b32.xlu0 %v5185_v45, %s4786_s4 }
 0x942   :  { %v536_v47 = vpop.permute.xlu1 %535 }
 0x943   :  { %v542_v54 = vsel %vm74_vm0, %v5197_v53, %v536_v47 }
 0x946   :  { %v514_v48 = vpop.permute.xlu1 %513 }
 0x947   :  { %516 = vst.msk [vmem:[#allocation3] sm:$0xff] %vm74_vm0, %v514_v48 }
 0x94e   :  { %v624_v49 = vld [vmem:[#allocation3] sm:$0xff] }
 0x94f   :  { %626 = vrot.lane.b32.xlu1 %v624_v49, %s4786_s4 }
 0x9b3   :  { %v519_v50 = vpop.permute.xlu0 %518 }
 0x9b4   :  { %521 = vst.msk [vmem:[#allocation2] sm:$0xff] %vm74_vm0, %v519_v50 }
 0x9b5   :  { %523 = vst.msk [vmem:[#allocation4 + $0x10] sm:$0xff] %vm77_vm4, %v519_v50  ;;  %v5268_v50 = vld [vmem:[%s6131_s24 + $0x30] sm:$0xff] }
 0x9bb   :  { %v533_v51 = vld [vmem:[#allocation2] sm:$0xff] }
 0x9bc   :  { %539 = vrot.lane.b32.xlu0 %v533_v51, %s4788_s25 }
 0x9c1   :  { %v627_v6 = vpop.permute.xlu1 %626 }
 0xa2e   :  { %v540_v55 = vpop.permute.xlu0 %539 }
 0xa2f   :  { %v543_v56 = vsel %vm134_vm2, %v542_v54, %v540_v55 }
 0xa30   :  { %3833 = vmatmul.mubr.msk.f32.vlgmr.msra.gmra.mrb[2].mxu1 %vm142_vm3, %v543_v56 }
 0xa31   :  { %4269 = vmatpush3.bf16.msra.mxu1 %v4931_v5  ;;  %3886 = vmatprep.mubr.msk.f32.mxu1 %vm4787_vm1, %v4784_v1 }
 0xa32   :  { %4270 = vmatprep.subr.bf16.mxu1 %v4785_v2 }
 0xa35   :  { %4272 = vmatpush3.bf16.msra.mxu1 %v4944_v8 }
 0xa36   :  { %4273 = vmatprep.subr.bf16.mxu1 %v4785_v2 }
 0xa39   :  { %4275 = vmatpush3.bf16.msra.mxu1 %v4956_v12 }
 0xa3a   :  { %4276 = vmatprep.subr.bf16.mxu1 %v4785_v2 }
 0xa3d   :  { %4278 = vmatpush3.bf16.msra.mxu1 %v4969_v15 }
 0xa3e   :  { %4279 = vmatprep.subr.bf16.mxu1 %v4785_v2 }
 0xa41   :  { %4281 = vmatpush3.bf16.msra.mxu1 %v4981_v18 }
 0xa42   :  { %4282 = vmatprep.subr.bf16.mxu1 %v4785_v2 }
 0xa45   :  { %4284 = vmatpush3.bf16.msra.mxu1 %v4993_v21 }
 0xa46   :  { %4303 = vmatprep.subr.bf16.mxu1 %v4785_v2 }
 0xb03   :  { %v613_v57 = vpop.f32.mrb[2].mxu1 }
 0xb04   :  { %v614_v58 = vadd.f32 %v5025_v27, %v613_v57  ;;  %v3834_v59 = vpop.f32.mrb[3].mxu1 }
 0xb06   :  { %4692 = vtanh.f32 %v614_v58  ;;  %v3443_v61 = vmul.f32 -1.442695, %v614_v58 }
 0xb08   :  { %4694 = vpow2.f32 %v3443_v61 }
 0xb10   :  { %v4693_v60 = vpop.eup %4692 }
 0xb11   :  { %631 = vrot.lane.b32.xlu0 %v4693_v60, %s4788_s25  ;;  %v3448_v60 = vld [vmem:[%s6131_s24 + $0x28] sm:$0xff] }
 0xb12   :  { %v4695_v62 = vpop.eup %4694 }
 0xb13   :  { %v620_v63 = vadd.f32 1.0, %v4695_v62 }
 0xb15   :  { %4696 = vrcp.f32 %v620_v63 }
 0xb1f   :  { %v4697_v0 = vpop.eup %4696 }
 0xb20   :  { %v629_v7 = vmul.f32 %v4697_v0, %v627_v6 }
 0xb83   :  { %v632_v3 = vpop.permute.xlu0 %631 }
 0xb84   :  { %v634_v4 = vmul.f32 %v4697_v0, %v632_v3 }
 0xb86   :  { %636 = vrot.lane.b32.xlu0 %v634_v4, %s4786_s4 }
 0xbf8   :  { %v637_v9 = vpop.permute.xlu0 %636 }
 0xbf9   :  { %v639_v10 = vadd.f32 %v637_v9, %v629_v7 }
 0xbfb   :  { %4698 = vtanh.f32 %v639_v10 }
 0xc05   :  { %v4699_v13 = vpop.eup %4698 }
 0xc06   :  { %642 = vrot.lane.b32.xlu1 %v4699_v13, %s4788_s25 }
 0xc0a   :  { %669 = vrot.lane.b32.xlu1 %v5224_v16, %s4786_s4 }
 0xc0e   :  { %647 = vrot.lane.b32.xlu1 %v639_v10, %s6121_s3 }
 0xc78   :  { %v643_v17 = vpop.permute.xlu1 %642 }
 0xc79   :  { %v5229_v19 = vmul.f32 %v4697_v0, %v643_v17 }
 0xc7b   :  { %652 = vrot.lane.b32.xlu0 %v5229_v19, %s4786_s4 }
 0xc7c   :  { %v670_v20 = vpop.permute.xlu1 %669 }
 0xc7d   :  { %v676_v29 = vsel %vm74_vm0, %v5241_v28, %v670_v20 }
 0xc80   :  { %v648_v22 = vpop.permute.xlu1 %647 }
 0xc81   :  { %650 = vst.msk [vmem:[#allocation3] sm:$0xff] %vm74_vm0, %v648_v22 }
 0xc88   :  { %v758_v24 = vld [vmem:[#allocation3] sm:$0xff] }
 0xc89   :  { %760 = vrot.lane.b32.xlu1 %v758_v24, %s4786_s4 }
 0xced   :  { %v653_v25 = vpop.permute.xlu0 %652 }
 0xcee   :  { %655 = vst.msk [vmem:[#allocation2] sm:$0xff] %vm74_vm0, %v653_v25 }
 0xcef   :  { %657 = vst.msk [vmem:[#allocation4 + $0x18] sm:$0xff] %vm77_vm4, %v653_v25 }
 0xcf5   :  { %v667_v26 = vld [vmem:[#allocation2] sm:$0xff] }
 0xcf6   :  { %673 = vrot.lane.b32.xlu0 %v667_v26, %s4788_s25 }
 0xcfb   :  { %v761_v42 = vpop.permute.xlu1 %760 }
 0xd68   :  { %v674_v30 = vpop.permute.xlu0 %673 }
 0xd69   :  { %v677_v31 = vsel %vm134_vm2, %v676_v29, %v674_v30 }
 0xd6a   :  { %3860 = vmatmul.mubr.msk.f32.vlgmr.msra.gmra.mrb[4].mxu0 %vm142_vm3, %v677_v31 }
 0xd6b   :  { %4287 = vmatpush3.bf16.msra.mxu0 %v4931_v5  ;;  %3913 = vmatprep.mubr.msk.f32.mxu0 %vm4787_vm1, %v4784_v1 }
 0xd6c   :  { %4288 = vmatprep.subr.bf16.mxu0 %v4785_v2 }
 0xd6f   :  { %4290 = vmatpush3.bf16.msra.mxu0 %v4944_v8 }
 0xd70   :  { %4291 = vmatprep.subr.bf16.mxu0 %v4785_v2 }
 0xd73   :  { %4293 = vmatpush3.bf16.msra.mxu0 %v4956_v12 }
 0xd74   :  { %4294 = vmatprep.subr.bf16.mxu0 %v4785_v2 }
 0xd77   :  { %4296 = vmatpush3.bf16.msra.mxu0 %v4969_v15 }
 0xd78   :  { %4297 = vmatprep.subr.bf16.mxu0 %v4785_v2 }
 0xd7b   :  { %4299 = vmatpush3.bf16.msra.mxu0 %v4981_v18 }
 0xd7c   :  { %4300 = vmatprep.subr.bf16.mxu0 %v4785_v2 }
 0xd7f   :  { %4302 = vmatpush3.bf16.msra.mxu0 %v4993_v21 }
 0xd80   :  { %4321 = vmatprep.subr.bf16.mxu0 %v4785_v2 }
 0xe3d   :  { %v747_v32 = vpop.f32.mrb[4].mxu0 }
 0xe3e   :  { %v748_v33 = vadd.f32 %v5025_v27, %v747_v32  ;;  %v3861_v34 = vpop.f32.mrb[5].mxu0 }
 0xe40   :  { %4700 = vtanh.f32 %v748_v33  ;;  %v3447_v36 = vmul.f32 -1.442695, %v748_v33 }
 0xe42   :  { %4702 = vpow2.f32 %v3447_v36 }
 0xe4a   :  { %v4701_v35 = vpop.eup %4700 }
 0xe4b   :  { %765 = vrot.lane.b32.xlu0 %v4701_v35, %s4788_s25 }
 0xe4c   :  { %v4703_v37 = vpop.eup %4702 }
 0xe4d   :  { %v754_v38 = vadd.f32 1.0, %v4703_v37 }
 0xe4f   :  { %4704 = vrcp.f32 %v754_v38 }
 0xe59   :  { %v4705_v39 = vpop.eup %4704 }
 0xe5a   :  { %v763_v44 = vmul.f32 %v4705_v39, %v761_v42 }
 0xebd   :  { %v766_v40 = vpop.permute.xlu0 %765 }
 0xebe   :  { %v768_v41 = vmul.f32 %v4705_v39, %v766_v40 }
 0xec0   :  { %770 = vrot.lane.b32.xlu0 %v768_v41, %s4786_s4 }
 0xf32   :  { %v771_v47 = vpop.permute.xlu0 %770 }
 0xf33   :  { %v773_v48 = vadd.f32 %v771_v47, %v763_v44 }
 0xf35   :  { %4706 = vtanh.f32 %v773_v48 }
 0xf3f   :  { %v4707_v49 = vpop.eup %4706 }
 0xf40   :  { %776 = vrot.lane.b32.xlu1 %v4707_v49, %s4788_s25 }
 0xf44   :  { %803 = vrot.lane.b32.xlu1 %v5268_v50, %s4786_s4 }
 0xf48   :  { %781 = vrot.lane.b32.xlu1 %v773_v48, %s6121_s3 }
 0xfb2   :  { %v777_v51 = vpop.permute.xlu1 %776 }
 0xfb3   :  { %v5273_v54 = vmul.f32 %v4705_v39, %v777_v51 }
 0xfb5   :  { %786 = vrot.lane.b32.xlu0 %v5273_v54, %s4786_s4 }
 0xfb6   :  { %v804_v55 = vpop.permute.xlu1 %803 }
 0xfb7   :  { %v810_v61 = vsel %vm74_vm0, %v3448_v60, %v804_v55 }
 0xfba   :  { %v782_v56 = vpop.permute.xlu1 %781 }
 0xfbb   :  { %784 = vst.msk [vmem:[#allocation3] sm:$0xff] %vm74_vm0, %v782_v56 }
 0xfc2   :  { %v892_v57 = vld [vmem:[#allocation3] sm:$0xff] }
 0xfc3   :  { %894 = vrot.lane.b32.xlu1 %v892_v57, %s4786_s4 }
0x1027   :  { %v787_v58 = vpop.permute.xlu0 %786 }
0x1028   :  { %789 = vst.msk [vmem:[#allocation2] sm:$0xff] %vm74_vm0, %v787_v58 }
0x1029   :  { %791 = vst.msk [vmem:[#allocation4 + $0x20] sm:$0xff] %vm77_vm4, %v787_v58 }
0x102f   :  { %v801_v59 = vld [vmem:[#allocation2] sm:$0xff] }
0x1030   :  { %807 = vrot.lane.b32.xlu0 %v801_v59, %s4788_s25 }
0x1035   :  { %v895_v22 = vpop.permute.xlu1 %894 }
0x10a2   :  { %v808_v62 = vpop.permute.xlu0 %807 }
0x10a3   :  { %v811_v63 = vsel %vm134_vm2, %v810_v61, %v808_v62 }
0x10a4   :  { %3887 = vmatmul.mubr.msk.f32.vlgmr.msra.gmra.mrb[4].mxu1 %vm142_vm3, %v811_v63 }
0x10a5   :  { %4305 = vmatpush3.bf16.msra.mxu1 %v4931_v5  ;;  %3940 = vmatprep.mubr.msk.f32.mxu1 %vm4787_vm1, %v4784_v1 }
0x10a6   :  { %4306 = vmatprep.subr.bf16.mxu1 %v4785_v2 }
0x10a9   :  { %4308 = vmatpush3.bf16.msra.mxu1 %v4944_v8 }
0x10aa   :  { %4309 = vmatprep.subr.bf16.mxu1 %v4785_v2 }
0x10ad   :  { %4311 = vmatpush3.bf16.msra.mxu1 %v4956_v12 }
0x10ae   :  { %4312 = vmatprep.subr.bf16.mxu1 %v4785_v2 }
0x10b1   :  { %4314 = vmatpush3.bf16.msra.mxu1 %v4969_v15 }
0x10b2   :  { %4315 = vmatprep.subr.bf16.mxu1 %v4785_v2 }
0x10b5   :  { %4317 = vmatpush3.bf16.msra.mxu1 %v4981_v18 }
0x10b6   :  { %4318 = vmatprep.subr.bf16.mxu1 %v4785_v2 }
0x10b9   :  { %4320 = vmatpush3.bf16.msra.mxu1 %v4993_v21 }
0x10ba   :  { %4339 = vmatprep.subr.bf16.mxu1 %v4785_v2 }
0x1177   :  { %v881_v0 = vpop.f32.mrb[4].mxu1 }
0x1178   :  { %v882_v3 = vadd.f32 %v5025_v27, %v881_v0  ;;  %v3888_v4 = vpop.f32.mrb[5].mxu1 }
0x117a   :  { %4708 = vtanh.f32 %v882_v3  ;;  %v3451_v7 = vmul.f32 -1.442695, %v882_v3 }
0x117c   :  { %4710 = vpow2.f32 %v3451_v7 }
0x1184   :  { %v4709_v6 = vpop.eup %4708 }
0x1185   :  { %899 = vrot.lane.b32.xlu0 %v4709_v6, %s4788_s25 }
0x1186   :  { %v4711_v9 = vpop.eup %4710 }
0x1187   :  { %v888_v10 = vadd.f32 1.0, %v4711_v9 }
0x1189   :  { %4712 = vrcp.f32 %v888_v10 }
0x1193   :  { %v4713_v13 = vpop.eup %4712 }
0x1194   :  { %v897_v24 = vmul.f32 %v4713_v13, %v895_v22 }
0x11f7   :  { %v900_v17 = vpop.permute.xlu0 %899 }
0x11f8   :  { %v902_v20 = vmul.f32 %v4713_v13, %v900_v17 }
0x11fa   :  { %904 = vrot.lane.b32.xlu0 %v902_v20, %s4786_s4 }
0x126c   :  { %v905_v25 = vpop.permute.xlu0 %904 }
0x126d   :  { %v907_v26 = vadd.f32 %v905_v25, %v897_v24 }
0x126f   :  { %4714 = vtanh.f32 %v907_v26 }
0x1279   :  { %v4715_v29 = vpop.eup %4714 }
0x127a   :  { %910 = vrot.lane.b32.xlu1 %v4715_v29, %s4788_s25 }
0x127e   :  { %935 = vrot.lane.b32.xlu1 %v3448_v60, %s4786_s4 }
0x1282   :  { %915 = vrot.lane.b32.xlu1 %v907_v26, %s6121_s3 }
0x12ec   :  { %v911_v30 = vpop.permute.xlu1 %910 }
0x12ed   :  { %v5308_v31 = vmul.f32 %v4713_v13, %v911_v30 }
0x12ef   :  { %920 = vrot.lane.b32.xlu0 %v5308_v31, %s4786_s4 }
0x12f0   :  { %v936_v32 = vpop.permute.xlu1 %935 }
0x12f1   :  { %v942_v37 = vsel %vm74_vm0, %v5268_v50, %v936_v32 }
0x12f4   :  { %v916_v33 = vpop.permute.xlu1 %915 }
0x12f5   :  { %918 = vst.msk [vmem:[#allocation3] sm:$0xff] %vm74_vm0, %v916_v33 }
0x12fc   :  { %v1024_v34 = vld [vmem:[#allocation3] sm:$0xff] }
0x12fd   :  { %1026 = vrot.lane.b32.xlu1 %v1024_v34, %s4786_s4 }
0x1361   :  { %v921_v35 = vpop.permute.xlu0 %920 }
0x1362   :  { %923 = vst.msk [vmem:[#allocation2] sm:$0xff] %vm74_vm0, %v921_v35 }
0x1363   :  { %925 = vst.msk [vmem:[#allocation4 + $0x28] sm:$0xff] %vm77_vm4, %v921_v35 }
0x1369   :  { %v933_v36 = vld [vmem:[#allocation2] sm:$0xff] }
0x136a   :  { %939 = vrot.lane.b32.xlu0 %v933_v36, %s4788_s25 }
0x136f   :  { %v1027_v56 = vpop.permute.xlu1 %1026 }
0x13dc   :  { %v940_v38 = vpop.permute.xlu0 %939 }
0x13dd   :  { %v943_v39 = vsel %vm134_vm2, %v942_v37, %v940_v38 }
0x13de   :  { %3914 = vmatmul.mubr.msk.f32.vlgmr.msra.gmra.mrb[6].mxu0 %vm142_vm3, %v943_v39 }
0x13df   :  { %4323 = vmatpush3.bf16.msra.mxu0 %v4931_v5  ;;  %3967 = vmatprep.mubr.msk.f32.mxu0 %vm4787_vm1, %v4784_v1 }
0x13e0   :  { %4324 = vmatprep.subr.bf16.mxu0 %v4785_v2 }
0x13e3   :  { %4326 = vmatpush3.bf16.msra.mxu0 %v4944_v8 }
0x13e4   :  { %4327 = vmatprep.subr.bf16.mxu0 %v4785_v2 }
0x13e7   :  { %4329 = vmatpush3.bf16.msra.mxu0 %v4956_v12 }
0x13e8   :  { %4330 = vmatprep.subr.bf16.mxu0 %v4785_v2 }
0x13eb   :  { %4332 = vmatpush3.bf16.msra.mxu0 %v4969_v15 }
0x13ec   :  { %4333 = vmatprep.subr.bf16.mxu0 %v4785_v2 }
0x13ef   :  { %4335 = vmatpush3.bf16.msra.mxu0 %v4981_v18 }
0x13f0   :  { %4336 = vmatprep.subr.bf16.mxu0 %v4785_v2 }
0x13f3   :  { %4338 = vmatpush3.bf16.msra.mxu0 %v4993_v21 }
0x13f4   :  { %4357 = vmatprep.subr.bf16.mxu0 %v4785_v2 }
0x14b1   :  { %v1013_v40 = vpop.f32.mrb[6].mxu0 }
0x14b2   :  { %v1014_v41 = vadd.f32 %v5025_v27, %v1013_v40  ;;  %v3915_v42 = vpop.f32.mrb[7].mxu0 }
0x14b4   :  { %4716 = vtanh.f32 %v1014_v41  ;;  %v3455_v47 = vmul.f32 -1.442695, %v1014_v41 }
0x14b6   :  { %4718 = vpow2.f32 %v3455_v47 }
0x14be   :  { %v4717_v44 = vpop.eup %4716 }
0x14bf   :  { %1031 = vrot.lane.b32.xlu0 %v4717_v44, %s4788_s25 }
0x14c0   :  { %v4719_v48 = vpop.eup %4718 }
0x14c1   :  { %v1020_v49 = vadd.f32 1.0, %v4719_v48 }
0x14c3   :  { %4720 = vrcp.f32 %v1020_v49 }
0x14cd   :  { %v4721_v50 = vpop.eup %4720 }
0x14ce   :  { %v1029_v57 = vmul.f32 %v4721_v50, %v1027_v56 }
0x1531   :  { %v1032_v51 = vpop.permute.xlu0 %1031 }
0x1532   :  { %v1034_v55 = vmul.f32 %v4721_v50, %v1032_v51 }
0x1534   :  { %1036 = vrot.lane.b32.xlu0 %v1034_v55, %s4786_s4 }
0x15a6   :  { %v1037_v58 = vpop.permute.xlu0 %1036 }
0x15a7   :  { %v1039_v59 = vadd.f32 %v1037_v58, %v1029_v57 }
0x15a9   :  { %4722 = vtanh.f32 %v1039_v59 }
0x15b3   :  { %v4723_v60 = vpop.eup %4722 }
0x15b4   :  { %1042 = vrot.lane.b32.xlu1 %v4723_v60, %s4788_s25 }
0x15b8   :  { %1067 = vrot.lane.b32.xlu1 %v5241_v28, %s4786_s4 }
0x15bc   :  { %1047 = vrot.lane.b32.xlu1 %v1039_v59, %s6121_s3 }
0x1626   :  { %v1043_v61 = vpop.permute.xlu1 %1042 }
0x1627   :  { %v5342_v62 = vmul.f32 %v4721_v50, %v1043_v61 }
0x1629   :  { %1052 = vrot.lane.b32.xlu0 %v5342_v62, %s4786_s4 }
0x162a   :  { %v1068_v63 = vpop.permute.xlu1 %1067 }
0x162b   :  { %v1074_v6 = vsel %vm74_vm0, %v5224_v16, %v1068_v63 }
0x162e   :  { %v1048_v0 = vpop.permute.xlu1 %1047 }
0x162f   :  { %1050 = vst.msk [vmem:[#allocation3] sm:$0xff] %vm74_vm0, %v1048_v0 }
0x1636   :  { %v1156_v3 = vld [vmem:[#allocation3] sm:$0xff] }
0x1637   :  { %1158 = vrot.lane.b32.xlu1 %v1156_v3, %s4786_s4 }
0x169b   :  { %v1053_v4 = vpop.permute.xlu0 %1052 }
0x169c   :  { %1055 = vst.msk [vmem:[#allocation2] sm:$0xff] %vm74_vm0, %v1053_v4 }
0x169d   :  { %1057 = vst.msk [vmem:[#allocation4 + $0x30] sm:$0xff] %vm77_vm4, %v1053_v4 }
0x16a3   :  { %v1065_v28 = vld [vmem:[#allocation2] sm:$0xff] }
0x16a4   :  { %1071 = vrot.lane.b32.xlu0 %v1065_v28, %s4788_s25 }
0x16a9   :  { %v1159_v30 = vpop.permute.xlu1 %1158 }
0x1716   :  { %v1072_v7 = vpop.permute.xlu0 %1071 }
0x1717   :  { %v1075_v9 = vsel %vm134_vm2, %v1074_v6, %v1072_v7 }
0x1718   :  { %3941 = vmatmul.mubr.msk.f32.vlgmr.msra.gmra.mrb[6].mxu1 %vm142_vm3, %v1075_v9 }
0x1719   :  { %4341 = vmatpush3.bf16.msra.mxu1 %v4931_v5  ;;  %3994 = vmatprep.mubr.msk.f32.mxu1 %vm4787_vm1, %v4784_v1 }
0x171a   :  { %4342 = vmatprep.subr.bf16.mxu1 %v4785_v2 }
0x171d   :  { %4344 = vmatpush3.bf16.msra.mxu1 %v4944_v8 }
0x171e   :  { %4345 = vmatprep.subr.bf16.mxu1 %v4785_v2 }
0x1721   :  { %4347 = vmatpush3.bf16.msra.mxu1 %v4956_v12 }
0x1722   :  { %4348 = vmatprep.subr.bf16.mxu1 %v4785_v2 }
0x1725   :  { %4350 = vmatpush3.bf16.msra.mxu1 %v4969_v15 }
0x1726   :  { %4351 = vmatprep.subr.bf16.mxu1 %v4785_v2 }
0x1729   :  { %4353 = vmatpush3.bf16.msra.mxu1 %v4981_v18 }
0x172a   :  { %4354 = vmatprep.subr.bf16.mxu1 %v4785_v2 }
0x172d   :  { %4356 = vmatpush3.bf16.msra.mxu1 %v4993_v21 }
0x172e   :  { %4375 = vmatprep.subr.bf16.mxu1 %v4785_v2 }
0x17eb   :  { %v1145_v16 = vpop.f32.mrb[6].mxu1 }
0x17ec   :  { %v1146_v10 = vadd.f32 %v5025_v27, %v1145_v16  ;;  %v3942_v13 = vpop.f32.mrb[7].mxu1 }
0x17ee   :  { %4724 = vtanh.f32 %v1146_v10  ;;  %v3459_v20 = vmul.f32 -1.442695, %v1146_v10 }
0x17f0   :  { %4726 = vpow2.f32 %v3459_v20 }
0x17f8   :  { %v4725_v17 = vpop.eup %4724 }
0x17f9   :  { %1163 = vrot.lane.b32.xlu0 %v4725_v17, %s4788_s25 }
0x17fa   :  { %v4727_v22 = vpop.eup %4726 }
0x17fb   :  { %v1152_v24 = vadd.f32 1.0, %v4727_v22 }
0x17fd   :  { %4728 = vrcp.f32 %v1152_v24 }
0x1807   :  { %v4729_v25 = vpop.eup %4728 }
0x1808   :  { %v1161_v32 = vmul.f32 %v4729_v25, %v1159_v30 }
0x186b   :  { %v1164_v26 = vpop.permute.xlu0 %1163 }
0x186c   :  { %v1166_v29 = vmul.f32 %v4729_v25, %v1164_v26 }
0x186e   :  { %1168 = vrot.lane.b32.xlu0 %v1166_v29, %s4786_s4 }
0x18e0   :  { %v1169_v33 = vpop.permute.xlu0 %1168 }
0x18e1   :  { %v1171_v34 = vadd.f32 %v1169_v33, %v1161_v32 }
0x18e3   :  { %4730 = vtanh.f32 %v1171_v34 }
0x18ed   :  { %v4731_v35 = vpop.eup %4730 }
0x18ee   :  { %1174 = vrot.lane.b32.xlu1 %v4731_v35, %s4788_s25 }
0x18f2   :  { %1199 = vrot.lane.b32.xlu1 %v5197_v53, %s4786_s4 }
0x18f6   :  { %1179 = vrot.lane.b32.xlu1 %v1171_v34, %s6121_s3 }
0x1960   :  { %v1175_v36 = vpop.permute.xlu1 %1174 }
0x1961   :  { %v5376_v37 = vmul.f32 %v4729_v25, %v1175_v36 }
0x1963   :  { %1184 = vrot.lane.b32.xlu0 %v5376_v37, %s4786_s4 }
0x1964   :  { %v1200_v38 = vpop.permute.xlu1 %1199 }
0x1965   :  { %v1206_v42 = vsel %vm74_vm0, %v5180_v43, %v1200_v38 }
0x1968   :  { %v1180_v39 = vpop.permute.xlu1 %1179 }
0x1969   :  { %1182 = vst.msk [vmem:[#allocation3] sm:$0xff] %vm74_vm0, %v1180_v39 }
0x1970   :  { %v1288_v40 = vld [vmem:[#allocation3] sm:$0xff] }
0x1971   :  { %1290 = vrot.lane.b32.xlu1 %v1288_v40, %s4786_s4  ;;  %v4783_v40 = vld [vmem:[%s6131_s24 + $0x50] sm:$0xff] }
0x19d5   :  { %v1185_v41 = vpop.permute.xlu0 %1184 }
0x19d6   :  { %1187 = vst.msk [vmem:[#allocation2] sm:$0xff] %vm74_vm0, %v1185_v41 }
0x19d7   :  { %1189 = vst.msk [vmem:[#allocation4 + $0x38] sm:$0xff] %vm77_vm4, %v1185_v41 }
0x19dd   :  { %v1197_v53 = vld [vmem:[#allocation2] sm:$0xff] }
0x19de   :  { %1203 = vrot.lane.b32.xlu0 %v1197_v53, %s4788_s25 }
0x19e3   :  { %v1291_v60 = vpop.permute.xlu1 %1290 }
0x1a50   :  { %v1204_v44 = vpop.permute.xlu0 %1203 }
0x1a51   :  { %v1207_v47 = vsel %vm134_vm2, %v1206_v42, %v1204_v44 }
0x1a52   :  { %3968 = vmatmul.mubr.msk.f32.vlgmr.msra.gmra.mrb[8].mxu0 %vm142_vm3, %v1207_v47 }
0x1a53   :  { %4359 = vmatpush3.bf16.msra.mxu0 %v4931_v5  ;;  %4021 = vmatprep.mubr.msk.f32.mxu0 %vm4787_vm1, %v4784_v1 }
0x1a54   :  { %4360 = vmatprep.subr.bf16.mxu0 %v4785_v2 }
0x1a57   :  { %4362 = vmatpush3.bf16.msra.mxu0 %v4944_v8 }
0x1a58   :  { %4363 = vmatprep.subr.bf16.mxu0 %v4785_v2 }
0x1a5b   :  { %4365 = vmatpush3.bf16.msra.mxu0 %v4956_v12 }
0x1a5c   :  { %4366 = vmatprep.subr.bf16.mxu0 %v4785_v2 }
0x1a5f   :  { %4368 = vmatpush3.bf16.msra.mxu0 %v4969_v15 }
0x1a60   :  { %4369 = vmatprep.subr.bf16.mxu0 %v4785_v2 }
0x1a63   :  { %4371 = vmatpush3.bf16.msra.mxu0 %v4981_v18 }
0x1a64   :  { %4372 = vmatprep.subr.bf16.mxu0 %v4785_v2 }
0x1a67   :  { %4374 = vmatpush3.bf16.msra.mxu0 %v4993_v21 }
0x1b25   :  { %v1277_v43 = vpop.f32.mrb[8].mxu0 }
0x1b26   :  { %v1278_v48 = vadd.f32 %v5025_v27, %v1277_v43  ;;  %v3969_v49 = vpop.f32.mrb[9].mxu0 }
0x1b28   :  { %4732 = vtanh.f32 %v1278_v48  ;;  %v3463_v51 = vmul.f32 -1.442695, %v1278_v48 }
0x1b2a   :  { %4734 = vpow2.f32 %v3463_v51 }
0x1b32   :  { %v4733_v50 = vpop.eup %4732 }
0x1b33   :  { %1295 = vrot.lane.b32.xlu0 %v4733_v50, %s4788_s25 }
0x1b34   :  { %v4735_v55 = vpop.eup %4734 }
0x1b35   :  { %v1284_v56 = vadd.f32 1.0, %v4735_v55 }
0x1b37   :  { %4736 = vrcp.f32 %v1284_v56 }
0x1b41   :  { %v4737_v57 = vpop.eup %4736 }
0x1b42   :  { %v1293_v61 = vmul.f32 %v4737_v57, %v1291_v60 }
0x1ba5   :  { %v1296_v58 = vpop.permute.xlu0 %1295 }
0x1ba6   :  { %v1298_v59 = vmul.f32 %v4737_v57, %v1296_v58 }
0x1ba8   :  { %1300 = vrot.lane.b32.xlu0 %v1298_v59, %s4786_s4 }
0x1c1a   :  { %v1301_v63 = vpop.permute.xlu0 %1300 }
0x1c1b   :  { %v1303_v0 = vadd.f32 %v1301_v63, %v1293_v61 }
0x1c1d   :  { %4738 = vtanh.f32 %v1303_v0 }
0x1c27   :  { %v4739_v27 = vpop.eup %4738 }
0x1c28   :  { %1306 = vrot.lane.b32.xlu1 %v4739_v27, %s4788_s25 }
0x1c2c   :  { %1331 = vrot.lane.b32.xlu1 %v5153_v23, %s4786_s4 }
0x1c30   :  { %1311 = vrot.lane.b32.xlu1 %v1303_v0, %s6121_s3  ;;  %v1592_v0 = vld [vmem:[%s6131_s24] sm:$0xff] }
0x1c9a   :  { %v1307_v3 = vpop.permute.xlu1 %1306 }
0x1c9b   :  { %v5409_v4 = vmul.f32 %v4737_v57, %v1307_v3 }
0x1c9d   :  { %1316 = vrot.lane.b32.xlu0 %v5409_v4, %s4786_s4 }
0x1c9e   :  { %v1332_v28 = vpop.permute.xlu1 %1331 }
0x1c9f   :  { %v1338_v16 = vsel %vm74_vm0, %v5136_v11, %v1332_v28 }
0x1ca2   :  { %v1312_v6 = vpop.permute.xlu1 %1311 }
0x1ca3   :  { %1314 = vst.msk [vmem:[#allocation3] sm:$0xff] %vm74_vm0, %v1312_v6 }
0x1caa   :  { %v1420_v7 = vld [vmem:[#allocation3] sm:$0xff] }
0x1cab   :  { %1422 = vrot.lane.b32.xlu1 %v1420_v7, %s4786_s4 }
0x1d0f   :  { %v1317_v9 = vpop.permute.xlu0 %1316 }
0x1d10   :  { %1319 = vst.msk [vmem:[#allocation2] sm:$0xff] %vm74_vm0, %v1317_v9 }
0x1d11   :  { %1321 = vst.msk [vmem:[#allocation4 + $0x40] sm:$0xff] %vm77_vm4, %v1317_v9 }
0x1d17   :  { %v1329_v23 = vld [vmem:[#allocation2] sm:$0xff] }
0x1d18   :  { %1335 = vrot.lane.b32.xlu0 %v1329_v23, %s4788_s25 }
0x1d1d   :  { %v1423_v25 = vpop.permute.xlu1 %1422 }
0x1d8a   :  { %v1336_v10 = vpop.permute.xlu0 %1335 }
0x1d8b   :  { %v1339_v13 = vsel %vm134_vm2, %v1338_v16, %v1336_v10  ;;  %v3472_v16 = vld [vmem:[%s6131_s24 + $0x58] sm:$0xff]  ;;  %s4790_s24 = smov 16  }
0x1d8c   :  { %3995 = vmatmul.mubr.msk.f32.vlgmr.msra.gmra.mrb[8].mxu1 %vm142_vm3, %v1339_v13 }
0x1d8d   :  { %4377 = vmatpush3.bf16.msra.mxu1 %v4931_v5  ;;  %4048 = vmatprep.mubr.msk.f32.mxu1 %vm4787_vm1, %v4784_v1 }
0x1d8e   :  { %4378 = vmatprep.subr.bf16.mxu1 %v4785_v2 }
0x1d91   :  { %4380 = vmatpush3.bf16.msra.mxu1 %v4944_v8  ;;  %v5439_v8 = vld [vmem:[%s6133_s5] ss:$0 sm:$0xff]  ;;  %s6134_s5 = sld [smem:[#allocation9_spill]] }
0x1d92   :  { %4381 = vmatprep.subr.bf16.mxu1 %v4785_v2 }
0x1d95   :  { %4383 = vmatpush3.bf16.msra.mxu1 %v4956_v12 }
0x1d96   :  { %4384 = vmatprep.subr.bf16.mxu1 %v4785_v2 }
0x1d99   :  { %4386 = vmatpush3.bf16.msra.mxu1 %v4969_v15 }
0x1d9a   :  { %4387 = vmatprep.subr.bf16.mxu1 %v4785_v2 }
0x1d9d   :  { %4389 = vmatpush3.bf16.msra.mxu1 %v4981_v18 }
0x1d9e   :  { %4390 = vmatprep.subr.bf16.mxu1 %v4785_v2 }
0x1da1   :  { %4392 = vmatpush3.bf16.msra.mxu1 %v4993_v21 }
0x1da2   :  { %4425 = vmatprep.subr.bf16.mxu1 %v4785_v2 }
0x1e5f   :  { %v1409_v5 = vpop.f32.mrb[8].mxu1 }
0x1e60   :  { %v1410_v12 = vadd.f32 %v5439_v8, %v1409_v5  ;;  %v3996_v11 = vpop.f32.mrb[9].mxu1 }
0x1e62   :  { %4740 = vtanh.f32 %v1410_v12  ;;  %v3467_v18 = vmul.f32 -1.442695, %v1410_v12 }
0x1e64   :  { %4742 = vpow2.f32 %v3467_v18 }
0x1e6c   :  { %v4741_v15 = vpop.eup %4740 }
0x1e6d   :  { %1427 = vrot.lane.b32.xlu0 %v4741_v15, %s4788_s25 }
0x1e6e   :  { %v4743_v17 = vpop.eup %4742 }
0x1e6f   :  { %v1416_v20 = vadd.f32 1.0, %v4743_v17 }
0x1e71   :  { %4744 = vrcp.f32 %v1416_v20 }
0x1e7b   :  { %v4745_v21 = vpop.eup %4744 }
0x1e7c   :  { %v1425_v26 = vmul.f32 %v4745_v21, %v1423_v25 }
0x1edf   :  { %v1428_v22 = vpop.permute.xlu0 %1427 }
0x1ee0   :  { %v1430_v24 = vmul.f32 %v4745_v21, %v1428_v22 }
0x1ee2   :  { %1432 = vrot.lane.b32.xlu0 %v1430_v24, %s4786_s4 }
0x1f54   :  { %v1433_v29 = vpop.permute.xlu0 %1432 }
0x1f55   :  { %v1435_v30 = vadd.f32 %v1433_v29, %v1425_v26 }
0x1f57   :  { %4746 = vtanh.f32 %v1435_v30 }
0x1f61   :  { %v4747_v32 = vpop.eup %4746 }
0x1f62   :  { %1438 = vrot.lane.b32.xlu1 %v4747_v32, %s4788_s25 }
0x1f66   :  { %1463 = vrot.lane.b32.xlu1 %v5109_v52, %s4786_s4 }
0x1f6a   :  { %1443 = vrot.lane.b32.xlu1 %v1435_v30, %s6121_s3 }
0x1fd4   :  { %v1439_v33 = vpop.permute.xlu1 %1438 }
0x1fd5   :  { %v5448_v34 = vmul.f32 %v4745_v21, %v1439_v33 }
0x1fd7   :  { %1448 = vrot.lane.b32.xlu0 %v5448_v34, %s4786_s4 }
0x1fd8   :  { %v1464_v35 = vpop.permute.xlu1 %1463 }
0x1fd9   :  { %v1470_v41 = vsel %vm74_vm0, %v4783_v40, %v1464_v35  ;;  %v5531_v40 = vld [vmem:[#allocation4 + $0x18] sm:$0xff] }
0x1fdc   :  { %v1444_v36 = vpop.permute.xlu1 %1443 }
0x1fdd   :  { %1446 = vst.msk [vmem:[#allocation3] sm:$0xff] %vm74_vm0, %v1444_v36 }
0x1fe4   :  { %v1552_v38 = vld [vmem:[#allocation3] sm:$0xff] }
0x1fe5   :  { %1554 = vrot.lane.b32.xlu1 %v1552_v38, %s4786_s4 }
0x2049   :  { %v1449_v39 = vpop.permute.xlu0 %1448 }
0x204a   :  { %1451 = vst.msk [vmem:[#allocation2] sm:$0xff] %vm74_vm0, %v1449_v39 }
0x204b   :  { %1453 = vst.msk [vmem:[#allocation4 + $0x48] sm:$0xff] %vm77_vm4, %v1449_v39 }
0x2051   :  { %v1461_v52 = vld [vmem:[#allocation2] sm:$0xff] }
0x2052   :  { %1467 = vrot.lane.b32.xlu0 %v1461_v52, %s4788_s25 }
0x2057   :  { %v1555_v58 = vpop.permute.xlu1 %1554 }
0x20c4   :  { %v1468_v53 = vpop.permute.xlu0 %1467 }
0x20c5   :  { %v1471_v42 = vsel %vm134_vm2, %v1470_v41, %v1468_v53 }
0x20c6   :  { %4022 = vmatmul.mubr.msk.f32.vlgmr.msra.gmra.mrb[10].mxu0 %vm142_vm3, %v1471_v42 }
0x2199   :  { %v1541_v44 = vpop.f32.mrb[10].mxu0 }
0x219a   :  { %v1542_v47 = vadd.f32 %v5439_v8, %v1541_v44  ;;  %v4023_v43 = vpop.f32.mrb[11].mxu0  ;;  %v5538_v44 = vld [vmem:[#allocation4 + $0x20] sm:$0xff] }
0x219b   :  { %v4481_v43 = vpack.i.bf16 %v5538_v44, %v5531_v40 }
0x219c   :  { %4748 = vtanh.f32 %v1542_v47  ;;  %v3471_v49 = vmul.f32 -1.442695, %v1542_v47 }
0x219e   :  { %4750 = vpow2.f32 %v3471_v49 }
0x21a6   :  { %v4749_v48 = vpop.eup %4748 }
0x21a7   :  { %1559 = vrot.lane.b32.xlu0 %v4749_v48, %s4788_s25 }
0x21a8   :  { %v4751_v50 = vpop.eup %4750 }
0x21a9   :  { %v1548_v51 = vadd.f32 1.0, %v4751_v50  ;;  %v5549_v50 = vld [vmem:[#allocation4 + $0x28] sm:$0xff] }
0x21ab   :  { %4752 = vrcp.f32 %v1548_v51 }
0x21b5   :  { %v4753_v55 = vpop.eup %4752 }
0x21b6   :  { %v1557_v59 = vmul.f32 %v4753_v55, %v1555_v58 }
0x2219   :  { %v1560_v56 = vpop.permute.xlu0 %1559 }
0x221a   :  { %v1562_v57 = vmul.f32 %v4753_v55, %v1560_v56 }
0x221c   :  { %1564 = vrot.lane.b32.xlu0 %v1562_v57, %s4786_s4  ;;  %v5555_v57 = vld [vmem:[#allocation4 + $0x30] sm:$0xff] }
0x221d   :  { %v4516_v58 = vpack.i.bf16 %v5555_v57, %v5549_v50 }
0x228e   :  { %v1565_v60 = vpop.permute.xlu0 %1564 }
0x228f   :  { %v1567_v61 = vadd.f32 %v1565_v60, %v1557_v59 }
0x2291   :  { %4754 = vtanh.f32 %v1567_v61 }
0x229b   :  { %v4755_v63 = vpop.eup %4754 }
0x229c   :  { %1570 = vrot.lane.b32.xlu1 %v4755_v63, %s4788_s25 }
0x22a0   :  { %1595 = vrot.lane.b32.xlu1 %v1592_v0, %s4786_s4 }
0x22a4   :  { %1575 = vrot.lane.b32.xlu1 %v1567_v61, %s6121_s3  ;;  %v5563_v61 = vld [vmem:[#allocation4 + $0x38] sm:$0xff] }
0x22a5   :  { %v4536_v63 = vpack.i.bf16 %v5563_v61, %v5555_v57 }
0x230e   :  { %v1571_v27 = vpop.permute.xlu1 %1570 }
0x230f   :  { %v1573_v3 = vmul.f32 %v4753_v55, %v1571_v27  ;;  %v4501_v55 = vpack.i.bf16 %v5549_v50, %v5538_v44 }
0x2311   :  { %1580 = vrot.lane.b32.xlu0 %v1573_v3, %s4786_s4 }
0x2312   :  { %v1596_v28 = vpop.permute.xlu1 %1595 }
0x2313   :  { %v1602_v10 = vsel %vm74_vm0, %v3472_v16, %v1596_v28  ;;  %v2122_v16 = vld [vmem:[%s6134_s5 + $0x10] sm:$0xff] }
0x2316   :  { %v1576_v6 = vpop.permute.xlu1 %1575 }
0x2317   :  { %1578 = vst.msk [vmem:[#allocation3] sm:$0xff] %vm74_vm0, %v1576_v6 }
0x231e   :  { %v1684_v7 = vld [vmem:[#allocation3] sm:$0xff] }
0x231f   :  { %1686 = vrot.lane.b32.xlu1 %v1684_v7, %s4786_s4 }
0x2383   :  { %v1581_v9 = vpop.permute.xlu0 %1580 }
0x2384   :  { %1583 = vst.msk [vmem:[#allocation2] sm:$0xff] %vm74_vm0, %v1581_v9 }
0x2385   :  { %1585 = vst.msk [vmem:[#allocation4 + $0x50] sm:$0xff] %vm77_vm4, %v1581_v9  ;;  %v2120_v9 = vld [vmem:[%s6134_s5] sm:$0xff] }
0x238b   :  { %v1593_v23 = vld [vmem:[#allocation2] sm:$0xff] }
0x238c   :  { %1599 = vrot.lane.b32.xlu0 %v1593_v23, %s4788_s25  ;;  %v2121_v23 = vld [vmem:[%s6134_s5 + $0x8] sm:$0xff] }
0x23fe   :  { %v1600_v13 = vpop.permute.xlu0 %1599 }
0x23ff   :  { %v1603_v5 = vsel %vm134_vm2, %v1602_v10, %v1600_v13  ;;  %v5588_v10 = vld [vmem:[#allocation4 + $0x48] sm:$0xff] }
0x2400   :  { %4049 = vmatmul.mubr.msk.f32.vlgmr.msra.gmra.mrb[10].mxu1 %vm142_vm3, %v1603_v5  ;;  %v4393_v5 = vpack.c.bf16 %v2121_v23, %v2120_v9  ;;  %v1734_v9 = vld [vmem:[#allocation4 + $0x60] sm:$0xff]  ;;  %v1735_v23 = vld [vmem:[#allocation4 + $0x68] sm:$0xff] }
0x2401   :  { %4107 = vmatprep.mubr.msk.f32.mxu1 %vm4787_vm1, %v4784_v1 }
0x2402   :  { %4394 = vmatprep.subr.bf16.mxu0 %v4393_v5 }
0x2403   :  { %4396 = vmatpush3.bf16.msra.mxu0 %v4393_v5 }
0x24d3   :  { %v1673_v12 = vpop.f32.mrb[10].mxu1 }
0x24d4   :  { %v1674_v11 = vadd.f32 %v5439_v8, %v1673_v12  ;;  %v4050_v15 = vpop.f32.mrb[11].mxu1  ;;  %v1687_v8 = vpop.permute.xlu1 %1686  ;;  %v2123_v12 = vld [vmem:[%s6134_s5 + $0x18] sm:$0xff] }
0x24d5   :  { %v2124_v15 = vld [vmem:[%s6134_s5 + $0x20] sm:$0xff] }
0x24d6   :  { %4756 = vtanh.f32 %v1674_v11  ;;  %v3474_v17 = vmul.f32 -1.442695, %v1674_v11  ;;  %v4397_v11 = vpack.c.bf16 %v2123_v12, %v2122_v16  ;;  %v1736_v16 = vld [vmem:[#allocation4 + $0x70] sm:$0xff] }
0x24d7   :  { %v4656_v12 = vpack.i.bf16 %v1736_v16, %v1735_v23 }
0x24d8   :  { %4758 = vpow2.f32 %v3474_v17  ;;  %4398 = vmatprep.subr.bf16.mxu0 %v4397_v11 }
0x24d9   :  { %4400 = vmatpush3.bf16.msra.mxu0 %v4397_v11  ;;  %v1750_v11 = vld [vmem:[#allocation5 + $0x68] sm:$0xff] }
0x24e0   :  { %v4757_v18 = vpop.eup %4756 }
0x24e1   :  { %1691 = vrot.lane.b32.xlu0 %v4757_v18, %s4788_s25  ;;  %v2125_v18 = vld [vmem:[%s6134_s5 + $0x28] sm:$0xff] }
0x24e2   :  { %v4759_v20 = vpop.eup %4758 }
0x24e3   :  { %v1680_v21 = vadd.f32 1.0, %v4759_v20 }
0x24e5   :  { %4760 = vrcp.f32 %v1680_v21  ;;  %v5603_v21 = vld [vmem:[#allocation4 + $0x50] sm:$0xff] }
0x24ef   :  { %v4761_v22 = vpop.eup %4760 }
0x24f0   :  { %v1689_v26 = vmul.f32 %v4761_v22, %v1687_v8  ;;  %v4586_v8 = vpack.i.bf16 %v5603_v21, %v5588_v10 }
0x2553   :  { %v1692_v24 = vpop.permute.xlu0 %1691 }
0x2554   :  { %v1694_v25 = vmul.f32 %v4761_v22, %v1692_v24  ;;  %v2126_v24 = vld [vmem:[%s6134_s5 + $0x30] sm:$0xff] }
0x2556   :  { %1696 = vrot.lane.b32.xlu0 %v1694_v25, %s4786_s4  ;;  %v2127_v25 = vld [vmem:[%s6134_s5 + $0x38] sm:$0xff] }
0x255a   :  { %1454 = vrot.lane.b32.xlu0 %v5448_v34, %s4790_s24 }
0x255e   :  { %1190 = vrot.lane.b32.xlu0 %v5376_v37, %s4790_s24 }
0x2562   :  { %926 = vrot.lane.b32.xlu0 %v5308_v31, %s4790_s24 }
0x2566   :  { %658 = vrot.lane.b32.xlu0 %v5229_v19, %s4790_s24 }
0x25c8   :  { %v1697_v29 = vpop.permute.xlu0 %1696 }
0x25c9   :  { %v5497_v30 = vadd.f32 %v1697_v29, %v1689_v26  ;;  %v4405_v26 = vpack.c.bf16 %v2127_v25, %v2126_v24  ;;  %v2128_v29 = vld [vmem:[%s6134_s5 + $0x40] sm:$0xff] }
0x25cb   :  { %4762 = vtanh.f32 %v5497_v30 }
0x25cc   :  { %v1455_v32 = vpop.permute.xlu0 %1454 }
0x25cd   :  { %1458 = vst.msk [vmem:[#allocation5 + $0x10] sm:$0xff] %vm77_vm4, %v1455_v32  ;;  %v2129_v32 = vld [vmem:[%s6134_s5 + $0x48] sm:$0xff] }
0x25d0   :  { %v1191_v33 = vpop.permute.xlu0 %1190 }
0x25d1   :  { %1194 = vst.msk [vmem:[#allocation5 + $0x20] sm:$0xff] %vm77_vm4, %v1191_v33  ;;  %v4409_v33 = vpack.c.bf16 %v2129_v32, %v2128_v29 }
0x25d4   :  { %v927_v37 = vpop.permute.xlu0 %926  ;;  %v1739_v39 = vld [vmem:[#allocation5 + $0x10] sm:$0xff] }
0x25d5   :  { %v4763_v34 = vpop.eup %4762  ;;  %930 = vst.msk [vmem:[#allocation5 + $0x30] sm:$0xff] %vm77_vm4, %v927_v37  ;;  %v2130_v37 = vld [vmem:[%s6134_s5 + $0x50] sm:$0xff] }
0x25d6   :  { %1702 = vrot.lane.b32.xlu1 %v4763_v34, %s4788_s25  ;;  %v2131_v34 = vld [vmem:[%s6134_s5 + $0x58] sm:$0xff] }
0x25d8   :  { %v659_v19 = vpop.permute.xlu0 %658  ;;  %v1741_v48 = vld [vmem:[#allocation5 + $0x20] sm:$0xff] }
0x25d9   :  { %662 = vst.msk [vmem:[#allocation5 + $0x40] sm:$0xff] %vm77_vm4, %v659_v19  ;;  %v4413_v19 = vpack.c.bf16 %v2131_v34, %v2130_v37 }
0x25da   :  { %1586 = vrot.lane.b32.xlu1 %v1573_v3, %s4790_s24  ;;  %v5571_v3 = vld [vmem:[#allocation4 + $0x40] sm:$0xff] }
0x25db   :  { %v4556_v28 = vpack.i.bf16 %v5571_v3, %v5563_v61  ;;  %v4571_v17 = vpack.i.bf16 %v5588_v10, %v5571_v3 }
0x25dc   :  { %v1743_v59 = vld [vmem:[#allocation5 + $0x30] sm:$0xff] }
0x25de   :  { %1322 = vrot.lane.b32.xlu1 %v5409_v4, %s4790_s24 }
0x25e0   :  { %v1745_v6 = vld [vmem:[#allocation5 + $0x40] sm:$0xff] }
0x25e2   :  { %1058 = vrot.lane.b32.xlu1 %v5342_v62, %s4790_s24  ;;  %v5519_v62 = vld [vmem:[#allocation4 + $0x10] sm:$0xff] }
0x25e3   :  { %v4466_v53 = vpack.i.bf16 %v5531_v40, %v5519_v62 }
0x25e6   :  { %792 = vrot.lane.b32.xlu1 %v5273_v54, %s4790_s24 }
0x25ea   :  { %524 = vrot.lane.b32.xlu1 %v5185_v45, %s4790_s24  ;;  %v5523_v45 = vld [vmem:[#allocation4 + $0x8] sm:$0xff] }
0x25eb   :  { %v4456_v52 = vpack.i.bf16 %v5519_v62, %v5523_v45 }
0x2648   :  { %v1703_v31 = vpop.permute.xlu1 %1702 }
0x2649   :  { %v1705_v35 = vmul.f32 %v4761_v22, %v1703_v31  ;;  %v4401_v22 = vpack.c.bf16 %v2125_v18, %v2124_v15  ;;  %v2132_v31 = vld [vmem:[%s6134_s5 + $0x60] sm:$0xff]  ;;  %v1751_v18 = vld [vmem:[#allocation5 + $0x70] sm:$0xff] }
0x264b   :  { %1718 = vrot.lane.b32.xlu0 %v1705_v35, %s4790_s24  ;;  %4402 = vmatprep.subr.bf16.mxu0 %v4401_v22 }
0x264c   :  { %v1587_v36 = vpop.permute.xlu1 %1586  ;;  %4404 = vmatpush3.bf16.msra.mxu0 %v4401_v22 }
0x264d   :  { %1590 = vst.msk [vmem:[#allocation5 + $0x8] sm:$0xff] %vm77_vm4, %v1587_v36  ;;  %4406 = vmatprep.subr.bf16.mxu0 %v4405_v26 }
0x264f   :  { %390 = vrot.lane.b32.xlu0 %v5141_v14, %s4790_s24 }
0x2650   :  { %v1323_v4 = vpop.permute.xlu1 %1322  ;;  %4408 = vmatpush3.bf16.msra.mxu0 %v4405_v26 }
0x2651   :  { %1326 = vst.msk [vmem:[#allocation5 + $0x18] sm:$0xff] %vm77_vm4, %v1323_v4  ;;  %4410 = vmatprep.subr.bf16.mxu0 %v4409_v33 }
0x2653   :  { %256 = vrot.lane.b32.xlu0 %v5097_v46, %s4790_s24 }
0x2654   :  { %v1059_v54 = vpop.permute.xlu1 %1058  ;;  %v5525_v38 = vld [vmem:[#allocation5 + $0x8] sm:$0xff]  ;;  %4412 = vmatpush3.bf16.msra.mxu0 %v4409_v33 }
0x2655   :  { %1062 = vst.msk [vmem:[#allocation5 + $0x28] sm:$0xff] %vm77_vm4, %v1059_v54  ;;  %v4461_v14 = vpack.i.bf16 %v1739_v39, %v5525_v38  ;;  %4414 = vmatprep.subr.bf16.mxu0 %v4413_v19  ;;  %v2134_v54 = vld [vmem:[%s6134_s5 + $0x70] sm:$0xff] }
0x2657   :  { %4457 = vrot.lane.b32.xlu0 %v4456_v52, %s4786_s4  ;;  %4462 = vrot.lane.b32.xlu1 %v4461_v14, %s4791_s26 }
0x2658   :  { %v793_v46 = vpop.permute.xlu1 %792  ;;  %v1740_v41 = vld [vmem:[#allocation5 + $0x18] sm:$0xff]  ;;  %4416 = vmatpush3.bf16.msra.mxu0 %v4413_v19 }
0x2659   :  { %796 = vst.msk [vmem:[#allocation5 + $0x38] sm:$0xff] %vm77_vm4, %v793_v46  ;;  %v4471_v42 = vpack.i.bf16 %v1740_v41, %v1739_v39  ;;  %v4496_v49 = vpack.i.bf16 %v1741_v48, %v1740_v41  ;;  %v2135_v39 = vld [vmem:[%s6134_s5 + $0x78] sm:$0xff] }
0x265a   :  { %v4421_v52 = vpack.c.bf16 %v2135_v39, %v2134_v54 }
0x265b   :  { %4467 = vrot.lane.b32.xlu0 %v4466_v53, %s4788_s25  ;;  %4472 = vrot.lane.b32.xlu1 %v4471_v42, %s4790_s24 }
0x265c   :  { %v525_v47 = vpop.permute.xlu1 %524  ;;  %v1742_v51 = vld [vmem:[#allocation5 + $0x28] sm:$0xff] }
0x265d   :  { %528 = vst.msk [vmem:[#allocation5 + $0x48] sm:$0xff] %vm77_vm4, %v525_v47  ;;  %v4506_v56 = vpack.i.bf16 %v1742_v51, %v1741_v48  ;;  %v4526_v60 = vpack.i.bf16 %v1743_v59, %v1742_v51 }
0x265f   :  { %4477 = vrot.lane.b32.xlu0 %v4471_v42, %s4792_s2  ;;  %4482 = vrot.lane.b32.xlu1 %v4481_v43, %s4786_s4 }
0x2660   :  { %v1744_v0 = vld [vmem:[#allocation5 + $0x38] sm:$0xff] }
0x2661   :  { %v4546_v27 = vpack.i.bf16 %v1744_v0, %v1743_v59  ;;  %v4566_v7 = vpack.i.bf16 %v1745_v6, %v1744_v0 }
0x2663   :  { %4487 = vrot.lane.b32.xlu0 %v4481_v43, %s6121_s3  ;;  %1712 = vrot.lane.b32.xlu1 %v1705_v35, %s4786_s4  ;;  %v2133_v35 = vld [vmem:[%s6134_s5 + $0x68] sm:$0xff] }
0x2664   :  { %v1746_v13 = vld [vmem:[#allocation5 + $0x48] sm:$0xff]  ;;  %v4417_v36 = vpack.c.bf16 %v2133_v35, %v2132_v31 }
0x2665   :  { %v4576_v20 = vpack.i.bf16 %v1746_v13, %v1745_v6 }
0x2666   :  { %4418 = vmatprep.subr.bf16.mxu0 %v4417_v36 }
0x2667   :  { %4497 = vrot.lane.b32.xlu0 %v4496_v49, %s4793_s27  ;;  %4492 = vrot.lane.b32.xlu1 %v4496_v49, %s4791_s26 }
0x2668   :  { %4420 = vmatpush3.bf16.msra.mxu0 %v4417_v36 }
0x2669   :  { %4422 = vmatprep.subr.bf16.mxu0 %v4421_v52 }
0x266b   :  { %4502 = vrot.lane.b32.xlu1 %v4501_v55, %s4788_s25  ;;  %4507 = vrot.lane.b32.xlu0 %v4506_v56, %s4790_s24 }
0x266c   :  { %4424 = vmatpush3.bf16.msra.mxu0 %v4421_v52 }
0x266f   :  { %4512 = vrot.lane.b32.xlu1 %v4506_v56, %s4792_s2  ;;  %4517 = vrot.lane.b32.xlu0 %v4516_v58, %s4786_s4 }
0x2673   :  { %4522 = vrot.lane.b32.xlu1 %v4516_v58, %s6121_s3  ;;  %4527 = vrot.lane.b32.xlu0 %v4526_v60, %s4791_s26  ;;  %v1749_v58 = vld [vmem:[#allocation5 + $0x60] sm:$0xff] }
0x2674   :  { %v4651_v15 = vpack.i.bf16 %v1750_v11, %v1749_v58 }
0x2677   :  { %4532 = vrot.lane.b32.xlu1 %v4526_v60, %s4793_s27  ;;  %4537 = vrot.lane.b32.xlu0 %v4536_v63, %s4788_s25 }
0x267b   :  { %4547 = vrot.lane.b32.xlu0 %v4546_v27, %s4792_s2  ;;  %4542 = vrot.lane.b32.xlu1 %v4546_v27, %s4790_s24 }
0x267f   :  { %4557 = vrot.lane.b32.xlu0 %v4556_v28, %s6121_s3  ;;  %4552 = vrot.lane.b32.xlu1 %v4556_v28, %s4786_s4 }
0x2683   :  { %4567 = vrot.lane.b32.xlu0 %v4566_v7, %s4793_s27  ;;  %4562 = vrot.lane.b32.xlu1 %v4566_v7, %s4791_s26 }
0x2687   :  { %4572 = vrot.lane.b32.xlu1 %v4571_v17, %s4788_s25  ;;  %4577 = vrot.lane.b32.xlu0 %v4576_v20, %s4790_s24  ;;  %v4661_v17 = vpack.i.bf16 %v1751_v18, %v1750_v11 }
0x268b   :  { %4582 = vrot.lane.b32.xlu1 %v4576_v20, %s4792_s2  ;;  %4587 = vrot.lane.b32.xlu0 %v4586_v8, %s4786_s4 }
0x26bd   :  { %v1719_v4 = vpop.permute.xlu0 %1718 }
0x26be   :  { %1721 = vst.msk [vmem:[#allocation5] sm:$0xff] %vm77_vm4, %v1719_v4 }
0x26c1   :  { %v391_v14 = vpop.permute.xlu0 %390 }
0x26c2   :  { %394 = vst.msk [vmem:[#allocation5 + $0x50] sm:$0xff] %vm77_vm4, %v391_v14 }
0x26c5   :  { %v257_v46 = vpop.permute.xlu0 %256  ;;  %v1737_v41 = vld [vmem:[#allocation5] sm:$0xff] }
0x26c6   :  { %260 = vst.msk [vmem:[#allocation5 + $0x58] sm:$0xff] %vm77_vm4, %v257_v46  ;;  %v4591_v53 = vpack.i.bf16 %v5525_v38, %v1737_v41 }
0x26c8   :  { %4592 = vrot.lane.b32.xlu1 %v4591_v53, %s4790_s24 }
0x26c9   :  { %v5646_v42 = vpop.permute.xlu1 %4462  ;;  %v1747_v47 = vld [vmem:[#allocation5 + $0x50] sm:$0xff]  ;;  %v5679_v20 = vpop.permute.xlu0 %4457 }
0x26ca   :  { %v4601_v43 = vpack.i.bf16 %v1747_v47, %v1746_v13  ;;  %v4460_v41 = vunpack.i.h.bf16 %v5679_v20  ;;  %v4459_v53 = vunpack.i.l.bf16 %v5679_v20 }
0x26cc   :  { %4597 = vrot.lane.b32.xlu1 %v4586_v8, %s6135_s28  ;;  %4602 = vrot.lane.b32.xlu0 %v4601_v43, %s4791_s26 }
0x26cd   :  { %v4473_v48 = vpop.permute.xlu1 %4472  ;;  %v1748_v49 = vld [vmem:[#allocation5 + $0x58] sm:$0xff]  ;;  %v5681_v22 = vpop.permute.xlu0 %4467 }
0x26ce   :  { %v4475_v51 = vunpack.i.h.bf16 %v4473_v48  ;;  %v4474_v55 = vunpack.i.l.bf16 %v4473_v48  ;;  %v4616_v56 = vpack.i.bf16 %v1748_v49, %v1747_v47  ;;  %v4626_v27 = vpack.i.bf16 %v1749_v58, %v1748_v49 }
0x26cf   :  { %v4465_v47 = vunpack.i.h.bf16 %v5646_v42  ;;  %v4470_v48 = vunpack.i.h.bf16 %v5681_v22  ;;  %v4469_v49 = vunpack.i.l.bf16 %v5681_v22 }
0x26d0   :  { %4607 = vrot.lane.b32.xlu1 %v4601_v43, %s4793_s27  ;;  %4617 = vrot.lane.b32.xlu0 %v4616_v56, %s4792_s2  ;;  %v2036_v63 = vsel %vm77_vm4, %v5531_v40, %v4475_v51  ;;  %v2035_v0 = vsel %vm77_vm4, %v5519_v62, %v4474_v55  ;;  %v4631_v62 = vpack.i.bf16 %v1735_v23, %v1734_v9  ;;  %v4464_v43 = vunpack.i.l.bf16 %v5646_v42 }
0x26d1   :  { %v4483_v38 = vpop.permute.xlu1 %4482  ;;  %v5683_v24 = vpop.permute.xlu0 %4477 }
0x26d2   :  { %v4485_v59 = vunpack.i.h.bf16 %v4483_v38  ;;  %v4484_v60 = vunpack.i.l.bf16 %v4483_v38  ;;  %v4480_v55 = vunpack.i.h.bf16 %v5683_v24 }
0x26d4   :  { %v5657_v28 = vsel %vm74_vm0, %v2035_v0, %v4484_v60  ;;  %v5660_v6 = vsel %vm74_vm0, %v2036_v63, %v4485_v59  ;;  %4612 = vrot.lane.b32.xlu1 %v4616_v56, %s4790_s24  ;;  %4627 = vrot.lane.b32.xlu0 %v4626_v27, %s4793_s27  ;;  %v4479_v60 = vunpack.i.l.bf16 %v5683_v24 }
0x26d5   :  { %v1713_v7 = vpop.permute.xlu1 %1712  ;;  %v5685_v8 = vpop.permute.xlu0 %4487 }
0x26d6   :  { %1715 = vst.msk [vmem:[#allocation2] sm:$0xff] %vm74_vm0, %v1713_v7  ;;  %v4490_v63 = vunpack.i.h.bf16 %v5685_v8  ;;  %v4489_v0 = vunpack.i.l.bf16 %v5685_v8 }
0x26d7   :  { %1717 = vst.msk [vmem:[#allocation4 + $0x58] sm:$0xff] %vm77_vm4, %v1713_v7 }
0x26d8   :  { %4622 = vrot.lane.b32.xlu1 %v4626_v27, %s4791_s26  ;;  %s6136_s26 = sld [smem:[#allocation10_spill]] }
0x26d9   :  { %v4493_v25 = vpop.permute.xlu1 %4492  ;;  %v5687_v29 = vpop.permute.xlu0 %4497 }
0x26da   :  { %v4494_v51 = vunpack.i.l.bf16 %v4493_v25  ;;  %v4495_v56 = vunpack.i.h.bf16 %v4493_v25  ;;  %v4499_v16 = vunpack.i.l.bf16 %v5687_v29 }
0x26dc   :  { %4632 = vrot.lane.b32.xlu1 %v4631_v62, %s4788_s25  ;;  %v4500_v62 = vunpack.i.h.bf16 %v5687_v29  ;;  %v2061_v11 = vsel %vm2057_vm5, %v5660_v6, %v4495_v56  ;;  %v1722_v6 = vld [vmem:[#allocation4] sm:$0xff] }
0x26dd   :  { %v4503_v26 = vpop.permute.xlu1 %4502  ;;  %v4508_v33 = vpop.permute.xlu0 %4507 }
0x26de   :  { %v5668_v40 = vld [vmem:[#allocation4 + $0x58] sm:$0xff]  ;;  %v4510_v58 = vunpack.i.h.bf16 %v4508_v33  ;;  %v4509_v38 = vunpack.i.l.bf16 %v4508_v33  ;;  %v4504_v27 = vunpack.i.l.bf16 %v4503_v26  ;;  %v4505_v42 = vunpack.i.h.bf16 %v4503_v26 }
0x26df   :  { %v4641_v13 = vpack.i.bf16 %v1734_v9, %v5668_v40  ;;  %v4636_v5 = vpack.i.bf16 %v5668_v40, %v5603_v21 }
0x26e0   :  { %v2037_v18 = vsel %vm77_vm4, %v5538_v44, %v4509_v38  ;;  %v2073_v8 = vsel %vm134_vm2, %v2061_v11, %v4505_v42 }
0x26e1   :  { %4642 = vrot.lane.b32.xlu1 %v4641_v13, %s4786_s4  ;;  %4637 = vrot.lane.b32.xlu0 %v4636_v5, %s4788_s25  ;;  %v4513_v32 = vpop.permute.xlu1 %4512  ;;  %v4518_v34 = vpop.permute.xlu0 %4517  ;;  %s6138_s4 = sld [smem:[#allocation12_spill]] }
0x26e2   :  { %v4520_v7 = vunpack.i.h.bf16 %v4518_v34  ;;  %v4519_v9 = vunpack.i.l.bf16 %v4518_v34  ;;  %v4514_v23 = vunpack.i.l.bf16 %v4513_v32  ;;  %v4515_v5 = vunpack.i.h.bf16 %v4513_v32 }
0x26e4   :  { %v2049_v26 = vsel %vm74_vm0, %v2037_v18, %v4519_v9  ;;  %v2086_v34 = vsel %vm2082_vm6, %v2073_v8, %v4515_v5 }
0x26e5   :  { %4647 = vrot.lane.b32.xlu0 %v4641_v13, %s6135_s28  ;;  %4657 = vrot.lane.b32.xlu1 %v4656_v12, %s6135_s28  ;;  %v5689_v37 = vpop.permute.xlu1 %4522  ;;  %v4528_v31 = vpop.permute.xlu0 %4527  ;;  %v2060_v13 = vsel %vm2057_vm5, %v5657_v28, %v4494_v51 }
0x26e6   :  { %v2072_v22 = vsel %vm134_vm2, %v2060_v13, %v4504_v27  ;;  %v4530_v24 = vunpack.i.h.bf16 %v4528_v31  ;;  %v4525_v51 = vunpack.i.h.bf16 %v5689_v37 }
0x26e7   :  { %v2085_v32 = vsel %vm2082_vm6, %v2072_v22, %v4514_v23 }
0x26e9   :  { %4652 = vrot.lane.b32.xlu0 %v4651_v15, %s4792_s2  ;;  %v5691_v19 = vpop.permute.xlu1 %4532  ;;  %v5695_v36 = vpop.permute.xlu0 %4537  ;;  %v2038_v15 = vsel %vm77_vm4, %v5549_v50, %v4510_v58  ;;  %v4524_v50 = vunpack.i.l.bf16 %v5689_v37  ;;  %s6139_s2 = sld [smem:[#allocation13_spill]] }
0x26ea   :  { %v2050_v29 = vsel %vm74_vm0, %v2038_v15, %v4520_v7  ;;  %v4540_v42 = vunpack.i.h.bf16 %v5695_v36  ;;  %v4539_v23 = vunpack.i.l.bf16 %v5695_v36  ;;  %v4534_v37 = vunpack.i.l.bf16 %v5691_v19 }
0x26eb   :  { %v2063_v27 = vsel %vm2057_vm5, %v2050_v29, %v4530_v24  ;;  %v4535_v13 = vunpack.i.h.bf16 %v5691_v19  ;;  %v2097_v15 = vsel %vm142_vm3, %v2085_v32, %v4524_v50 }
0x26ec   :  { %v2075_v22 = vsel %vm134_vm2, %v2063_v27, %v4540_v42 }
0x26ed   :  { %4662 = vrot.lane.b32.xlu0 %v4661_v17, %s4793_s27  ;;  %v5693_v35 = vpop.permute.xlu1 %4542  ;;  %v5699_v54 = vpop.permute.xlu0 %4547  ;;  %v4529_v17 = vunpack.i.l.bf16 %v4528_v31 }
0x26ef   :  { %v2062_v31 = vsel %vm2057_vm5, %v2049_v26, %v4529_v17 }
0x26f1   :  { %v5697_v4 = vpop.permute.xlu1 %4552  ;;  %v5703_v52 = vpop.permute.xlu0 %4557 }
0x26f2   :  { %v4559_v24 = vunpack.i.l.bf16 %v5703_v52  ;;  %v4555_v32 = vunpack.i.h.bf16 %v5697_v4 }
0x26f5   :  { %v5701_v39 = vpop.permute.xlu1 %4562  ;;  %v5707_v46 = vpop.permute.xlu0 %4567 }
0x26f9   :  { %v5705_v14 = vpop.permute.xlu1 %4572  ;;  %v5725_v12 = vpop.permute.xlu0 %4577 }
0x26fa   :  { %v4574_v26 = vunpack.i.l.bf16 %v5705_v14 }
0x26fd   :  { %v5716_v59 = vpop.permute.xlu1 %4582  ;;  %v5751_v7 = vpop.permute.xlu0 %4587 }
0x273a   :  { %v4593_v20 = vpop.permute.xlu1 %4592 }
0x273b   :  { %v4595_v25 = vunpack.i.h.bf16 %v4593_v20  ;;  %v4594_v28 = vunpack.i.l.bf16 %v4593_v20  ;;  %v2074_v20 = vsel %vm134_vm2, %v2062_v31, %v4539_v23 }
0x273d   :  { %v2034_v44 = vsel %vm77_vm4, %v5523_v45, %v4595_v25  ;;  %v2033_v33 = vsel %vm77_vm4, %v1722_v6, %v4594_v28  ;;  %v4569_v25 = vunpack.i.l.bf16 %v5707_v46  ;;  %v4564_v28 = vunpack.i.l.bf16 %v5701_v39 }
0x273e   :  { %v2046_v56 = vsel %vm74_vm0, %v2034_v44, %v4460_v41  ;;  %v2045_v58 = vsel %vm74_vm0, %v2033_v33, %v4459_v53  ;;  %v5747_v38 = vpop.permute.xlu1 %4597  ;;  %v5770_v17 = vpop.permute.xlu0 %4602  ;;  %v4584_v44 = vunpack.i.l.bf16 %v5716_v59  ;;  %v4565_v33 = vunpack.i.h.bf16 %v5701_v39 }
0x273f   :  { %v2059_v45 = vsel %vm2057_vm5, %v2046_v56, %v4465_v47  ;;  %v2058_v9 = vsel %vm2057_vm5, %v2045_v58, %v4464_v43  ;;  %v4549_v47 = vunpack.i.l.bf16 %v5699_v54  ;;  %v4544_v43 = vunpack.i.l.bf16 %v5693_v35 }
0x2740   :  { %v2070_v41 = vsel %vm134_vm2, %v2058_v9, %v4469_v49  ;;  %v2071_v53 = vsel %vm134_vm2, %v2059_v45, %v4470_v48  ;;  %v4554_v48 = vunpack.i.l.bf16 %v5697_v4  ;;  %v4585_v58 = vunpack.i.h.bf16 %v5716_v59 }
0x2741   :  { %v2083_v5 = vsel %vm2082_vm6, %v2070_v41, %v4479_v60  ;;  %v2084_v11 = vsel %vm2082_vm6, %v2071_v53, %v4480_v55  ;;  %v2098_v60 = vsel %vm142_vm3, %v2086_v34, %v4525_v51  ;;  %v2039_v8 = vsel %vm77_vm4, %v5555_v57, %v4544_v43 }
0x2742   :  { %v5765_v18 = vpop.permute.xlu1 %4607  ;;  %v2095_v36 = vsel %vm142_vm3, %v2083_v5, %v4489_v0  ;;  %v2096_v49 = vsel %vm142_vm3, %v2084_v11, %v4490_v63  ;;  %v2110_v0 = vsel %vm2107_vm7, %v2097_v15, %v4534_v37  ;;  %v4550_v63 = vunpack.i.h.bf16 %v5699_v54  ;;  %v5800_v56 = vpop.permute.xlu0 %4617 }
0x2743   :  { %v2108_v19 = vsel %vm2107_vm7, %v2095_v36, %v4499_v16  ;;  %v2109_v55 = vsel %vm2107_vm7, %v2096_v49, %v4500_v62  ;;  %v2111_v62 = vsel %vm2107_vm7, %v2098_v60, %v4535_v13  ;;  %v4545_v16 = vunpack.i.h.bf16 %v5693_v35 }
0x2744   :  { %4083 = vmatprep.mubr.f32.mxu0 %v2108_v19  ;;  %v2087_v6 = vsel %vm2082_vm6, %v2074_v20, %v4549_v47  ;;  %v4560_v54 = vunpack.i.h.bf16 %v5703_v52  ;;  %v2051_v50 = vsel %vm74_vm0, %v2039_v8, %v4554_v48  ;;  %v4570_v35 = vunpack.i.h.bf16 %v5707_v46 }
0x2745   :  { %4084 = vmatmul.mubr.f32.vlgmr.msra.gmra.mrb[12].mxu0 %v2109_v55  ;;  %v4599_v57 = vunpack.i.l.bf16 %v5747_v38  ;;  %v2099_v34 = vsel %vm142_vm3, %v2087_v6, %v4559_v24  ;;  %v2064_v31 = vsel %vm2057_vm5, %v2051_v50, %v4564_v28  ;;  %v4575_v51 = vunpack.i.h.bf16 %v5705_v14 }
0x2746   :  { %v5787_v29 = vpop.permute.xlu1 %4612  ;;  %4086 = vmatprep.mubr.f32.mxu0 %v2110_v0  ;;  %v4609_v4 = vunpack.i.l.bf16 %v5765_v18  ;;  %v2112_v52 = vsel %vm2107_vm7, %v2099_v34, %v4569_v25  ;;  %v2040_v46 = vsel %vm77_vm4, %v5563_v61, %v4545_v16  ;;  %v2076_v39 = vsel %vm134_vm2, %v2064_v31, %v4574_v26 }
0x2747   :  { %v2088_v42 = vsel %vm2082_vm6, %v2075_v22, %v4550_v63  ;;  %v2052_v14 = vsel %vm74_vm0, %v2040_v46, %v4555_v32  ;;  %v4600_v45 = vunpack.i.h.bf16 %v5747_v38  ;;  %v2089_v23 = vsel %vm2082_vm6, %v2076_v39, %v4584_v44 }
0x2748   :  { %v2100_v9 = vsel %vm142_vm3, %v2088_v42, %v4560_v54  ;;  %v2065_v37 = vsel %vm2057_vm5, %v2052_v14, %v4565_v33  ;;  %v4610_v61 = vunpack.i.h.bf16 %v5765_v18  ;;  %v2101_v59 = vsel %vm142_vm3, %v2089_v23, %v4599_v57  ;;  %v4628_v18 = vpop.permute.xlu0 %4627 }
0x2749   :  { %4087 = vmatmul.mubr.f32.gmra.mrb[14].mxu0 %v2111_v62  ;;  %v2113_v41 = vsel %vm2107_vm7, %v2100_v9, %v4570_v35  ;;  %v2077_v53 = vsel %vm134_vm2, %v2065_v37, %v4575_v51  ;;  %v2114_v13 = vsel %vm2107_vm7, %v2101_v59, %v4609_v4  ;;  %v4580_v5 = vunpack.i.h.bf16 %v5725_v12 }
0x274a   :  { %v5808_v27 = vpop.permute.xlu1 %4622  ;;  %4089 = vmatprep.mubr.f32.mxu0 %v2112_v52  ;;  %v4579_v38 = vunpack.i.l.bf16 %v5725_v12  ;;  %v2090_v15 = vsel %vm2082_vm6, %v2077_v53, %v4585_v58  ;;  %v4590_v47 = vunpack.i.h.bf16 %v5751_v7  ;;  %v4589_v43 = vunpack.i.l.bf16 %v5751_v7 }
0x274b   :  { %v2102_v36 = vsel %vm142_vm3, %v2090_v15, %v4600_v45  ;;  %v4605_v48 = vunpack.i.h.bf16 %v5770_v17  ;;  %v4604_v19 = vunpack.i.l.bf16 %v5770_v17  ;;  %v2042_v12 = vsel %vm77_vm4, %v5588_v10, %v4580_v5 }
0x274c   :  { %v2115_v49 = vsel %vm2107_vm7, %v2102_v36, %v4610_v61  ;;  %v2041_v55 = vsel %vm77_vm4, %v5571_v3, %v4579_v38  ;;  %v4615_v60 = vunpack.i.h.bf16 %v5787_v29  ;;  %v4614_v7 = vunpack.i.l.bf16 %v5787_v29  ;;  %v2390_v36 = vld [vmem:[%s6136_s26 + $0x8] sm:$0xff] }
0x274d   :  { %4090 = vmatmul.mubr.f32.gmra.mrb[16].mxu0 %v2113_v41  ;;  %v2053_v20 = vsel %vm74_vm0, %v2041_v55, %v4589_v43  ;;  %v2054_v22 = vsel %vm74_vm0, %v2042_v12, %v4590_v47  ;;  %v4620_v3 = vunpack.i.h.bf16 %v5800_v56  ;;  %v4619_v16 = vunpack.i.l.bf16 %v5800_v56  ;;  %v2473_v12 = vld [vmem:[%s6137_s30] sm:$0xff] }
0x274e   :  { %v4633_v11 = vpop.permute.xlu1 %4632  ;;  %4092 = vmatprep.mubr.f32.mxu0 %v2114_v13  ;;  %v2066_v62 = vsel %vm2057_vm5, %v2053_v20, %v4604_v19  ;;  %v2067_v10 = vsel %vm2057_vm5, %v2054_v22, %v4605_v48  ;;  %v2044_v8 = vsel %vm77_vm4, %v5668_v40, %v4615_v60  ;;  %v2043_v26 = vsel %vm77_vm4, %v5603_v21, %v4614_v7  ;;  %v2391_v48 = vld [vmem:[%s6136_s26 + $0x10] sm:$0xff]  ;;  %v5885_v60 = vld [vmem:[%s6138_s4] ss:$0 sm:$0xff] }
0x274f   :  { %v4630_v54 = vunpack.i.h.bf16 %v4628_v18  ;;  %v4629_v32 = vunpack.i.l.bf16 %v4628_v18  ;;  %v4625_v33 = vunpack.i.h.bf16 %v5808_v27  ;;  %v4624_v57 = vunpack.i.l.bf16 %v5808_v27  ;;  %v2389_v18 = vld [vmem:[%s6136_s26] sm:$0xff] }
0x2750   :  { %v4635_v31 = vunpack.i.h.bf16 %v4633_v11  ;;  %v4634_v51 = vunpack.i.l.bf16 %v4633_v11  ;;  %v4794_v19 = vmov 0  }
0x2751   :  { %4093 = vmatmul.mubr.f32.gmra.mrb[18].mxu0 %v2115_v49  ;;  %v4426_v49 = vpack.c.bf16 %v2390_v36, %v2389_v18  ;;  %4666 = vset.pattern.permute.xlu1 %v4794_v19 }
0x2752   :  { %2476 = vperm.xlu1 %4666, %v2473_v12   ;;  %4667 = vset.pattern.permute.xlu0 %v4794_v19 }
0x2753   :  { %v4638_v24 = vpop.permute.xlu0 %4637  ;;  %v4643_v0 = vpop.permute.xlu1 %4642  ;;  %4427 = vmatpush3.bf16.msra.mxu1 %v4426_v49 }
0x2754   :  { %v4640_v63 = vunpack.i.h.bf16 %v4638_v24  ;;  %v4639_v25 = vunpack.i.l.bf16 %v4638_v24  ;;  %v4645_v17 = vunpack.i.h.bf16 %v4643_v0  ;;  %v4644_v28 = vunpack.i.l.bf16 %v4643_v0  ;;  %4105 = vmatprep.subr.mxu1 %v4784_v1  ;;  %v3477_v24 = vld [vmem:[%s6139_s2 + $0x1] ss:$0 sm:$0xff] }
0x2756   :  { %v2079_v29 = vsel %vm134_vm2, %v2067_v10, %v4640_v63  ;;  %v2078_v6 = vsel %vm134_vm2, %v2066_v62, %v4639_v25  ;;  %v2055_v50 = vsel %vm74_vm0, %v2043_v26, %v4644_v28  ;;  %v2056_v44 = vsel %vm74_vm0, %v2044_v8, %v4645_v17  ;;  %v3476_v25 = vld [vmem:[%s6139_s2] ss:$0 sm:$0xff]  ;;  %v3481_v62 = vld [vmem:[%s6139_s2 + $0x5] ss:$0 sm:$0xff]  ;;  %v3480_v26 = vld [vmem:[%s6139_s2 + $0x4] ss:$0 sm:$0xff] }
0x2757   :  { %v4648_v35 = vpop.permute.xlu0 %4647  ;;  %v2091_v21 = vsel %vm2082_vm6, %v2078_v6, %v4619_v16  ;;  %v2092_v56 = vsel %vm2082_vm6, %v2079_v29, %v4620_v3  ;;  %v2068_v4 = vsel %vm2057_vm5, %v2055_v50, %v4624_v57  ;;  %v2069_v52 = vsel %vm2057_vm5, %v2056_v44, %v4625_v33  ;;  %v4658_v46 = vpop.permute.xlu1 %4657  ;;  %4106 = vmatpush3.msra.mxu1 %v2391_v48  ;;  %v3479_v29 = vld [vmem:[%s6139_s2 + $0x3] ss:$0 sm:$0xff]  ;;  %v3483_v57 = vld [vmem:[%s6139_s2 + $0x7] ss:$0 sm:$0xff]  ;;  %v3487_v48 = vld [vmem:[%s6139_s2 + $0xb] ss:$0 sm:$0xff] }
0x2758   :  { %v4650_v34 = vunpack.i.h.bf16 %v4648_v35  ;;  %v4649_v40 = vunpack.i.l.bf16 %v4648_v35  ;;  %v4660_v23 = vunpack.i.h.bf16 %v4658_v46  ;;  %v4659_v37 = vunpack.i.l.bf16 %v4658_v46  ;;  %4428 = vmatprep.subr.bf16.mxu1 %v4785_v2 }
0x2759   :  { %v2080_v61 = vsel %vm134_vm2, %v2068_v4, %v4634_v51  ;;  %v2081_v41 = vsel %vm134_vm2, %v2069_v52, %v4635_v31 }
0x275a   :  { %v2103_v39 = vsel %vm142_vm3, %v2091_v21, %v4649_v40  ;;  %v2104_v58 = vsel %vm142_vm3, %v2092_v56, %v4650_v34  ;;  %v3482_v56 = vld [vmem:[%s6139_s2 + $0x6] ss:$0 sm:$0xff] }
0x275b   :  { %v4653_v42 = vpop.permute.xlu0 %4652  ;;  %v2116_v27 = vsel %vm2107_vm7, %v2103_v39, %v4629_v32  ;;  %v2117_v14 = vsel %vm2107_vm7, %v2104_v58, %v4630_v54  ;;  %v3478_v32 = vld [vmem:[%s6139_s2 + $0x2] ss:$0 sm:$0xff] }
0x275c   :  { %v4655_v45 = vunpack.i.h.bf16 %v4653_v42  ;;  %v4654_v9 = vunpack.i.l.bf16 %v4653_v42  ;;  %4095 = vmatprep.mubr.f32.mxu0 %v2116_v27 }
0x275d   :  { %4096 = vmatmul.mubr.f32.gmra.mrb[20].mxu0 %v2117_v14 }
0x275e   :  { %v2093_v59 = vsel %vm2082_vm6, %v2080_v61, %v4654_v9  ;;  %v2094_v53 = vsel %vm2082_vm6, %v2081_v41, %v4655_v45 }
0x275f   :  { %v4663_v13 = vpop.permute.xlu0 %4662  ;;  %v2105_v11 = vsel %vm142_vm3, %v2093_v59, %v4659_v37  ;;  %v2106_v15 = vsel %vm142_vm3, %v2094_v53, %v4660_v23  ;;  %v3485_v59 = vld [vmem:[%s6139_s2 + $0x9] ss:$0 sm:$0xff] }
0x2760   :  { %v4665_v5 = vunpack.i.h.bf16 %v4663_v13  ;;  %v4664_v38 = vunpack.i.l.bf16 %v4663_v13 }
0x2762   :  { %v2118_v47 = vsel %vm2107_vm7, %v2105_v11, %v4664_v38  ;;  %v2119_v43 = vsel %vm2107_vm7, %v2106_v15, %v4665_v5  ;;  %v3484_v5 = vld [vmem:[%s6139_s2 + $0x8] ss:$0 sm:$0xff] }
0x2763   :  { %4098 = vmatprep.mubr.f32.mxu0 %v2118_v47 }
0x2764   :  { %4099 = vmatmul.mubr.f32.gmra.mrb[22].mxu0 %v2119_v43 }
0x2818   :  { %v4085_v55 = vpop.f32.mrb[12].mxu0 }
0x2819   :  { %v2209_v7 = vpop.f32.mrb[13].mxu0  ;;  %v2215_v20 = vadd.f32 %v4085_v55, %v5885_v60  ;;  %v3486_v55 = vld [vmem:[%s6139_s2 + $0xa] ss:$0 sm:$0xff] }
0x281a   :  { %v2210_v0 = vadd.f32 %v5885_v60, %v2209_v7 }
0x281b   :  { %v2353_v17 = vadd.f32 %v3477_v24, %v2215_v20 }
0x281c   :  { %v4088_v22 = vpop.f32.mrb[14].mxu0  ;;  %v2352_v10 = vadd.f32 %v3476_v25, %v2210_v0 }
0x281d   :  { %v2219_v63 = vpop.f32.mrb[15].mxu0  ;;  %v2225_v3 = vadd.f32 %v4088_v22, %v5885_v60  ;;  %v2366_v44 = vsel %vm2364_vm8, %v2353_v17, -inf }
0x281e   :  { %v2220_v6 = vadd.f32 %v5885_v60, %v2219_v63  ;;  %v2365_v34 = vsel %vm2364_vm8, %v2352_v10, -inf }
0x281f   :  { %v2355_v40 = vadd.f32 %v3479_v29, %v2225_v3  ;;  %v2481_v3 = vld [vmem:[%s6099_s9 + $0x8] sm:$0xff] }
0x2820   :  { %v4091_v28 = vpop.f32.mrb[16].mxu0  ;;  %v2354_v4 = vadd.f32 %v3478_v32, %v2220_v6  ;;  %v2477_v32 = vpop.permute.xlu1 %2476 }
0x2821   :  { %v2235_v16 = vadd.f32 %v4091_v28, %v5885_v60  ;;  %v2229_v8 = vpop.f32.mrb[17].mxu0  ;;  %v2368_v14 = vsel %vm2364_vm8, %v2355_v40, -inf  ;;  %v3490_v40 = vld [vmem:[%s6103_s10] ss:$0 sm:$0xff] }
0x2822   :  { %v2230_v54 = vadd.f32 %v5885_v60, %v2229_v8  ;;  %v2367_v9 = vsel %vm2364_vm8, %v2354_v4, -inf  ;;  %v2563_v8 = vld [vmem:[%s6100_s11] sm:$0xff] }
0x2823   :  { %v2357_v50 = vadd.f32 %v3481_v62, %v2235_v16  ;;  %2565 = vrot.lane.b32.xlu0 %v2563_v8, %s4790_s24 }
0x2824   :  { %v2356_v35 = vadd.f32 %v3480_v26, %v2230_v54  ;;  %v4094_v33 = vpop.f32.mrb[18].mxu0  ;;  %v3488_v26 = vld [vmem:[%s6101_s7] ss:$0 sm:$0xff] }
0x2825   :  { %v2371_v31 = vsel %vm2364_vm8, %v2357_v50, -inf  ;;  %v2245_v51 = vadd.f32 %v4094_v33, %v5885_v60  ;;  %v2239_v21 = vpop.f32.mrb[19].mxu0  ;;  %v2571_v33 = vld [vmem:[%s6102_s13 + $0x8] sm:$0xff] }
0x2826   :  { %v2372_v52 = vmax.f32 %v2366_v44, %v2371_v31  ;;  %v2369_v46 = vsel %vm2364_vm8, %v2356_v35, -inf  ;;  %v2240_v39 = vadd.f32 %v5885_v60, %v2239_v21  ;;  %v2570_v35 = vld [vmem:[%s6102_s13] sm:$0xff] }
0x2827   :  { %v2370_v58 = vmax.f32 %v2365_v34, %v2369_v46  ;;  %v2359_v42 = vadd.f32 %v3483_v57, %v2245_v51  ;;  %v4432_v57 = vpack.c.bf16 %v2571_v33, %v2570_v35  ;;  %v2572_v34 = vld [vmem:[%s6102_s13 + $0x10] sm:$0xf]  ;;  %v5987_v46 = vld [vmem:[%s6104_s12] sm:$0xff] }
0x2828   :  { %v2358_v27 = vadd.f32 %v3482_v56, %v2240_v39  ;;  %vm2961_vm14 = vcmp.gt.f32.partialorder %v5987_v46, 0.0 }
0x2829   :  { %v2375_v45 = vsel %vm2364_vm8, %v2359_v42, -inf  ;;  %v2733_v42 = vld [vmem:[%s6105_s15] sm:$0xff] }
0x282a   :  { %v2376_v23 = vmax.f32 %v2368_v14, %v2375_v45  ;;  %v2373_v37 = vsel %vm2364_vm8, %v2358_v27, -inf  ;;  %v2734_v27 = vld [vmem:[%s6105_s15 + $0x8] sm:$0xff]  ;;  %v3494_v45 = vld [vmem:[%s6106_s14] ss:$0 sm:$0xff] }
0x282b   :  { %v2374_v61 = vmax.f32 %v2367_v9, %v2373_v37  ;;  %v4435_v14 = vpack.c.bf16 %v2734_v27, %v2733_v42 }
0x2830   :  { %v4097_v41 = vpop.f32.mrb[20].mxu0 }
0x2831   :  { %v2255_v53 = vadd.f32 %v4097_v41, %v5885_v60  ;;  %v2249_v13 = vpop.f32.mrb[21].mxu0 }
0x2832   :  { %v2250_v38 = vadd.f32 %v5885_v60, %v2249_v13  ;;  %v2887_v13 = vld [vmem:[%s6107_s17 + $0x8] sm:$0xff] }
0x2833   :  { %v2361_v11 = vadd.f32 %v3485_v59, %v2255_v53  ;;  %v2886_v53 = vld [vmem:[%s6107_s17] sm:$0xff] }
0x2834   :  { %v2360_v15 = vadd.f32 %v3484_v5, %v2250_v38  ;;  %v4438_v5 = vpack.c.bf16 %v2887_v13, %v2886_v53  ;;  %v3505_v38 = vld [vmem:[%s6108_s19 + $0x1] ss:$0 sm:$0xff] }
0x2835   :  { %v2379_v47 = vsel %vm2364_vm8, %v2361_v11, -inf  ;;  %3152 = vrot.lane.b32.xlu0 %v3505_v38, %s4790_s24  ;;  %v3497_v11 = vld [vmem:[%s6109_s16] ss:$0 sm:$0xff] }
0x2836   :  { %v2380_v43 = vmax.f32 %v2372_v52, %v2379_v47  ;;  %v2377_v18 = vsel %vm2364_vm8, %v2360_v15, -inf }
0x2837   :  { %v2378_v36 = vmax.f32 %v2370_v58, %v2377_v18  ;;  %v4100_v49 = vpop.f32.mrb[22].mxu0 }
0x2838   :  { %v2265_v19 = vadd.f32 %v4100_v49, %v5885_v60  ;;  %v2259_v12 = vpop.f32.mrb[23].mxu0 }
0x2839   :  { %v2385_v7 = vmax.f32 %v2378_v36, %v2380_v43  ;;  %v2260_v20 = vadd.f32 %v5885_v60, %v2259_v12  ;;  %v2480_v60 = vld [vmem:[%s6099_s9] sm:$0xff] }
0x283a   :  { %v2363_v22 = vadd.f32 %v3487_v48, %v2265_v19  ;;  %v4429_v16 = vpack.c.bf16 %v2481_v3, %v2480_v60  ;;  %v2962_v19 = vld [vmem:[%s6110_s18] sm:$0x1] }
0x283b   :  { %v2362_v24 = vadd.f32 %v3486_v55, %v2260_v20  ;;  %v3502_v55 = vld [vmem:[%s6108_s19] ss:$0 sm:$0xff] }
0x283c   :  { %v2383_v0 = vsel %vm2364_vm8, %v2363_v22, -inf }
0x283d   :  { %v2384_v63 = vmax.f32 %v2376_v23, %v2383_v0  ;;  %v2381_v25 = vsel %vm2364_vm8, %v2362_v24, -inf  ;;  %v3068_v24 = vld [vmem:[%s6110_s18 + $0x1] sm:$0x1] }
0x283e   :  { %v2382_v17 = vmax.f32 %v2374_v61, %v2381_v25 }
0x2840   :  { %v2386_v28 = vmax.f32 %v2382_v17, %v2384_v63 }
0x2842   :  { %v2387_v62 = vmax.f32 %v2385_v7, %v2386_v28  ;;  %v3048_v28 = vlaneseq }
0x2844   :  { %v2388_v10 = vmax.f32 %v2387_v62, 0.0  ;;  %v3049_v62 = vshrl.u32 %v3048_v28, 7 }
0x2846   :  { %4108 = vmatmul.mubr.msk.f32.vlgmr.msra.gmra.mrb[12].mxu1 %vm2364_vm8, %v2388_v10  ;;  %v3050_v10 = vsub.s32 0, %v3049_v62 }
0x2847   :  { %4114 = vmatprep.mubr.msk.f32.mxu1 %vm4787_vm1, %v4784_v1  ;;  %4430 = vmatpush3.bf16.msra.mxu1 %v4429_v16 }
0x2848   :  { %4431 = vmatprep.subr.bf16.mxu1 %v4785_v2 }
0x2895   :  { %v2566_v56 = vpop.permute.xlu0 %2565 }
0x28a7   :  { %v3153_v49 = vpop.permute.xlu0 %3152 }
0x2919   :  { %v2468_v29 = vpop.f32.mrb[12].mxu1 }
0x291a   :  { %v2469_v6 = vadd.f32 %v3488_v26, %v2468_v29  ;;  %v4109_v54 = vpop.f32.mrb[13].mxu1 }
0x291c   :  { %4764 = vtanh.f32 %v2469_v6 }
0x2926   :  { %v4765_v50 = vpop.eup %4764 }
0x2927   :  { %v2479_v44 = vmul.f32 %v4765_v50, %v2477_v32 }
0x2929   :  { %4115 = vmatmul.mubr.msk.f32.vlgmr.msra.gmra.mrb[14].mxu1 %vm77_vm4, %v2479_v44 }
0x292a   :  { %4123 = vmatprep.mubr.msk.f32.mxu1 %vm4787_vm1, %v4784_v1  ;;  %4433 = vmatpush3.bf16.msra.mxu1 %v4432_v57 }
0x292b   :  { %4121 = vmatprep.subr.mxu1 %v4784_v1 }
0x292e   :  { %4122 = vmatpush3.msk.msra.mxu1 %vm2577_vm9, %v2572_v34 }
0x292f   :  { %4126 = vmatprep.subr.mxu1 %v4784_v1 }
0x29fc   :  { %v2558_v31 = vpop.f32.mrb[14].mxu1 }
0x29fd   :  { %v2559_v51 = vadd.f32 %v3490_v40, %v2558_v31  ;;  %v4116_v21 = vpop.f32.mrb[15].mxu1 }
0x29ff   :  { %4766 = vtanh.f32 %v2559_v51 }
0x2a09   :  { %v4767_v4 = vpop.eup %4766 }
0x2a0a   :  { %v2568_v52 = vsel %vm77_vm4, %v4767_v4, %v2566_v56 }
0x2a0b   :  { %4124 = vmatmul.mubr.msk.f32.vlgmr.msra.gmra.mrb[16].mxu1 %vm2573_vm10, %v2568_v52 }
0x2a0c   :  { %4128 = vmatprep.mubr.msk.f32.mxu1 %vm4787_vm1, %v4784_v1 }
0x2ade   :  { %v2647_v39 = vpop.f32.mrb[16].mxu1 }
0x2adf   :  { %v4125_v58 = vpop.f32.mrb[17].mxu1  ;;  %4127 = vmatpush3.msra.mxu1 %v2647_v39 }
0x2ae0   :  { %4129 = vmatmul.mubr.msk.f32.vlgmr.msra.gmra.mrb[18].mxu1 %vm2658_vm11, %v5987_v46  ;;  %4434 = vmatprep.subr.bf16.mxu1 %v4785_v2 }
0x2ae1   :  { %4135 = vmatprep.mubr.msk.f32.mxu1 %vm4787_vm1, %v4784_v1  ;;  %4436 = vmatpush3.bf16.msra.mxu1 %v4435_v14 }
0x2ae2   :  { %4138 = vmatprep.subr.mxu1 %v4784_v1 }
0x2bb3   :  { %v2728_v9 = vpop.f32.mrb[18].mxu1 }
0x2bb4   :  { %v2729_v23 = vadd.f32 %v3494_v45, %v2728_v9  ;;  %v4130_v37 = vpop.f32.mrb[19].mxu1 }
0x2bb6   :  { %4768 = vtanh.f32 %v2729_v23 }
0x2bc0   :  { %v4769_v61 = vpop.eup %4768 }
0x2bc1   :  { %4136 = vmatmul.mubr.msk.f32.vlgmr.msra.gmra.mrb[20].mxu1 %vm77_vm4, %v4769_v61  ;;  %v3340_v61 = vld [vmem:[%s6111_s21] sm:$0xff] }
0x2bc2   :  { %4140 = vmatprep.mubr.msk.f32.mxu1 %vm4787_vm1, %v4784_v1 }
0x2c94   :  { %v2804_v41 = vpop.f32.mrb[20].mxu1 }
0x2c95   :  { %v4137_v59 = vpop.f32.mrb[21].mxu1  ;;  %4139 = vmatpush3.msra.mxu1 %v2804_v41  ;;  %v3341_v41 = vld [vmem:[%s6111_s21 + $0x8] sm:$0xff] }
0x2c96   :  { %4141 = vmatmul.mubr.msk.f32.vlgmr.msra.gmra.mrb[22].mxu1 %vm2658_vm11, %v5987_v46  ;;  %4437 = vmatprep.subr.bf16.mxu1 %v4785_v2  ;;  %v4441_v59 = vpack.c.bf16 %v3341_v41, %v3340_v61 }
0x2c97   :  { %4147 = vmatprep.mubr.msk.f32.mxu1 %vm4787_vm1, %v4784_v1  ;;  %4439 = vmatpush3.bf16.msra.mxu1 %v4438_v5 }
0x2c98   :  { %4150 = vmatprep.subr.mxu1 %v4784_v1 }
0x2d69   :  { %v2881_v15 = vpop.f32.mrb[22].mxu1 }
0x2d6a   :  { %v2882_v47 = vadd.f32 %v3497_v11, %v2881_v15  ;;  %v4142_v43 = vpop.f32.mrb[23].mxu1  ;;  %v3509_v11 = vld [vmem:[%s6113_s22] ss:$0 sm:$0xff] }
0x2d6c   :  { %4770 = vtanh.f32 %v2882_v47 }
0x2d76   :  { %v4771_v18 = vpop.eup %4770 }
0x2d77   :  { %4148 = vmatmul.mubr.msk.f32.vlgmr.msra.gmra.mrb[24].mxu1 %vm77_vm4, %v4771_v18 }
0x2d78   :  { %4152 = vmatprep.mubr.msk.f32.mxu1 %vm4787_vm1, %v4784_v1 }
0x2e4a   :  { %v6029_v36 = vpop.f32.mrb[24].mxu1 }
0x2e4b   :  { %3070 = vrot.lane.b32.xlu1 %v6029_v36, %s4793_s27  ;;  %4151 = vmatpush3.xpose.msk.msra.mxu1 %vm77_vm4, %v6029_v36  ;;  %v4149_v48 = vpop.f32.mrb[25].mxu1  ;;  %v3155_v12 = vmul.f32 %v3153_v49, %v6029_v36  ;;  %v3044_v7 = vmul.f32 %v3502_v55, %v6029_v36 }
0x2e4c   :  { %4155 = vmatprep.subr.mxu1 %v4784_v1 }
0x2e4d   :  { %v3045_v20 = vsel %vm77_vm4, %v3044_v7, 0.0 }
0x2e4e   :  { %4153 = vmatmul.mubr.msk.f32.vlgmr.msra.gmra.mrb[26].mxu1 %vm77_vm4, %v2962_v19 }
0x2e4f   :  { %3157 = vrot.lane.b32.xlu1 %v3155_v12, %s4793_s27  ;;  %4157 = vmatprep.mubr.msk.f32.mxu1 %vm4787_vm1, %v4784_v1 }
0x2e73   :  { %3046 = vadd.xlane.f32.xlu1 %v3045_v20 }
0x2ebd   :  { %v3071_v22 = vpop.permute.xlu1 %3070 }
0x2ebe   :  { %4156 = vmatpush3.xpose.msk.msra.mxu1 %vm77_vm4, %v3071_v22 }
0x2ebf   :  { %4160 = vmatprep.subr.mxu1 %v4784_v1 }
0x2ec1   :  { %v3158_v0 = vpop.permute.xlu1 %3157  ;;  %4158 = vmatmul.mubr.msk.f32.vlgmr.msra.gmra.mrb[28].mxu1 %vm77_vm4, %v3068_v24 }
0x2ec2   :  { %v3160_v63 = vsel %vm77_vm4, %v3158_v0, 0.0  ;;  %4161 = vmatpush3.msra.mxu1 %v3071_v22  ;;  %4162 = vmatprep.mubr.msk.f32.mxu1 %vm4787_vm1, %v4784_v1 }
0x2ec3   :  { %3161 = vadd.xlane.f32.xlu0 %v3160_v63  ;;  %4165 = vmatprep.subr.mxu1 %v4784_v1 }
0x2f00   :  { %v3047_v3 = vpop.xlane.xlu1 %3046 }
0x2f21   :  { %v3036_v25 = vpop.f32.mrb[26].mxu1 }
0x2f22   :  { %v4154_v17 = vpop.f32.mrb[27].mxu1  ;;  %v3051_v60 = vrot.slane %v3036_v25, %v3050_v10 }
0x2f24   :  { %v3052_v16 = vadd.f32 %v3051_v60, %v3047_v3 }
0x2f26   :  { %v3054_v54 = vmul.f32 0.2, %v3052_v16  ;;  %vm3053_vm12 = vcmp.gt.f32.partialorder %v3052_v16, 0.0 }
0x2f28   :  { %v3055_v35 = vsel %vm3053_vm12, %v3052_v16, %v3054_v54 }
0x2f29   :  { %v3056_v34 = vsel %vm2961_vm14, %v3055_v35, -1e+30 }
0x2f2a   :  { %v3057_v40 = vsel %vm2658_vm11, %v3056_v34, -inf }
0x2f50   :  { %v3162_v6 = vpop.xlane.xlu0 %3161 }
0x2f94   :  { %v3143_v8 = vpop.f32.mrb[28].mxu1 }
0x2f95   :  { %v3166_v26 = vrot.slane %v3143_v8, %v3050_v10  ;;  %v4159_v29 = vpop.f32.mrb[29].mxu1 }
0x2f97   :  { %v3167_v32 = vadd.f32 %v3166_v26, %v3162_v6 }
0x2f99   :  { %v3169_v50 = vmul.f32 0.2, %v3167_v32  ;;  %vm3168_vm13 = vcmp.gt.f32.partialorder %v3167_v32, 0.0 }
0x2f9b   :  { %v3170_v44 = vsel %vm3168_vm13, %v3167_v32, %v3169_v50 }
0x2f9c   :  { %v3171_v33 = vsel %vm2961_vm14, %v3170_v44, -1e+30 }
0x2f9d   :  { %v3172_v57 = vsel %vm2658_vm11, %v3171_v33, -inf }
0x2f9e   :  { %3173 = vmax.xlane.f32.xlu0 %v3172_v57 }
0x2fa2   :  { %3058 = vmax.xlane.f32.xlu0 %v3057_v40 }
0x302b   :  { %v3174_v31 = vpop.xlane.xlu0 %3173 }
0x302c   :  { %v3175_v51 = vsub.f32 %v3171_v33, %v3174_v31 }
0x302e   :  { %v3176_v21 = vmul.f32 1.442695, %v3175_v51 }
0x302f   :  { %v3059_v56 = vpop.xlane.xlu0 %3058 }
0x3030   :  { %4772 = vpow2.f32 %v3176_v21  ;;  %v3060_v4 = vsub.f32 %v3056_v34, %v3059_v56 }
0x3032   :  { %v3061_v52 = vmul.f32 1.442695, %v3060_v4 }
0x3034   :  { %4774 = vpow2.f32 %v3061_v52 }
0x303a   :  { %v4773_v39 = vpop.eup %4772 }
0x303b   :  { %v3178_v46 = vsel %vm2658_vm11, %v4773_v39, 0.0 }
0x303c   :  { %3179 = vadd.xlane.f32.xlu1 %v3178_v46 }
0x303e   :  { %v4775_v58 = vpop.eup %4774 }
0x303f   :  { %v3063_v42 = vsel %vm2658_vm11, %v4775_v58, 0.0 }
0x3040   :  { %3064 = vadd.xlane.f32.xlu0 %v3063_v42 }
0x304d   :  { %1707 = vrot.lane.b32.xlu1 %v5497_v30, %s6135_s28 }
0x30c9   :  { %v3180_v27 = vpop.xlane.xlu1 %3179 }
0x30ca   :  { %4776 = vrcp.f32 %v3180_v27 }
0x30cd   :  { %v1708_v14 = vpop.permute.xlu1 %1707  ;;  %v3065_v45 = vpop.xlane.xlu0 %3064 }
0x30ce   :  { %1710 = vst.msk [vmem:[#allocation3] sm:$0xff] %vm74_vm0, %v1708_v14  ;;  %4778 = vrcp.f32 %v3065_v45 }
0x30d4   :  { %v4777_v9 = vpop.eup %4776 }
0x30d5   :  { %v3182_v23 = vmul.f32 %v4777_v9, %v4773_v39 }
0x30d7   :  { %4163 = vmatmul.mubr.msk.f32.vlgmr.msra.gmra.mrb[30].mxu1 %vm2658_vm11, %v3182_v23 }
0x30d8   :  { %4166 = vmatpush3.msra.mxu1 %v6029_v36  ;;  %4167 = vmatprep.mubr.msk.f32.mxu1 %vm4787_vm1, %v4784_v1  ;;  %v4779_v37 = vpop.eup %4778 }
0x30d9   :  { %4440 = vmatprep.subr.bf16.mxu1 %v4785_v2  ;;  %v3067_v30 = vmul.f32 %v4779_v37, %v4775_v58  ;;  %v3508_v2 = vld [vmem:[%s6112_s20] ss:$0 sm:$0xff] }
0x30df   :  { %4168 = vmatmul.mubr.msk.f32.vlgmr.msra.gmra.mrb[30].mxu1 %vm2658_vm11, %v3067_v30 }
0x30e0   :  { %4174 = vmatprep.mubr.msk.f32.mxu1 %vm4787_vm1, %v4784_v1  ;;  %4442 = vmatpush3.bf16.msra.mxu1 %v4441_v59 }
0x31b2   :  { %v3326_v53 = vpop.f32.mrb[30].mxu1 }
0x31b3   :  { %v3330_v13 = vmul.f32 0.5, %v3326_v53  ;;  %v4169_v5 = vpop.f32.mrb[31].mxu1 }
0x31b5   :  { %v3338_v38 = vadd.f32 %v3508_v2, %v3330_v13 }
0x31b7   :  { %4780 = vtanh.f32 %v3338_v38 }
0x31c1   :  { %v4781_v1 = vpop.eup %4780 }
0x31c2   :  { %4175 = vmatmul.mubr.msk.f32.vlgmr.msra.gmra.mrb[32].mxu1 %vm77_vm4, %v4781_v1 }
0x3295   :  { %v3418_v15 = vpop.f32.mrb[32].mxu1 }
0x3296   :  { %v3419_v47 = vadd.f32 %v3509_v11, %v3418_v15  ;;  %v4176_v43 = vpop.f32.mrb[33].mxu1 }
0x3298   :  { %3423 = vst.msk [vmem:[%s6114_s23] sm:$0xff] %vm3422_vm15, %v3419_v47 }

</bundles_post_ra>
